<compile_context>
chip_gen: v5e
topology: v5e:2x2
jax: 0.10.0
libtpu: 0.0.40
codegen_flags: <defaults>
</compile_context>

<pallas_src>
import jax
import jax.numpy as jnp
from jax.experimental import pallas as pl
from jax.experimental.pallas import tpu as pltpu

H1, H2 = 400, 300           # logical hidden dims (PyTorch module)
H1P, H2P = 512, 384         # padded to multiples of 128
OUT_LANES = 128             # lane-dense output: q1 -> lane 0, q2 -> lane 1


def _round_up(x, m):
    return (x + m - 1) // m * m


# ----------------------------------------------------------------------------
# Pallas kernel: both critic heads, three fused matmuls, one lane-dense output.
# ----------------------------------------------------------------------------
def _critic_kernel(xu_ref, w1_ref, b1_ref, w2_ref, b2_ref, w3_ref, b3_ref, out_ref):
    xu = xu_ref[...]                                           # (TM, IN_P) fp32

    # Layer 1 (both heads share the input): (TM, IN_P) @ (IN_P, 1024)
    h = jnp.dot(xu.astype(jnp.bfloat16), w1_ref[...],
                preferred_element_type=jnp.float32) + b1_ref[...]
    h = jnp.maximum(h, 0.0)                                    # fp32 epilogue

    # Layer 2 (block-diagonal): (TM, 1024) @ (1024, 768)
    h = jnp.dot(h.astype(jnp.bfloat16), w2_ref[...],
                preferred_element_type=jnp.float32) + b2_ref[...]
    h = jnp.maximum(h, 0.0)

    # Layer 3 (block-diagonal, lane-dense result): (TM, 768) @ (768, 128)
    out_ref[...] = jnp.dot(h.astype(jnp.bfloat16), w3_ref[...],
                           preferred_element_type=jnp.float32) + b3_ref[...]


# ----------------------------------------------------------------------------
# Parameter packing: PyTorch-style (in, out) fp32 weights -> fused, padded,
# bf16 block-diagonal weights + fp32 biases.  Padding is all zeros.
# ----------------------------------------------------------------------------
def pack_critic_params(params, state_dim, action_dim):
    in_dim = state_dim + action_dim
    in_p = _round_up(in_dim, 128)

    # Layer 1: columns [0:400] = critic1, [512:912] = critic2.
    w1f = jnp.zeros((in_p, 2 * H1P), jnp.float32)
    w1f = w1f.at[:in_dim, :H1].set(params["w1"])
    w1f = w1f.at[:in_dim, H1P:H1P + H1].set(params["w4"])
    b1f = jnp.zeros((1, 2 * H1P), jnp.float32)
    b1f = b1f.at[:, :H1].set(params["b1"])
    b1f = b1f.at[:, H1P:H1P + H1].set(params["b4"])

    # Layer 2: block-diagonal [w2 0; 0 w5].
    w2f = jnp.zeros((2 * H1P, 2 * H2P), jnp.float32)
    w2f = w2f.at[:H1, :H2].set(params["w2"])
    w2f = w2f.at[H1P:H1P + H1, H2P:H2P + H2].set(params["w5"])
    b2f = jnp.zeros((1, 2 * H2P), jnp.float32)
    b2f = b2f.at[:, :H2].set(params["b2"])
    b2f = b2f.at[:, H2P:H2P + H2].set(params["b5"])

    # Layer 3: q1 in lane 0, q2 in lane 1, rest zero (lane-dense output).
    w3f = jnp.zeros((2 * H2P, OUT_LANES), jnp.float32)
    w3f = w3f.at[:H2, 0].set(params["w3"][:, 0])
    w3f = w3f.at[H2P:H2P + H2, 1].set(params["w6"][:, 0])
    b3f = jnp.zeros((1, OUT_LANES), jnp.float32)
    b3f = b3f.at[:, 0].set(params["b3"][:, 0])
    b3f = b3f.at[:, 1].set(params["b6"][:, 0])

    return {
        "w1": w1f.astype(jnp.bfloat16), "b1": b1f,
        "w2": w2f.astype(jnp.bfloat16), "b2": b2f,
        "w3": w3f.astype(jnp.bfloat16), "b3": b3f,
    }


# ----------------------------------------------------------------------------
# Wrapper: concat + pad (layout plumbing in plain JAX), one pallas_call,
# slice q1/q2 back out of the lane-dense output.
# ----------------------------------------------------------------------------
def critic_forward(x, u, packed):
    """Returns (q1, q2), each (batch, 1), matching Critic.forward."""
    xu = jnp.concatenate([x, u], axis=1).astype(jnp.float32)
    B, in_dim = xu.shape

    w1, b1 = packed["w1"], packed["b1"]
    w2, b2 = packed["w2"], packed["b2"]
    w3, b3 = packed["w3"], packed["b3"]
    in_p = w1.shape[0]

    # Batch tiling: big batches -> 128-row tiles pipelined over resident
    # weights; small batches -> a single tile rounded up to the sublane (8).
    TM = 128 if B >= 128 else _round_up(B, 8)
    B_pad = _round_up(B, TM)
    n_tiles = B_pad // TM

    xu_p = jnp.zeros((B_pad, in_p), jnp.float32).at[:B, :in_dim].set(xu)

    def _resident(arr):  # same block every grid step -> stays in VMEM
        return pl.BlockSpec(arr.shape, lambda i: (0, 0))

    flops = 2 * B_pad * (in_p * w1.shape[1]
                         + w2.shape[0] * w2.shape[1]
                         + w3.shape[0] * w3.shape[1])
    bytes_accessed = int(
        xu_p.size * 4 + B_pad * OUT_LANES * 4
        + w1.size * 2 + w2.size * 2 + w3.size * 2
        + (b1.size + b2.size + b3.size) * 4)

    out = pl.pallas_call(
        _critic_kernel,
        out_shape=jax.ShapeDtypeStruct((B_pad, OUT_LANES), jnp.float32),
        grid=(n_tiles,),
        in_specs=[
            pl.BlockSpec((TM, in_p), lambda i: (i, 0)),
            _resident(w1), _resident(b1),
            _resident(w2), _resident(b2),
            _resident(w3), _resident(b3),
        ],
        out_specs=pl.BlockSpec((TM, OUT_LANES), lambda i: (i, 0)),
        compiler_params=pltpu.CompilerParams(
            dimension_semantics=("parallel",)),
        cost_estimate=pl.CostEstimate(
            flops=flops, transcendentals=0, bytes_accessed=bytes_accessed),
    )(xu_p, w1, b1, w2, b2, w3, b3)

    q1 = out[:B, 0:1]
    q2 = out[:B, 1:2]
    return q1, q2


# ----------------------------------------------------------------------------
# Deterministic parameter init (PyTorch Linear default: U(-1/sqrt(fan_in), ...)),
# stored transposed as (in, out) with (1, out) biases.
# ----------------------------------------------------------------------------
def init_critic_params(key, state_dim, action_dim):
    in_dim = state_dim + action_dim
    dims = [
        ("w1", "b1", in_dim, 400),
        ("w2", "b2", 400, 300),
        ("w3", "b3", 300, 1),
        ("w4", "b4", in_dim, 400),
        ("w5", "b5", 400, 300),
        ("w6", "b6", 300, 1),
    ]
    params = {}
    for wname, bname, fan_in, fan_out in dims:
        key, kw, kb = jax.random.split(key, 3)
        bound = 1.0 / jnp.sqrt(jnp.float32(fan_in))
        params[wname] = jax.random.uniform(
            kw, (fan_in, fan_out), jnp.float32, -bound, bound)
        params[bname] = jax.random.uniform(
            kb, (1, fan_out), jnp.float32, -bound, bound)
    return params


# Pure-JAX fp32 reference for correctness checking.
def critic_reference(x, u, p):
    xu = jnp.concatenate([x, u], axis=1)
    h1 = jnp.maximum(xu @ p["w1"] + p["b1"], 0.0)
    h1 = jnp.maximum(h1 @ p["w2"] + p["b2"], 0.0)
    q1 = h1 @ p["w3"] + p["b3"]
    h2 = jnp.maximum(xu @ p["w4"] + p["b4"], 0.0)
    h2 = jnp.maximum(h2 @ p["w5"] + p["b5"], 0.0)
    q2 = h2 @ p["w6"] + p["b6"]
    return q1, q2


if __name__ == "__main__":
    state_dim, action_dim, batch = 16, 8, 8

    key = jax.random.PRNGKey(0)
    kx, ku, kp = jax.random.split(key, 3)
    x = jax.random.normal(kx, (batch, state_dim), jnp.float32)
    u = jax.random.normal(ku, (batch, action_dim), jnp.float32)
    params = init_critic_params(kp, state_dim, action_dim)
    packed = pack_critic_params(params, state_dim, action_dim)

    q1, q2 = jax.block_until_ready(critic_forward(x, u, packed))

    q1_ref, q2_ref = critic_reference(x, u, params)
    assert q1.shape == (batch, 1) and q2.shape == (batch, 1)
    # bf16 MXU operands (fp32 accumulate) -> slightly looser tolerance vs fp32 ref.
    assert jnp.allclose(q1, q1_ref, atol=5e-2, rtol=5e-2)
    assert jnp.allclose(q2, q2_ref, atol=5e-2, rtol=5e-2)

    print("KERNEL_OK")
</pallas_src>

<mosaic_0001>
module attributes {stable_mosaic.version = 11 : i64} {
  func.func @_critic_kernel(%arg0: i32, %arg1: memref<8x128xf32, #tpu.memory_space<vmem>>, %arg2: memref<128x1024xbf16, #tpu.memory_space<vmem>>, %arg3: memref<1x1024xf32, #tpu.memory_space<vmem>>, %arg4: memref<1024x768xbf16, #tpu.memory_space<vmem>>, %arg5: memref<1x768xf32, #tpu.memory_space<vmem>>, %arg6: memref<768x128xbf16, #tpu.memory_space<vmem>>, %arg7: memref<1x128xf32, #tpu.memory_space<vmem>>, %arg8: memref<8x128xf32, #tpu.memory_space<vmem>>) attributes {dimension_semantics = [#tpu.dimension_semantics<parallel>], iteration_bounds = array<i64: 1>, scalar_prefetch = 0 : i64, scratch_operands = 0 : i64, tpu.core_type = #tpu.core_type<tc>, window_params = [{transform_indices = @transform_0, window_bounds = array<i64: 8, 128>}, {pipeline_mode = #tpu.pipeline_mode<synchronous>, transform_indices = @transform_1, window_bounds = array<i64: 128, 1024>}, {pipeline_mode = #tpu.pipeline_mode<synchronous>, transform_indices = @transform_2, window_bounds = array<i64: 1, 1024>}, {pipeline_mode = #tpu.pipeline_mode<synchronous>, transform_indices = @transform_3, window_bounds = array<i64: 1024, 768>}, {pipeline_mode = #tpu.pipeline_mode<synchronous>, transform_indices = @transform_4, window_bounds = array<i64: 1, 768>}, {pipeline_mode = #tpu.pipeline_mode<synchronous>, transform_indices = @transform_5, window_bounds = array<i64: 768, 128>}, {pipeline_mode = #tpu.pipeline_mode<synchronous>, transform_indices = @transform_6, window_bounds = array<i64: 1, 128>}, {transform_indices = @transform_7, window_bounds = array<i64: 8, 128>}]} {
    %c0 = arith.constant 0 : index
    %c0_0 = arith.constant 0 : index
    %0 = vector.load %arg1[%c0, %c0_0] : memref<8x128xf32, #tpu.memory_space<vmem>>, vector<8x128xf32>
    %1 = arith.truncf %0 : vector<8x128xf32> to vector<8x128xbf16>
    %c0_1 = arith.constant 0 : index
    %c0_2 = arith.constant 0 : index
    %2 = vector.load %arg2[%c0_1, %c0_2] : memref<128x1024xbf16, #tpu.memory_space<vmem>>, vector<128x1024xbf16>
    %cst = arith.constant dense<0.000000e+00> : vector<8x1024xf32>
    %3 = tpu.matmul %1, %2, %cst {dimension_numbers = #tpu.dot_dimension_numbers<[1], [0], [0], [1], [0, 0, 1, 1], [], []>} : vector<8x128xbf16>, vector<128x1024xbf16>, vector<8x1024xf32> -> vector<8x1024xf32>
    %c0_3 = arith.constant 0 : index
    %c0_4 = arith.constant 0 : index
    %4 = vector.load %arg3[%c0_3, %c0_4] : memref<1x1024xf32, #tpu.memory_space<vmem>>, vector<1x1024xf32>
    %5 = vector.broadcast %4 : vector<1x1024xf32> to vector<8x1024xf32>
    %6 = arith.addf %3, %5 : vector<8x1024xf32>
    %cst_5 = arith.constant 0.000000e+00 : f32
    %7 = vector.broadcast %cst_5 : f32 to vector<8x1024xf32>
    %8 = arith.maximumf %6, %7 : vector<8x1024xf32>
    %9 = arith.truncf %8 : vector<8x1024xf32> to vector<8x1024xbf16>
    %c0_6 = arith.constant 0 : index
    %c0_7 = arith.constant 0 : index
    %10 = vector.load %arg4[%c0_6, %c0_7] : memref<1024x768xbf16, #tpu.memory_space<vmem>>, vector<1024x768xbf16>
    %cst_8 = arith.constant dense<0.000000e+00> : vector<8x768xf32>
    %11 = tpu.matmul %9, %10, %cst_8 {dimension_numbers = #tpu.dot_dimension_numbers<[1], [0], [0], [1], [0, 0, 1, 1], [], []>} : vector<8x1024xbf16>, vector<1024x768xbf16>, vector<8x768xf32> -> vector<8x768xf32>
    %c0_9 = arith.constant 0 : index
    %c0_10 = arith.constant 0 : index
    %12 = vector.load %arg5[%c0_9, %c0_10] : memref<1x768xf32, #tpu.memory_space<vmem>>, vector<1x768xf32>
    %13 = vector.broadcast %12 : vector<1x768xf32> to vector<8x768xf32>
    %14 = arith.addf %11, %13 : vector<8x768xf32>
    %cst_11 = arith.constant 0.000000e+00 : f32
    %15 = vector.broadcast %cst_11 : f32 to vector<8x768xf32>
    %16 = arith.maximumf %14, %15 : vector<8x768xf32>
    %17 = arith.truncf %16 : vector<8x768xf32> to vector<8x768xbf16>
    %c0_12 = arith.constant 0 : index
    %c0_13 = arith.constant 0 : index
    %18 = vector.load %arg6[%c0_12, %c0_13] : memref<768x128xbf16, #tpu.memory_space<vmem>>, vector<768x128xbf16>
    %cst_14 = arith.constant dense<0.000000e+00> : vector<8x128xf32>
    %19 = tpu.matmul %17, %18, %cst_14 {dimension_numbers = #tpu.dot_dimension_numbers<[1], [0], [0], [1], [0, 0, 1, 1], [], []>} : vector<8x768xbf16>, vector<768x128xbf16>, vector<8x128xf32> -> vector<8x128xf32>
    %c0_15 = arith.constant 0 : index
    %c0_16 = arith.constant 0 : index
    %20 = vector.load %arg7[%c0_15, %c0_16] : memref<1x128xf32, #tpu.memory_space<vmem>>, vector<1x128xf32>
    %21 = vector.broadcast %20 : vector<1x128xf32> to vector<8x128xf32>
    %22 = arith.addf %19, %21 : vector<8x128xf32>
    %c0_17 = arith.constant 0 : index
    %c0_18 = arith.constant 0 : index
    %23 = vector.load %arg8[%c0_17, %c0_18] : memref<8x128xf32, #tpu.memory_space<vmem>>, vector<8x128xf32>
    tpu.vector_store %arg8[%c0_17, %c0_18], %22 {strides = array<i32>} : memref<8x128xf32, #tpu.memory_space<vmem>>, vector<8x128xf32>,
    return
  }
  func.func @transform_0(%arg0: i32) -> (i32, i32) {
    %c0_i32 = arith.constant 0 : i32
    %c0_i32_0 = arith.constant 0 : i32
    return %arg0, %c0_i32 : i32, i32
  }
  func.func @transform_1(%arg0: i32) -> (i32, i32) {
    %c0_i32 = arith.constant 0 : i32
    %c0_i32_0 = arith.constant 0 : i32
    %c0_i32_1 = arith.constant 0 : i32
    return %c0_i32, %c0_i32_0 : i32, i32
  }
  func.func @transform_2(%arg0: i32) -> (i32, i32) {
    %c0_i32 = arith.constant 0 : i32
    %c0_i32_0 = arith.constant 0 : i32
    %c0_i32_1 = arith.constant 0 : i32
    return %c0_i32, %c0_i32_0 : i32, i32
  }
  func.func @transform_3(%arg0: i32) -> (i32, i32) {
    %c0_i32 = arith.constant 0 : i32
    %c0_i32_0 = arith.constant 0 : i32
    %c0_i32_1 = arith.constant 0 : i32
    return %c0_i32, %c0_i32_0 : i32, i32
  }
  func.func @transform_4(%arg0: i32) -> (i32, i32) {
    %c0_i32 = arith.constant 0 : i32
    %c0_i32_0 = arith.constant 0 : i32
    %c0_i32_1 = arith.constant 0 : i32
    return %c0_i32, %c0_i32_0 : i32, i32
  }
  func.func @transform_5(%arg0: i32) -> (i32, i32) {
    %c0_i32 = arith.constant 0 : i32
    %c0_i32_0 = arith.constant 0 : i32
    %c0_i32_1 = arith.constant 0 : i32
    return %c0_i32, %c0_i32_0 : i32, i32
  }
  func.func @transform_6(%arg0: i32) -> (i32, i32) {
    %c0_i32 = arith.constant 0 : i32
    %c0_i32_0 = arith.constant 0 : i32
    %c0_i32_1 = arith.constant 0 : i32
    return %c0_i32, %c0_i32_0 : i32, i32
  }
  func.func @transform_7(%arg0: i32) -> (i32, i32) {
    %c0_i32 = arith.constant 0 : i32
    %c0_i32_0 = arith.constant 0 : i32
    return %arg0, %c0_i32 : i32, i32
  }
}

</mosaic_0001>

<bundles_post_ra>
// kernel: tpu_custom_call.1
= control target key start
LH: loop header
LB: loop body
LE: loop exit
PB: predicated region body
PF: predicated region fallthrough
CT: control target
= control target key end

     0   :  { %12 = vsyncpa [#allocation3], 0  ;;  %s6987_s0 = inlined_call_operand.hbm [shape: f32[8,128], index: 0, kind: input, shape index: {}]   ;;  %s6988_s1 = inlined_call_operand.hbm [shape: bf16[128,1024], index: 1, kind: input, shape index: {}]   ;;  %s6989_s2 = inlined_call_operand.hbm [shape: f32[1,1024], index: 2, kind: input, shape index: {}]   ;;  %s6990_s3 = inlined_call_operand.hbm [shape: bf16[1024,768], index: 3, kind: input, shape index: {}]   ;;  %s6991_s4 = inlined_call_operand.hbm [shape: f32[1,768], index: 4, kind: input, shape index: {}]   ;;  %s6992_s5 = inlined_call_operand.hbm [shape: bf16[768,128], index: 5, kind: input, shape index: {}]   ;;  %s6993_s6 = inlined_call_operand.hbm [shape: f32[1,128], index: 6, kind: input, shape index: {}]   ;;  %s6994_s7 = inlined_call_operand.hbm [shape: f32[8,128], index: 7, kind: output, shape index: {}]  }
   0x1   :  { %13 = vsyncpa [#allocation6], 0 }
   0x2   :  { %14 = vsyncpa [#allocation9], 0 }
   0x3   :  { %15 = vsyncpa [#allocation12], 0  ;;  %s32_s26 = sshll.u32 %s6988_s1, 4  ;;  %s33_s26 = int_to_ptr.hbm [resolvable:$true] %s32_s26 }
   0x4   :  { %16 = vsyncpa [#allocation4], 0  ;;  %s6791_s27 = smov [#allocation5]   ;;  %s56_s8 = sshll.u32 %s6990_s3, 4  ;;  %s57_s8 = int_to_ptr.hbm [resolvable:$true] %s56_s8 }
   0x5   :  { %s34_s28 = sshll.u32 %s6791_s27, 4  ;;  %s6792_s9 = smov 512   ;;  %s35_s28 = int_to_ptr.vmem [resolvable:$true] %s34_s28 }
   0x6   :  { %s6793_s10 = smov 32   ;;  %s6794_s11 = smov [#allocation8]  }
   0x7   :  { %40 = dma.hbm_to_vmem [thread:$0]  %s33_s26, 8192, %s35_s28, [#allocation6], %s6792_s9, %s6792_s9, %s6793_s10  }
   0x8   :  { %s58_s12 = sshll.u32 %s6794_s11, 4  ;;  %s6795_s13 = smov 384   ;;  %s59_s12 = int_to_ptr.vmem [resolvable:$true] %s58_s12 }
   0x9   :  { %s6796_s14 = smov 24   ;;  %s80_s16 = sshll.u32 %s6992_s5, 4  ;;  %s81_s16 = int_to_ptr.hbm [resolvable:$true] %s80_s16 }
   0xa   :  { %64 = dma.hbm_to_vmem [thread:$0]  %s57_s8, 49152, %s59_s12, [#allocation9], %s6795_s13, %s6795_s13, %s6796_s14  }
   0xb   :  { %s6797_s17 = smov [#allocation11]   ;;  %s22_s20 = sshll.u32 %s6987_s0, 4  ;;  %s23_s20 = int_to_ptr.hbm [resolvable:$true] %s22_s20 }
   0xc   :  { %s82_s18 = sshll.u32 %s6797_s17, 4  ;;  %s6798_s21 = smov 64   ;;  %s83_s18 = int_to_ptr.vmem [resolvable:$true] %s82_s18 }
   0xd   :  { %s6799_s22 = smov 4   ;;  %s6800_s23 = smov [#allocation2]  }
   0xe   :  { %88 = dma.hbm_to_vmem [thread:$0]  %s81_s16, 6144, %s83_s18, [#allocation12], %s6798_s21, %s6798_s21, %s6799_s22  }
   0xf   :  { %s24_s24 = sshll.u32 %s6800_s23, 4  ;;  %s46_s27 = sshll.u32 %s6989_s2, 4  ;;  %s25_s24 = int_to_ptr.vmem [resolvable:$true] %s24_s24  ;;  %s47_s27 = int_to_ptr.hbm [resolvable:$true] %s46_s27 }
  0x10   :  { %27 = dma.hbm_to_vmem [thread:$0]  %s23_s20, 128, %s25_s24, [#allocation3]  }
  0x11   :  { %s70_s29 = sshll.u32 %s6991_s4, 4  ;;  %s6801_s30 = smov [#allocation7]   ;;  %s71_s29 = int_to_ptr.hbm [resolvable:$true] %s70_s29 }
  0x12   :  { %s48_s8 = sshll.u32 %s6801_s30, 4  ;;  %s6802_s0 = smov [#allocation10]   ;;  %s49_s8 = int_to_ptr.vmem [resolvable:$true] %s48_s8 }
  0x13   :  { %51 = dma.hbm_to_vmem [thread:$0]  %s47_s27, 128, %s49_s8, [#allocation6]  }
  0x14   :  { %s72_s9 = sshll.u32 %s6802_s0, 4  ;;  %s94_s12 = sshll.u32 %s6993_s6, 4  ;;  %s73_s9 = int_to_ptr.vmem [resolvable:$true] %s72_s9  ;;  %s95_s12 = int_to_ptr.hbm [resolvable:$true] %s94_s12 }
  0x15   :  { %75 = dma.hbm_to_vmem [thread:$0]  %s71_s29, 96, %s73_s9, [#allocation9]  }
  0x16   :  { %s6803_s2 = smov [#allocation13]  }
  0x17   :  { %s96_s13 = sshll.u32 %s6803_s2, 4  ;;  %s97_s13 = int_to_ptr.vmem [resolvable:$true] %s96_s13 }
  0x18   :  { %99 = dma.hbm_to_vmem [thread:$0]  %s95_s12, 16, %s97_s13, [#allocation12]  }
  0x19   :  { %6781 = dma.done.wait [#allocation3], 128  }
  0x1a   :  { %6782 = vsyncadd [#allocation3], 4294967168 }
  0x1b   :  { %6783 = dma.done.wait [#allocation6], 8320  }
  0x1c   :  { %6784 = vsyncadd [#allocation6], 4294958976 }
  0x1d   :  { %6785 = dma.done.wait [#allocation9], 49248  }
  0x1e   :  { %6786 = vsyncadd [#allocation9], 4294918048 }
  0x1f   :  { %6787 = dma.done.wait [#allocation12], 6160  }
  0x20   :  { %6788 = vsyncadd [#allocation12], 4294961136  ;;  %v4319_v0 = vld [vmem:[#allocation5 + $0x1c0] sm:$0xf]  ;;  %v6133_v2 = vld [vmem:[#allocation5 + $0x1c4] sm:$0xf] }
  0x21   :  { %v6137_v1 = vld [vmem:[#allocation5 + $0x1dc] sm:$0xf0]  ;;  %v4321_v4 = vld [vmem:[#allocation5 + $0x1e0] sm:$0xf0]  ;;  %v4327_v5 = vld [vmem:[#allocation5 + $0x1c8] sm:$0xf] }
  0x22   :  { %v4320_v3 = vor.u32 %v6137_v1, %v4319_v0  ;;  %v6138_v6 = vld [vmem:[#allocation5 + $0x1e4] sm:$0xf0]  ;;  %v4324_v7 = vor.u32 %v6133_v2, %v4321_v4  ;;  %v6134_v9 = vld [vmem:[#allocation5 + $0x1cc] sm:$0xf]  ;;  %v4287_v11 = vld [vmem:[#allocation5 + $0x180] sm:$0xf] }
  0x23   :  { %v4328_v8 = vor.u32 %v6138_v6, %v4327_v5  ;;  %v4329_v10 = vld [vmem:[#allocation5 + $0x1e8] sm:$0xf0]  ;;  %v6129_v13 = vld [vmem:[#allocation5 + $0x19c] sm:$0xf0]  ;;  %v6125_v14 = vld [vmem:[#allocation5 + $0x184] sm:$0xf] }
  0x24   :  { %532 = vmatpush.bf16.msra.mxu0 %v4320_v3  ;;  %v4332_v12 = vor.u32 %v6134_v9, %v4329_v10  ;;  %v4289_v15 = vld [vmem:[#allocation5 + $0x1a0] sm:$0xf0]  ;;  %545 = vmatpush.bf16.msra.mxu1 %v4324_v7  ;;  %v4288_v16 = vor.u32 %v6129_v13, %v4287_v11  ;;  %v4295_v18 = vld [vmem:[#allocation5 + $0x188] sm:$0xf]  ;;  %v6126_v20 = vld [vmem:[#allocation5 + $0x18c] sm:$0xf] }
  0x25   :  { %558 = vmatpush.bf16.msra.mxu2 %v4328_v8  ;;  %v4292_v17 = vor.u32 %v6125_v14, %v4289_v15  ;;  %v6130_v19 = vld [vmem:[#allocation5 + $0x1a4] sm:$0xf0]  ;;  %v4297_v22 = vld [vmem:[#allocation5 + $0x1a8] sm:$0xf0]  ;;  %v4255_v23 = vld [vmem:[#allocation5 + $0x140] sm:$0xf] }
  0x26   :  { %571 = vmatpush.bf16.msra.mxu3 %v4332_v12  ;;  %v4296_v21 = vor.u32 %v6130_v19, %v4295_v18  ;;  %v6121_v24 = vld [vmem:[#allocation5 + $0x15c] sm:$0xf0]  ;;  %v4300_v25 = vor.u32 %v6126_v20, %v4297_v22  ;;  %v6117_v26 = vld [vmem:[#allocation5 + $0x144] sm:$0xf]  ;;  %v4263_v28 = vld [vmem:[#allocation5 + $0x148] sm:$0xf] }
  0x27   :  { %v4257_v27 = vld [vmem:[#allocation5 + $0x160] sm:$0xf0]  ;;  %v4256_v29 = vor.u32 %v6121_v24, %v4255_v23  ;;  %v6122_v30 = vld [vmem:[#allocation5 + $0x164] sm:$0xf0]  ;;  %v6118_v31 = vld [vmem:[#allocation5 + $0x14c] sm:$0xf] }
  0x28   :  { %533 = vmatpush.bf16.msra.mxu0 %v4288_v16  ;;  %v4265_v32 = vld [vmem:[#allocation5 + $0x168] sm:$0xf0]  ;;  %546 = vmatpush.bf16.msra.mxu1 %v4292_v17  ;;  %v4260_v33 = vor.u32 %v6117_v26, %v4257_v27  ;;  %v4264_v34 = vor.u32 %v6122_v30, %v4263_v28  ;;  %v4223_v35 = vld [vmem:[#allocation5 + $0x100] sm:$0xf]  ;;  %v6109_v37 = vld [vmem:[#allocation5 + $0x104] sm:$0xf] }
  0x29   :  { %559 = vmatpush.bf16.msra.mxu2 %v4296_v21  ;;  %v6113_v36 = vld [vmem:[#allocation5 + $0x11c] sm:$0xf0]  ;;  %v4268_v38 = vor.u32 %v6118_v31, %v4265_v32  ;;  %v4225_v39 = vld [vmem:[#allocation5 + $0x120] sm:$0xf0]  ;;  %v4231_v40 = vld [vmem:[#allocation5 + $0x108] sm:$0xf] }
  0x2a   :  { %572 = vmatpush.bf16.msra.mxu3 %v4300_v25  ;;  %v6114_v41 = vld [vmem:[#allocation5 + $0x124] sm:$0xf0]  ;;  %v6110_v42 = vld [vmem:[#allocation5 + $0x10c] sm:$0xf]  ;;  %v4224_v44 = vor.u32 %v6113_v36, %v4223_v35  ;;  %v4228_v45 = vor.u32 %v6109_v37, %v4225_v39  ;;  %v4191_v47 = vld [vmem:[#allocation5 + $0xc0] sm:$0xf] }
  0x2b   :  { %v4233_v43 = vld [vmem:[#allocation5 + $0x128] sm:$0xf0]  ;;  %v4232_v46 = vor.u32 %v6114_v41, %v4231_v40  ;;  %v6105_v48 = vld [vmem:[#allocation5 + $0xdc] sm:$0xf0]  ;;  %v6101_v49 = vld [vmem:[#allocation5 + $0xc4] sm:$0xf] }
  0x2c   :  { %534 = vmatpush.bf16.msra.mxu0 %v4256_v29  ;;  %547 = vmatpush.bf16.msra.mxu1 %v4260_v33  ;;  %v4236_v50 = vor.u32 %v6110_v42, %v4233_v43  ;;  %v4193_v51 = vld [vmem:[#allocation5 + $0xe0] sm:$0xf0]  ;;  %v4199_v52 = vld [vmem:[#allocation5 + $0xc8] sm:$0xf]  ;;  %v6102_v54 = vld [vmem:[#allocation5 + $0xcc] sm:$0xf]  ;;  %v4192_v56 = vor.u32 %v6105_v48, %v4191_v47 }
  0x2d   :  { %560 = vmatpush.bf16.msra.mxu2 %v4264_v34  ;;  %v6106_v53 = vld [vmem:[#allocation5 + $0xe4] sm:$0xf0]  ;;  %v4201_v55 = vld [vmem:[#allocation5 + $0xe8] sm:$0xf0]  ;;  %v4196_v57 = vor.u32 %v6101_v49, %v4193_v51  ;;  %v4159_v59 = vld [vmem:[#allocation5 + $0x80] sm:$0xf] }
  0x2e   :  { %573 = vmatpush.bf16.msra.mxu3 %v4268_v38  ;;  %v4200_v58 = vor.u32 %v6106_v53, %v4199_v52  ;;  %v6097_v60 = vld [vmem:[#allocation5 + $0x9c] sm:$0xf0]  ;;  %v6093_v61 = vld [vmem:[#allocation5 + $0x84] sm:$0xf]  ;;  %v4204_v62 = vor.u32 %v6102_v54, %v4201_v55  ;;  %v4167_v0 = vld [vmem:[#allocation5 + $0x88] sm:$0xf] }
  0x2f   :  { %v4161_v63 = vld [vmem:[#allocation5 + $0xa0] sm:$0xf0]  ;;  %v6098_v1 = vld [vmem:[#allocation5 + $0xa4] sm:$0xf0]  ;;  %v6094_v2 = vld [vmem:[#allocation5 + $0x8c] sm:$0xf]  ;;  %v4160_v4 = vor.u32 %v6097_v60, %v4159_v59 }
  0x30   :  { %535 = vmatpush.bf16.msra.mxu0 %v4224_v44  ;;  %548 = vmatpush.bf16.msra.mxu1 %v4228_v45  ;;  %v4169_v3 = vld [vmem:[#allocation5 + $0xa8] sm:$0xf0]  ;;  %v4164_v5 = vor.u32 %v6093_v61, %v4161_v63  ;;  %v4168_v6 = vor.u32 %v6098_v1, %v4167_v0  ;;  %v4127_v7 = vld [vmem:[#allocation5 + $0x40] sm:$0xf]  ;;  %v6085_v9 = vld [vmem:[#allocation5 + $0x44] sm:$0xf] }
  0x31   :  { %561 = vmatpush.bf16.msra.mxu2 %v4232_v46  ;;  %v6089_v8 = vld [vmem:[#allocation5 + $0x5c] sm:$0xf0]  ;;  %v4172_v10 = vor.u32 %v6094_v2, %v4169_v3  ;;  %v4129_v11 = vld [vmem:[#allocation5 + $0x60] sm:$0xf0]  ;;  %v4135_v12 = vld [vmem:[#allocation5 + $0x48] sm:$0xf] }
  0x32   :  { %574 = vmatpush.bf16.msra.mxu3 %v4236_v50  ;;  %v6090_v13 = vld [vmem:[#allocation5 + $0x64] sm:$0xf0]  ;;  %v6086_v14 = vld [vmem:[#allocation5 + $0x4c] sm:$0xf]  ;;  %v4128_v16 = vor.u32 %v6089_v8, %v4127_v7  ;;  %v4095_v17 = vld [vmem:[#allocation5] sm:$0xf]  ;;  %v4132_v19 = vor.u32 %v6085_v9, %v4129_v11 }
  0x33   :  { %v4137_v15 = vld [vmem:[#allocation5 + $0x68] sm:$0xf0]  ;;  %v6081_v18 = vld [vmem:[#allocation5 + $0x1c] sm:$0xf0]  ;;  %v4136_v20 = vor.u32 %v6090_v13, %v4135_v12  ;;  %v6077_v21 = vld [vmem:[#allocation5 + $0x4] sm:$0xf] }
  0x34   :  { %536 = vmatpush.bf16.msra.mxu0 %v4192_v56  ;;  %549 = vmatpush.bf16.msra.mxu1 %v4196_v57  ;;  %v4097_v22 = vld [vmem:[#allocation5 + $0x20] sm:$0xf0]  ;;  %v4103_v23 = vld [vmem:[#allocation5 + $0x8] sm:$0xf]  ;;  %v4140_v24 = vor.u32 %v6086_v14, %v4137_v15  ;;  %v6078_v26 = vld [vmem:[#allocation5 + $0xc] sm:$0xf]  ;;  %v4096_v31 = vor.u32 %v6081_v18, %v4095_v17 }
  0x35   :  { %562 = vmatpush.bf16.msra.mxu2 %v4200_v58  ;;  %v6082_v25 = vld [vmem:[#allocation5 + $0x24] sm:$0xf0]  ;;  %v4105_v27 = vld [vmem:[#allocation5 + $0x28] sm:$0xf0]  ;;  %v4335_v28 = vld [vmem:[#allocation5 + $0x1d0] sm:$0xf]  ;;  %v4100_v35 = vor.u32 %v6077_v21, %v4097_v22 }
  0x36   :  { %575 = vmatpush.bf16.msra.mxu3 %v4204_v62  ;;  %v6139_v29 = vld [vmem:[#allocation5 + $0x1ec] sm:$0xf0]  ;;  %v6135_v30 = vld [vmem:[#allocation5 + $0x1d4] sm:$0xf]  ;;  %v4343_v33 = vld [vmem:[#allocation5 + $0x1d8] sm:$0xf]  ;;  %v4104_v36 = vor.u32 %v6082_v25, %v4103_v23  ;;  %v4108_v40 = vor.u32 %v6078_v26, %v4105_v27 }
  0x37   :  { %v4337_v32 = vld [vmem:[#allocation5 + $0x1f0] sm:$0xf0]  ;;  %v6140_v34 = vld [vmem:[#allocation5 + $0x1f4] sm:$0xf0]  ;;  %v6136_v37 = vld [vmem:[#allocation5 + $0x1dc] sm:$0xf]  ;;  %v4336_v41 = vor.u32 %v6139_v29, %v4335_v28 }
  0x38   :  { %537 = vmatpush.bf16.msra.mxu0 %v4160_v4  ;;  %550 = vmatpush.bf16.msra.mxu1 %v4164_v5  ;;  %v4345_v38 = vld [vmem:[#allocation5 + $0x1f8] sm:$0xf0]  ;;  %v4340_v42 = vor.u32 %v6135_v30, %v4337_v32  ;;  %v4344_v43 = vor.u32 %v6140_v34, %v4343_v33  ;;  %v4303_v44 = vld [vmem:[#allocation5 + $0x190] sm:$0xf]  ;;  %v6127_v46 = vld [vmem:[#allocation5 + $0x194] sm:$0xf] }
  0x39   :  { %563 = vmatpush.bf16.msra.mxu2 %v4168_v6  ;;  %v128_v39 = vld [vmem:[#allocation2] sm:$0xff]  ;;  %v6131_v45 = vld [vmem:[#allocation5 + $0x1ac] sm:$0xf0]  ;;  %v4348_v47 = vor.u32 %v6136_v37, %v4345_v38  ;;  %v4305_v49 = vld [vmem:[#allocation5 + $0x1b0] sm:$0xf0]  ;;  %s6804_s4 = smov [#allocation14]  }
  0x3a   :  { %576 = vmatpush.bf16.msra.mxu3 %v4172_v10  ;;  %v6866_v48 = vpack.c.bf16 %v128_v39, %v128_v39  ;;  %v4311_v50 = vld [vmem:[#allocation5 + $0x198] sm:$0xf]  ;;  %v6128_v52 = vld [vmem:[#allocation5 + $0x19c] sm:$0xf]  ;;  %v4304_v54 = vor.u32 %v6131_v45, %v4303_v44  ;;  %v4308_v55 = vor.u32 %v6127_v46, %v4305_v49  ;;  %v4271_v57 = vld [vmem:[#allocation5 + $0x150] sm:$0xf] }
  0x3b   :  { %v6132_v51 = vld [vmem:[#allocation5 + $0x1b4] sm:$0xf0]  ;;  %v4313_v53 = vld [vmem:[#allocation5 + $0x1b8] sm:$0xf0]  ;;  %v6123_v58 = vld [vmem:[#allocation5 + $0x16c] sm:$0xf0] }
  0x3c   :  { %538 = vmatpush.bf16.msra.mxu0 %v4128_v16  ;;  %551 = vmatpush.bf16.msra.mxu1 %v4132_v19  ;;  %v4312_v56 = vor.u32 %v6132_v51, %v4311_v50  ;;  %v6119_v59 = vld [vmem:[#allocation5 + $0x154] sm:$0xf]  ;;  %v4316_v60 = vor.u32 %v6128_v52, %v4313_v53  ;;  %v4279_v62 = vld [vmem:[#allocation5 + $0x158] sm:$0xf]  ;;  %v6120_v0 = vld [vmem:[#allocation5 + $0x15c] sm:$0xf]  ;;  %v4272_v2 = vor.u32 %v6123_v58, %v4271_v57 }
  0x3d   :  { %564 = vmatpush.bf16.msra.mxu2 %v4136_v20  ;;  %v4273_v61 = vld [vmem:[#allocation5 + $0x170] sm:$0xf0]  ;;  %v6124_v63 = vld [vmem:[#allocation5 + $0x174] sm:$0xf0]  ;;  %v4281_v1 = vld [vmem:[#allocation5 + $0x178] sm:$0xf0] }
  0x3e   :  { %577 = vmatpush.bf16.msra.mxu3 %v4140_v24  ;;  %v4276_v3 = vor.u32 %v6119_v59, %v4273_v61  ;;  %v4280_v4 = vor.u32 %v6124_v63, %v4279_v62  ;;  %v4239_v5 = vld [vmem:[#allocation5 + $0x110] sm:$0xf]  ;;  %v6111_v7 = vld [vmem:[#allocation5 + $0x114] sm:$0xf]  ;;  %v4284_v8 = vor.u32 %v6120_v0, %v4281_v1  ;;  %v4247_v10 = vld [vmem:[#allocation5 + $0x118] sm:$0xf] }
  0x3f   :  { %v6115_v6 = vld [vmem:[#allocation5 + $0x12c] sm:$0xf0]  ;;  %v4241_v9 = vld [vmem:[#allocation5 + $0x130] sm:$0xf0]  ;;  %v6116_v11 = vld [vmem:[#allocation5 + $0x134] sm:$0xf0] }
  0x40   :  { %539 = vmatpush.bf16.msra.mxu0 %v4096_v31  ;;  %552 = vmatpush.bf16.msra.mxu1 %v4100_v35  ;;  %v6112_v12 = vld [vmem:[#allocation5 + $0x11c] sm:$0xf]  ;;  %v4240_v14 = vor.u32 %v6115_v6, %v4239_v5  ;;  %v4244_v15 = vor.u32 %v6111_v7, %v4241_v9  ;;  %v4248_v16 = vor.u32 %v6116_v11, %v4247_v10  ;;  %v4207_v17 = vld [vmem:[#allocation5 + $0xd0] sm:$0xf]  ;;  %v6103_v19 = vld [vmem:[#allocation5 + $0xd4] sm:$0xf] }
  0x41   :  { %565 = vmatpush.bf16.msra.mxu2 %v4104_v36  ;;  %v4249_v13 = vld [vmem:[#allocation5 + $0x138] sm:$0xf0]  ;;  %v6107_v18 = vld [vmem:[#allocation5 + $0xec] sm:$0xf0]  ;;  %v4209_v21 = vld [vmem:[#allocation5 + $0xf0] sm:$0xf0] }
  0x42   :  { %578 = vmatpush.bf16.msra.mxu3 %v4108_v40  ;;  %v4252_v20 = vor.u32 %v6112_v12, %v4249_v13  ;;  %v4215_v22 = vld [vmem:[#allocation5 + $0xd8] sm:$0xf]  ;;  %v6104_v24 = vld [vmem:[#allocation5 + $0xdc] sm:$0xf]  ;;  %v4208_v26 = vor.u32 %v6107_v18, %v4207_v17  ;;  %v4212_v27 = vor.u32 %v6103_v19, %v4209_v21  ;;  %v4175_v29 = vld [vmem:[#allocation5 + $0x90] sm:$0xf] }
  0x43   :  { %540 = vmatmul.bf16.vlgmr.msra.gmra.mxu0 %v6866_v48  ;;  %553 = vmatmul.bf16.vlgmr.msra.gmra.mxu1 %v6866_v48  ;;  %v6108_v23 = vld [vmem:[#allocation5 + $0xf4] sm:$0xf0]  ;;  %v4217_v25 = vld [vmem:[#allocation5 + $0xf8] sm:$0xf0]  ;;  %v6099_v30 = vld [vmem:[#allocation5 + $0xac] sm:$0xf0] }
  0x44   :  { %584 = vmatpush.bf16.msrb.mxu0 %v4336_v41  ;;  %597 = vmatpush.bf16.msrb.mxu1 %v4340_v42  ;;  %v4216_v28 = vor.u32 %v6108_v23, %v4215_v22  ;;  %v6095_v31 = vld [vmem:[#allocation5 + $0x94] sm:$0xf]  ;;  %v4220_v32 = vor.u32 %v6104_v24, %v4217_v25  ;;  %v4183_v34 = vld [vmem:[#allocation5 + $0x98] sm:$0xf]  ;;  %v6096_v36 = vld [vmem:[#allocation5 + $0x9c] sm:$0xf]  ;;  %v4176_v38 = vor.u32 %v6099_v30, %v4175_v29 }
  0x45   :  { %610 = vmatpush.bf16.msrb.mxu2 %v4344_v43  ;;  %579 = vmatmul.bf16.vlgmr.msra.gmra.mxu3 %v6866_v48  ;;  %v4177_v33 = vld [vmem:[#allocation5 + $0xb0] sm:$0xf0]  ;;  %v6100_v35 = vld [vmem:[#allocation5 + $0xb4] sm:$0xf0]  ;;  %v4185_v37 = vld [vmem:[#allocation5 + $0xb8] sm:$0xf0] }
  0x46   :  { %623 = vmatpush.bf16.msrb.mxu3 %v4348_v47  ;;  %566 = vmatmul.bf16.vlgmr.msra.gmra.mxu2 %v6866_v48  ;;  %v4180_v39 = vor.u32 %v6095_v31, %v4177_v33  ;;  %v4184_v40 = vor.u32 %v6100_v35, %v4183_v34  ;;  %v4143_v41 = vld [vmem:[#allocation5 + $0x50] sm:$0xf]  ;;  %v6087_v43 = vld [vmem:[#allocation5 + $0x54] sm:$0xf]  ;;  %v4188_v44 = vor.u32 %v6096_v36, %v4185_v37  ;;  %v4151_v46 = vld [vmem:[#allocation5 + $0x58] sm:$0xf] }
  0x47   :  { %v6091_v42 = vld [vmem:[#allocation5 + $0x6c] sm:$0xf0]  ;;  %v4145_v45 = vld [vmem:[#allocation5 + $0x70] sm:$0xf0]  ;;  %v6092_v47 = vld [vmem:[#allocation5 + $0x74] sm:$0xf0] }
  0x48   :  { %585 = vmatpush.bf16.msrb.mxu0 %v4304_v54  ;;  %598 = vmatpush.bf16.msrb.mxu1 %v4308_v55  ;;  %v6088_v49 = vld [vmem:[#allocation5 + $0x5c] sm:$0xf]  ;;  %v4144_v51 = vor.u32 %v6091_v42, %v4143_v41  ;;  %v4111_v52 = vld [vmem:[#allocation5 + $0x10] sm:$0xf]  ;;  %v4148_v53 = vor.u32 %v6087_v43, %v4145_v45  ;;  %v4152_v54 = vor.u32 %v6092_v47, %v4151_v46  ;;  %v4113_v57 = vld [vmem:[#allocation5 + $0x30] sm:$0xf0] }
  0x49   :  { %611 = vmatpush.bf16.msrb.mxu2 %v4312_v56  ;;  %v4153_v50 = vld [vmem:[#allocation5 + $0x78] sm:$0xf0]  ;;  %v6083_v55 = vld [vmem:[#allocation5 + $0x2c] sm:$0xf0]  ;;  %v6079_v56 = vld [vmem:[#allocation5 + $0x14] sm:$0xf] }
  0x4a   :  { %624 = vmatpush.bf16.msrb.mxu3 %v4316_v60  ;;  %v4156_v58 = vor.u32 %v6088_v49, %v4153_v50  ;;  %v4119_v59 = vld [vmem:[#allocation5 + $0x18] sm:$0xf]  ;;  %v6080_v61 = vld [vmem:[#allocation5 + $0x1c] sm:$0xf]  ;;  %v6186_v0 = vld [vmem:[#allocation8 + $0x164] sm:$0xf0]  ;;  %v4112_v1 = vor.u32 %v6083_v55, %v4111_v52 }
  0x4b   :  { %v6084_v60 = vld [vmem:[#allocation5 + $0x34] sm:$0xf0]  ;;  %v4121_v62 = vld [vmem:[#allocation5 + $0x38] sm:$0xf0]  ;;  %v6282_v10 = vld [vmem:[#allocation8 + $0x464] sm:$0xf0] }
  0x4c   :  { %586 = vmatpush.bf16.msrb.mxu0 %v4272_v2  ;;  %599 = vmatpush.bf16.msrb.mxu1 %v4276_v3  ;;  %v4519_v63 = vld [vmem:[#allocation8 + $0x150] sm:$0xf]  ;;  %v6234_v3 = vld [vmem:[#allocation8 + $0x2e4] sm:$0xf0]  ;;  %v4120_v5 = vor.u32 %v6084_v60, %v4119_v59  ;;  %v4124_v6 = vor.u32 %v6080_v61, %v4121_v62  ;;  %v6180_v12 = vld [vmem:[#allocation8 + $0x134] sm:$0xf0] }
  0x4d   :  { %612 = vmatpush.bf16.msrb.mxu2 %v4280_v4  ;;  %v4711_v2 = vld [vmem:[#allocation8 + $0x2d0] sm:$0xf]  ;;  %v4116_v4 = vor.u32 %v6079_v56, %v4113_v57  ;;  %v4520_v7 = vor.u32 %v6186_v0, %v4519_v63  ;;  %v4879_v21 = vld [vmem:[#allocation8 + $0x420] sm:$0xf]  ;;  %v6276_v22 = vld [vmem:[#allocation8 + $0x434] sm:$0xf0] }
  0x4e   :  { %625 = vmatpush.bf16.msrb.mxu3 %v4284_v8  ;;  %v4495_v8 = vld [vmem:[#allocation8 + $0x120] sm:$0xf]  ;;  %v4903_v9 = vld [vmem:[#allocation8 + $0x450] sm:$0xf]  ;;  %v4712_v11 = vor.u32 %v6234_v3, %v4711_v2  ;;  %v6174_v24 = vld [vmem:[#allocation8 + $0x104] sm:$0xf0]  ;;  %v4880_v29 = vor.u32 %v6276_v22, %v4879_v21 }
  0x4f   :  { %v5095_v13 = vld [vmem:[#allocation8 + $0x5d0] sm:$0xf]  ;;  %v4904_v17 = vor.u32 %v6282_v10, %v4903_v9  ;;  %v4496_v18 = vor.u32 %v6180_v12, %v4495_v8  ;;  %v5071_v25 = vld [vmem:[#allocation8 + $0x5a0] sm:$0xf]  ;;  %v6270_v34 = vld [vmem:[#allocation8 + $0x404] sm:$0xf0] }
  0x50   :  { %587 = vmatpush.bf16.msrb.mxu0 %v4240_v14  ;;  %600 = vmatpush.bf16.msrb.mxu1 %v4244_v15  ;;  %v6330_v14 = vld [vmem:[#allocation8 + $0x5e4] sm:$0xf0]  ;;  %v4687_v15 = vld [vmem:[#allocation8 + $0x2a0] sm:$0xf]  ;;  %v4855_v33 = vld [vmem:[#allocation8 + $0x3f0] sm:$0xf] }
  0x51   :  { %613 = vmatpush.bf16.msrb.mxu2 %v4248_v16  ;;  %v6228_v16 = vld [vmem:[#allocation8 + $0x2b4] sm:$0xf0]  ;;  %v5096_v19 = vor.u32 %v6330_v14, %v5095_v13  ;;  %v5047_v37 = vld [vmem:[#allocation8 + $0x570] sm:$0xf]  ;;  %v4856_v41 = vor.u32 %v6270_v34, %v4855_v33  ;;  %v6162_v47 = vld [vmem:[#allocation8 + $0xa4] sm:$0xf0] }
  0x52   :  { %626 = vmatpush.bf16.msrb.mxu3 %v4252_v20  ;;  %v4471_v20 = vld [vmem:[#allocation8 + $0xf0] sm:$0xf]  ;;  %v4688_v23 = vor.u32 %v6228_v16, %v4687_v15  ;;  %v6168_v36 = vld [vmem:[#allocation8 + $0xd4] sm:$0xf0]  ;;  %v5023_v49 = vld [vmem:[#allocation8 + $0x540] sm:$0xf] }
  0x53   :  { %v4472_v30 = vor.u32 %v6174_v24, %v4471_v20  ;;  %v4423_v42 = vld [vmem:[#allocation8 + $0x90] sm:$0xf]  ;;  %v6264_v45 = vld [vmem:[#allocation8 + $0x3d4] sm:$0xf0]  ;;  %v6210_v52 = vld [vmem:[#allocation8 + $0x224] sm:$0xf0] }
  0x54   :  { %588 = vmatpush.bf16.msrb.mxu0 %v4208_v26  ;;  %601 = vmatpush.bf16.msrb.mxu1 %v4212_v27  ;;  %v6324_v26 = vld [vmem:[#allocation8 + $0x5b4] sm:$0xf0]  ;;  %v4663_v27 = vld [vmem:[#allocation8 + $0x270] sm:$0xf]  ;;  %v4399_v56 = vld [vmem:[#allocation8 + $0x60] sm:$0xf] }
  0x55   :  { %614 = vmatpush.bf16.msrb.mxu2 %v4216_v28  ;;  %v6222_v28 = vld [vmem:[#allocation8 + $0x284] sm:$0xf0]  ;;  %v5072_v31 = vor.u32 %v6324_v26, %v5071_v25  ;;  %v6312_v50 = vld [vmem:[#allocation8 + $0x554] sm:$0xf0]  ;;  %v4807_v57 = vld [vmem:[#allocation8 + $0x390] sm:$0xf] }
  0x56   :  { %627 = vmatpush.bf16.msrb.mxu3 %v4220_v32  ;;  %v4447_v32 = vld [vmem:[#allocation8 + $0xc0] sm:$0xf]  ;;  %v4664_v35 = vor.u32 %v6222_v28, %v4663_v27  ;;  %v5024_v55 = vor.u32 %v6312_v50, %v5023_v49  ;;  %v6156_v60 = vld [vmem:[#allocation8 + $0x74] sm:$0xf0]  ;;  %v4999_v61 = vld [vmem:[#allocation8 + $0x510] sm:$0xf] }
  0x57   :  { %v6306_v62 = vld [vmem:[#allocation8 + $0x524] sm:$0xf0]  ;;  %v4591_v63 = vld [vmem:[#allocation8 + $0x1e0] sm:$0xf]  ;;  %v6204_v0 = vld [vmem:[#allocation8 + $0x1f4] sm:$0xf0]  ;;  %v4400_v2 = vor.u32 %v6156_v60, %v4399_v56 }
  0x58   :  { %589 = vmatpush.bf16.msrb.mxu0 %v4176_v38  ;;  %602 = vmatpush.bf16.msrb.mxu1 %v4180_v39  ;;  %v6318_v38 = vld [vmem:[#allocation8 + $0x584] sm:$0xf0]  ;;  %v4639_v39 = vld [vmem:[#allocation8 + $0x240] sm:$0xf]  ;;  %v5000_v3 = vor.u32 %v6306_v62, %v4999_v61  ;;  %v6300_v10 = vld [vmem:[#allocation8 + $0x4f4] sm:$0xf0] }
  0x59   :  { %615 = vmatpush.bf16.msrb.mxu2 %v4184_v40  ;;  %v6216_v40 = vld [vmem:[#allocation8 + $0x254] sm:$0xf0]  ;;  %v5048_v43 = vor.u32 %v6318_v38, %v5047_v37  ;;  %v6150_v8 = vld [vmem:[#allocation8 + $0x44] sm:$0xf0]  ;;  %v4975_v9 = vld [vmem:[#allocation8 + $0x4e0] sm:$0xf] }
  0x5a   :  { %628 = vmatpush.bf16.msrb.mxu3 %v4188_v44  ;;  %v4831_v44 = vld [vmem:[#allocation8 + $0x3c0] sm:$0xf]  ;;  %v4640_v46 = vor.u32 %v6216_v40, %v4639_v39  ;;  %v6198_v12 = vld [vmem:[#allocation8 + $0x1c4] sm:$0xf0]  ;;  %v4976_v16 = vor.u32 %v6300_v10, %v4975_v9  ;;  %v4951_v22 = vld [vmem:[#allocation8 + $0x4b0] sm:$0xf] }
  0x5b   :  { %v4351_v14 = vld [vmem:[#allocation8] sm:$0xf]  ;;  %v6192_v24 = vld [vmem:[#allocation8 + $0x194] sm:$0xf0]  ;;  %v5287_v25 = vld [vmem:[#allocation8 + $0x750] sm:$0xf] }
  0x5c   :  { %590 = vmatpush.bf16.msrb.mxu0 %v4144_v51  ;;  %603 = vmatpush.bf16.msrb.mxu1 %v4148_v53  ;;  %v4615_v51 = vld [vmem:[#allocation8 + $0x210] sm:$0xf]  ;;  %v4832_v53 = vor.u32 %v6264_v45, %v4831_v44  ;;  %v4543_v21 = vld [vmem:[#allocation8 + $0x180] sm:$0xf]  ;;  %v6378_v26 = vld [vmem:[#allocation8 + $0x764] sm:$0xf0] }
  0x5d   :  { %616 = vmatpush.bf16.msrb.mxu2 %v4152_v54  ;;  %v4424_v54 = vor.u32 %v6162_v47, %v4423_v42  ;;  %v4616_v59 = vor.u32 %v6210_v52, %v4615_v51  ;;  %v5479_v27 = vld [vmem:[#allocation8 + $0x8d0] sm:$0xf]  ;;  %v6426_v28 = vld [vmem:[#allocation8 + $0x8e4] sm:$0xf0]  ;;  %v4735_v33 = vld [vmem:[#allocation8 + $0x300] sm:$0xf]  ;;  %v5288_v37 = vor.u32 %v6378_v26, %v5287_v25 }
  0x5e   :  { %629 = vmatpush.bf16.msrb.mxu3 %v4156_v58  ;;  %v6258_v58 = vld [vmem:[#allocation8 + $0x3a4] sm:$0xf0]  ;;  %v6240_v34 = vld [vmem:[#allocation8 + $0x314] sm:$0xf0]  ;;  %v5671_v39 = vld [vmem:[#allocation8 + $0xa50] sm:$0xf] }
  0x5f   :  { %v6288_v38 = vld [vmem:[#allocation8 + $0x494] sm:$0xf0]  ;;  %v6474_v40 = vld [vmem:[#allocation8 + $0xa64] sm:$0xf0]  ;;  %v5455_v44 = vld [vmem:[#allocation8 + $0x8a0] sm:$0xf] }
  0x60   :  { %591 = vmatpush.bf16.msrb.mxu0 %v4112_v1  ;;  %604 = vmatpush.bf16.msrb.mxu1 %v4116_v4  ;;  %v4808_v1 = vor.u32 %v6258_v58, %v4807_v57  ;;  %v4375_v4 = vld [vmem:[#allocation8 + $0x30] sm:$0xf]  ;;  %v6372_v42 = vld [vmem:[#allocation8 + $0x734] sm:$0xf0]  ;;  %v5672_v49 = vor.u32 %v6474_v40, %v5671_v39  ;;  %v6366_v56 = vld [vmem:[#allocation8 + $0x704] sm:$0xf0] }
  0x61   :  { %617 = vmatpush.bf16.msrb.mxu2 %v4120_v5  ;;  %v4783_v5 = vld [vmem:[#allocation8 + $0x360] sm:$0xf]  ;;  %v4376_v15 = vor.u32 %v6150_v8, %v4375_v4  ;;  %v6420_v45 = vld [vmem:[#allocation8 + $0x8b4] sm:$0xf0]  ;;  %v5239_v52 = vld [vmem:[#allocation8 + $0x6f0] sm:$0xf] }
  0x62   :  { %630 = vmatpush.bf16.msrb.mxu3 %v4124_v6  ;;  %v6252_v6 = vld [vmem:[#allocation8 + $0x374] sm:$0xf0]  ;;  %v5839_v57 = vld [vmem:[#allocation8 + $0xba0] sm:$0xf]  ;;  %v6414_v60 = vld [vmem:[#allocation8 + $0x884] sm:$0xf0]  ;;  %v5240_v62 = vor.u32 %v6366_v56, %v5239_v52 }
  0x63   :  { %592 = vmatmul.bf16.vlgmr.msrb.gmra.mxu0 %v6866_v48  ;;  %605 = vmatmul.bf16.vlgmr.msrb.gmra.mxu1 %v6866_v48  ;;  %v4784_v13 = vor.u32 %v6252_v6, %v4783_v5  ;;  %v6516_v58 = vld [vmem:[#allocation8 + $0xbb4] sm:$0xf0]  ;;  %v5815_v5 = vld [vmem:[#allocation8 + $0xb70] sm:$0xf]  ;;  %v6510_v6 = vld [vmem:[#allocation8 + $0xb84] sm:$0xf0] }
  0x64   :  { %2970 = vmatpush.bf16.msra.mxu0 %v4520_v7  ;;  %2983 = vmatpush.bf16.msra.mxu1 %v4712_v11  ;;  %v4592_v7 = vor.u32 %v6204_v0, %v4591_v63  ;;  %v4567_v11 = vld [vmem:[#allocation8 + $0x1b0] sm:$0xf]  ;;  %v5840_v63 = vor.u32 %v6516_v58, %v5839_v57  ;;  %v5215_v0 = vld [vmem:[#allocation8 + $0x6c0] sm:$0xf]  ;;  %v6360_v4 = vld [vmem:[#allocation8 + $0x6d4] sm:$0xf0] }
  0x65   :  { %618 = vmatmul.bf16.vlgmr.msrb.gmra.mxu2 %v6866_v48  ;;  %631 = vmatmul.bf16.vlgmr.msrb.gmra.mxu3 %v6866_v48  ;;  %v4448_v48 = vor.u32 %v6168_v36, %v4447_v32  ;;  %v4568_v20 = vor.u32 %v6198_v12, %v4567_v11  ;;  %v5263_v32 = vld [vmem:[#allocation8 + $0x720] sm:$0xf]  ;;  %v4544_v36 = vor.u32 %v6192_v24, %v4543_v21  ;;  %v6408_v8 = vld [vmem:[#allocation8 + $0x854] sm:$0xf0]  ;;  %v5191_v12 = vld [vmem:[#allocation8 + $0x690] sm:$0xf] }
  0x66   :  { %2996 = vmatpush.bf16.msra.mxu2 %v4904_v17  ;;  %3009 = vmatpush.bf16.msra.mxu3 %v5096_v19  ;;  %v6144_v17 = vld [vmem:[#allocation8 + $0x14] sm:$0xf0]  ;;  %v6246_v19 = vld [vmem:[#allocation8 + $0x344] sm:$0xf0]  ;;  %v5264_v50 = vor.u32 %v6372_v42, %v5263_v32  ;;  %v5216_v10 = vor.u32 %v6360_v4, %v5215_v0  ;;  %v5816_v11 = vor.u32 %v6510_v6, %v5815_v5  ;;  %v5167_v25 = vld [vmem:[#allocation8 + $0x660] sm:$0xf] }
  0x67   :  { %v6348_v26 = vld [vmem:[#allocation8 + $0x674] sm:$0xf0]  ;;  %v6450_v32 = vld [vmem:[#allocation8 + $0x9a4] sm:$0xf0]  ;;  %v5335_v40 = vld [vmem:[#allocation8 + $0x7b0] sm:$0xf] }
  0x68   :  { %2971 = vmatpush.bf16.msra.mxu0 %v4496_v18  ;;  %2984 = vmatpush.bf16.msra.mxu1 %v4688_v23  ;;  %v4759_v18 = vld [vmem:[#allocation8 + $0x330] sm:$0xf]  ;;  %v6294_v23 = vld [vmem:[#allocation8 + $0x4c4] sm:$0xf0]  ;;  %v5695_v0 = vld [vmem:[#allocation8 + $0xa80] sm:$0xf] }
  0x69   :  { %v6438_v56 = vld [vmem:[#allocation8 + $0x944] sm:$0xf0]  ;;  %v5719_v58 = vld [vmem:[#allocation8 + $0xab0] sm:$0xf]  ;;  %s4078_s6 = sshll.u32 %s6804_s4, 4  ;;  %s4080_s15 = sshll.u32 %s6994_s7, 4  ;;  %s4079_s6 = int_to_ptr.vmem [resolvable:$true] %s4078_s6  ;;  %s4081_s15 = int_to_ptr.hbm [resolvable:$true] %s4080_s15 }
  0x6a   :  { %2997 = vmatpush.bf16.msra.mxu2 %v4880_v29  ;;  %3010 = vmatpush.bf16.msra.mxu3 %v5072_v31  ;;  %v4760_v29 = vor.u32 %v6246_v19, %v4759_v18  ;;  %v4952_v31 = vor.u32 %v6294_v23, %v4951_v22  ;;  %v6504_v18 = vld [vmem:[#allocation8 + $0xb54] sm:$0xf0]  ;;  %v5383_v19 = vld [vmem:[#allocation8 + $0x810] sm:$0xf] }
  0x6c   :  { %2972 = vmatpush.bf16.msra.mxu0 %v4472_v30  ;;  %2985 = vmatpush.bf16.msra.mxu1 %v4664_v35  ;;  %v4352_v30 = vor.u32 %v6144_v17, %v4351_v14  ;;  %v4927_v35 = vld [vmem:[#allocation8 + $0x480] sm:$0xf]  ;;  %v6456_v14 = vld [vmem:[#allocation8 + $0x9d4] sm:$0xf0] }
  0x6d   :  { %v4928_v47 = vor.u32 %v6288_v38, %v4927_v35  ;;  %v5791_v17 = vld [vmem:[#allocation8 + $0xb40] sm:$0xf]  ;;  %v6498_v35 = vld [vmem:[#allocation8 + $0xb24] sm:$0xf0] }
  0x6e   :  { %2998 = vmatpush.bf16.msra.mxu2 %v4856_v41  ;;  %3011 = vmatpush.bf16.msra.mxu3 %v5048_v43  ;;  %v5480_v41 = vor.u32 %v6426_v28, %v5479_v27  ;;  %v6522_v43 = vld [vmem:[#allocation8 + $0xbe4] sm:$0xf0]  ;;  %v5792_v23 = vor.u32 %v6504_v18, %v5791_v17  ;;  %v5359_v27 = vld [vmem:[#allocation8 + $0x7e0] sm:$0xf]  ;;  %v6396_v28 = vld [vmem:[#allocation8 + $0x7f4] sm:$0xf0] }
  0x6f   :  { %v6342_v38 = vld [vmem:[#allocation8 + $0x644] sm:$0xf0] }
  0x70   :  { %2973 = vmatpush.bf16.msra.mxu0 %v4448_v48  ;;  %2986 = vmatpush.bf16.msra.mxu1 %v4640_v46  ;;  %v5863_v48 = vld [vmem:[#allocation8 + $0xbd0] sm:$0xf]  ;;  %v4736_v46 = vor.u32 %v6240_v34, %v4735_v33 }
  0x71   :  { %v5864_v51 = vor.u32 %v6522_v43, %v5863_v48  ;;  %v5767_v33 = vld [vmem:[#allocation8 + $0xb10] sm:$0xf]  ;;  %v5551_v48 = vld [vmem:[#allocation8 + $0x960] sm:$0xf]  ;;  %v6444_v43 = vld [vmem:[#allocation8 + $0x974] sm:$0xf0] }
  0x72   :  { %2999 = vmatpush.bf16.msra.mxu2 %v4832_v53  ;;  %3012 = vmatpush.bf16.msra.mxu3 %v5024_v55  ;;  %v5647_v53 = vld [vmem:[#allocation8 + $0xa20] sm:$0xf]  ;;  %v5456_v55 = vor.u32 %v6420_v45, %v5455_v44  ;;  %v5552_v45 = vor.u32 %v6444_v43, %v5551_v48 }
  0x73   :  { %v5743_v44 = vld [vmem:[#allocation8 + $0xae0] sm:$0xf] }
  0x74   :  { %2974 = vmatpush.bf16.msra.mxu0 %v4424_v54  ;;  %2987 = vmatpush.bf16.msra.mxu1 %v4616_v59  ;;  %v6468_v54 = vld [vmem:[#allocation8 + $0xa34] sm:$0xf0]  ;;  %v5431_v59 = vld [vmem:[#allocation8 + $0x870] sm:$0xf] }
  0x75   :  { %v5648_v61 = vor.u32 %v6468_v54, %v5647_v53  ;;  %v6384_v53 = vld [vmem:[#allocation8 + $0x794] sm:$0xf0] }
  0x76   :  { %3000 = vmatpush.bf16.msra.mxu2 %v4808_v1  ;;  %3013 = vmatpush.bf16.msra.mxu3 %v5000_v3  ;;  %v5623_v1 = vld [vmem:[#allocation8 + $0x9f0] sm:$0xf]  ;;  %v5432_v3 = vor.u32 %v6414_v60, %v5431_v59  ;;  %v6486_v59 = vld [vmem:[#allocation8 + $0xac4] sm:$0xf0] }
  0x77   :  { %v5720_v60 = vor.u32 %v6486_v59, %v5719_v58 }
  0x78   :  { %2975 = vmatpush.bf16.msra.mxu0 %v4400_v2  ;;  %2988 = vmatpush.bf16.msra.mxu1 %v4592_v7  ;;  %v6462_v2 = vld [vmem:[#allocation8 + $0xa04] sm:$0xf0]  ;;  %v5407_v7 = vld [vmem:[#allocation8 + $0x840] sm:$0xf] }
  0x79   :  { %v5624_v9 = vor.u32 %v6462_v2, %v5623_v1  ;;  %v6480_v1 = vld [vmem:[#allocation8 + $0xa94] sm:$0xf0] }
  0x7a   :  { %3001 = vmatpush.bf16.msra.mxu2 %v4784_v13  ;;  %3014 = vmatpush.bf16.msra.mxu3 %v4976_v16  ;;  %v5599_v13 = vld [vmem:[#allocation8 + $0x9c0] sm:$0xf]  ;;  %v6354_v16 = vld [vmem:[#allocation8 + $0x6a4] sm:$0xf0]  ;;  %v5696_v2 = vor.u32 %v6480_v1, %v5695_v0  ;;  %v4857_v0 = vld [vmem:[#allocation8 + $0x408] sm:$0xf0] }
  0x7b   :  { %v5600_v21 = vor.u32 %v6456_v14, %v5599_v13  ;;  %v5192_v22 = vor.u32 %v6354_v16, %v5191_v12  ;;  %v6231_v12 = vld [vmem:[#allocation8 + $0x2d4] sm:$0xf]  ;;  %v4713_v13 = vld [vmem:[#allocation8 + $0x2e8] sm:$0xf0] }
  0x7c   :  { %2976 = vmatpush.bf16.msra.mxu0 %v4376_v15  ;;  %2989 = vmatpush.bf16.msra.mxu1 %v4568_v20  ;;  %v5408_v15 = vor.u32 %v6408_v8, %v5407_v7  ;;  %v6402_v20 = vld [vmem:[#allocation8 + $0x824] sm:$0xf0]  ;;  %v6315_v1 = vld [vmem:[#allocation8 + $0x574] sm:$0xf] }
  0x7d   :  { %v5384_v24 = vor.u32 %v6402_v20, %v5383_v19  ;;  %v4716_v20 = vor.u32 %v6231_v12, %v4713_v13  ;;  %v6261_v12 = vld [vmem:[#allocation8 + $0x3c4] sm:$0xf]  ;;  %v4833_v13 = vld [vmem:[#allocation8 + $0x3d8] sm:$0xf0] }
  0x7e   :  { %3002 = vmatpush.bf16.msra.mxu2 %v4760_v29  ;;  %3015 = vmatpush.bf16.msra.mxu3 %v4952_v31  ;;  %v5168_v29 = vor.u32 %v6348_v26, %v5167_v25  ;;  %v5575_v31 = vld [vmem:[#allocation8 + $0x990] sm:$0xf]  ;;  %v4689_v25 = vld [vmem:[#allocation8 + $0x2b8] sm:$0xf0] }
  0x7f   :  { %v5576_v34 = vor.u32 %v6450_v32, %v5575_v31  ;;  %v6279_v31 = vld [vmem:[#allocation8 + $0x454] sm:$0xf]  ;;  %v4905_v32 = vld [vmem:[#allocation8 + $0x468] sm:$0xf0] }
  0x80   :  { %2977 = vmatpush.bf16.msra.mxu0 %v4352_v30  ;;  %2990 = vmatpush.bf16.msra.mxu1 %v4544_v36  ;;  %v5360_v30 = vor.u32 %v6396_v28, %v5359_v27  ;;  %v5768_v36 = vor.u32 %v6498_v35, %v5767_v33  ;;  %v6327_v33 = vld [vmem:[#allocation8 + $0x5d4] sm:$0xf]  ;;  %v4908_v43 = vor.u32 %v6279_v31, %v4905_v32  ;;  %v4377_v32 = vld [vmem:[#allocation8 + $0x48] sm:$0xf0] }
  0x81   :  { %v6147_v31 = vld [vmem:[#allocation8 + $0x34] sm:$0xf] }
  0x82   :  { %3003 = vmatpush.bf16.msra.mxu2 %v4736_v46  ;;  %3016 = vmatpush.bf16.msra.mxu3 %v4928_v47  ;;  %v6492_v46 = vld [vmem:[#allocation8 + $0xaf4] sm:$0xf0] }
  0x83   :  { %v5744_v47 = vor.u32 %v6492_v46, %v5743_v44 }
  0x84   :  { %3022 = vmatpush.bf16.msrb.mxu0 %v5288_v37  ;;  %3035 = vmatpush.bf16.msrb.mxu1 %v5480_v41  ;;  %v5143_v37 = vld [vmem:[#allocation8 + $0x630] sm:$0xf]  ;;  %v6390_v41 = vld [vmem:[#allocation8 + $0x7c4] sm:$0xf0] }
  0x85   :  { %v5144_v39 = vor.u32 %v6342_v38, %v5143_v37  ;;  %v5336_v42 = vor.u32 %v6390_v41, %v5335_v40  ;;  %v5097_v37 = vld [vmem:[#allocation8 + $0x5e8] sm:$0xf0]  ;;  %v6171_v38 = vld [vmem:[#allocation8 + $0xf4] sm:$0xf] }
  0x86   :  { %3048 = vmatpush.bf16.msrb.mxu2 %v5672_v49  ;;  %3061 = vmatpush.bf16.msrb.mxu3 %v5864_v51  ;;  %v5119_v49 = vld [vmem:[#allocation8 + $0x600] sm:$0xf]  ;;  %v6219_v41 = vld [vmem:[#allocation8 + $0x274] sm:$0xf] }
  0x87   :  { %v5311_v51 = vld [vmem:[#allocation8 + $0x780] sm:$0xf] }
  0x88   :  { %3023 = vmatpush.bf16.msrb.mxu0 %v5264_v50  ;;  %3036 = vmatpush.bf16.msrb.mxu1 %v5456_v55  ;;  %v6336_v50 = vld [vmem:[#allocation8 + $0x614] sm:$0xf0]  ;;  %v5312_v54 = vor.u32 %v6384_v53, %v5311_v51  ;;  %v5527_v55 = vld [vmem:[#allocation8 + $0x930] sm:$0xf]  ;;  %v5073_v53 = vld [vmem:[#allocation8 + $0x5b8] sm:$0xf0] }
  0x89   :  { %v5120_v52 = vor.u32 %v6336_v50, %v5119_v49  ;;  %v5528_v57 = vor.u32 %v6438_v56, %v5527_v55  ;;  %v4881_v49 = vld [vmem:[#allocation8 + $0x438] sm:$0xf0]  ;;  %v6321_v50 = vld [vmem:[#allocation8 + $0x5a4] sm:$0xf] }
  0x8a   :  { %3049 = vmatpush.bf16.msrb.mxu2 %v5648_v61  ;;  %3062 = vmatpush.bf16.msrb.mxu3 %v5840_v63  ;;  %v5503_v61 = vld [vmem:[#allocation8 + $0x900] sm:$0xf]  ;;  %v4449_v55 = vld [vmem:[#allocation8 + $0xd8] sm:$0xf0]  ;;  %v6213_v56 = vld [vmem:[#allocation8 + $0x244] sm:$0xf] }
  0x8c   :  { %3024 = vmatpush.bf16.msrb.mxu0 %v5240_v62  ;;  %3037 = vmatpush.bf16.msrb.mxu1 %v5432_v3  ;;  %v6432_v62 = vld [vmem:[#allocation8 + $0x914] sm:$0xf0] }
  0x8d   :  { %v5504_v63 = vor.u32 %v6432_v62, %v5503_v61  ;;  %v6876_v3 = vld [vmem:[#allocation7] sm:$0xff]  ;;  %v5076_v61 = vor.u32 %v6321_v50, %v5073_v53 }
  0x8e   :  { %3050 = vmatpush.bf16.msrb.mxu2 %v5624_v9  ;;  %3063 = vmatpush.bf16.msrb.mxu3 %v5816_v11  ;;  %v196_v4 = vperm.slane %v6876_v3, 0  ;;  %v197_v5 = vperm.slane %v6876_v3, 1  ;;  %v6183_v9 = vld [vmem:[#allocation8 + $0x154] sm:$0xf]  ;;  %v198_v16 = vperm.slane %v6876_v3, 2  ;;  %v199_v19 = vperm.slane %v6876_v3, 3 }
  0x8f   :  { %v4545_v53 = vld [vmem:[#allocation8 + $0x198] sm:$0xf0] }
  0x90   :  { %3025 = vmatpush.bf16.msrb.mxu0 %v5216_v10  ;;  %3038 = vmatpush.bf16.msrb.mxu1 %v5408_v15  ;;  %v4521_v10 = vld [vmem:[#allocation8 + $0x168] sm:$0xf0] }
  0x91   :  { %v4524_v17 = vor.u32 %v6183_v9, %v4521_v10 }
  0x92   :  { %3051 = vmatpush.bf16.msrb.mxu2 %v5600_v21  ;;  %3064 = vmatpush.bf16.msrb.mxu3 %v5792_v23  ;;  %v6177_v21 = vld [vmem:[#allocation8 + $0x124] sm:$0xf] }
  0x94   :  { %3026 = vmatpush.bf16.msrb.mxu0 %v5192_v22  ;;  %3039 = vmatpush.bf16.msrb.mxu1 %v5384_v24  ;;  %v4497_v22 = vld [vmem:[#allocation8 + $0x138] sm:$0xf0]  ;;  %v6225_v24 = vld [vmem:[#allocation8 + $0x2a4] sm:$0xf] }
  0x96   :  { %3052 = vmatpush.bf16.msrb.mxu2 %v5576_v34  ;;  %3065 = vmatpush.bf16.msrb.mxu3 %v5768_v36  ;;  %v4692_v36 = vor.u32 %v6225_v24, %v4689_v25 }
  0x98   :  { %3027 = vmatpush.bf16.msrb.mxu0 %v5168_v29  ;;  %3040 = vmatpush.bf16.msrb.mxu1 %v5360_v30  ;;  %v4500_v30 = vor.u32 %v6177_v21, %v4497_v22  ;;  %v4593_v21 = vld [vmem:[#allocation8 + $0x1f8] sm:$0xf0]  ;;  %v4836_v22 = vor.u32 %v6261_v12, %v4833_v13  ;;  %v6369_v13 = vld [vmem:[#allocation8 + $0x724] sm:$0xf] }
  0x9a   :  { %3053 = vmatpush.bf16.msrb.mxu2 %v5552_v45  ;;  %3066 = vmatpush.bf16.msrb.mxu3 %v5744_v47  ;;  %v5100_v45 = vor.u32 %v6327_v33, %v5097_v37  ;;  %v6273_v47 = vld [vmem:[#allocation8 + $0x424] sm:$0xf]  ;;  %v200_v33 = vperm.slane %v6876_v3, 4 }
  0x9b   :  { %v4884_v59 = vor.u32 %v6273_v47, %v4881_v49  ;;  %v4353_v47 = vld [vmem:[#allocation8 + $0x18] sm:$0xf0] }
  0x9c   :  { %3028 = vmatpush.bf16.msrb.mxu0 %v5144_v39  ;;  %3041 = vmatpush.bf16.msrb.mxu1 %v5336_v42  ;;  %v4473_v39 = vld [vmem:[#allocation8 + $0x108] sm:$0xf0] }
  0x9d   :  { %v4665_v42 = vld [vmem:[#allocation8 + $0x288] sm:$0xf0]  ;;  %v4476_v46 = vor.u32 %v6171_v38, %v4473_v39  ;;  %v4380_v39 = vor.u32 %v6147_v31, %v4377_v32  ;;  %v6519_v32 = vld [vmem:[#allocation8 + $0xbd4] sm:$0xf] }
  0x9e   :  { %3054 = vmatpush.bf16.msrb.mxu2 %v5528_v57  ;;  %3067 = vmatpush.bf16.msrb.mxu3 %v5720_v60  ;;  %v4641_v57 = vld [vmem:[#allocation8 + $0x258] sm:$0xf0]  ;;  %v5673_v31 = vld [vmem:[#allocation8 + $0xa68] sm:$0xf0] }
  0xa0   :  { %3029 = vmatpush.bf16.msrb.mxu0 %v5120_v52  ;;  %3042 = vmatpush.bf16.msrb.mxu1 %v5312_v54  ;;  %v4668_v52 = vor.u32 %v6219_v41, %v4665_v42  ;;  %v6165_v54 = vld [vmem:[#allocation8 + $0xc4] sm:$0xf]  ;;  %v4785_v41 = vld [vmem:[#allocation8 + $0x378] sm:$0xf0] }
  0xa1   :  { %v4452_v62 = vor.u32 %v6165_v54, %v4449_v55  ;;  %v6297_v42 = vld [vmem:[#allocation8 + $0x4e4] sm:$0xf]  ;;  %v6375_v54 = vld [vmem:[#allocation8 + $0x754] sm:$0xf] }
  0xa2   :  { %3055 = vmatpush.bf16.msrb.mxu2 %v5504_v63  ;;  %3068 = vmatpush.bf16.msrb.mxu3 %v5696_v2  ;;  %v6267_v63 = vld [vmem:[#allocation8 + $0x3f4] sm:$0xf]  ;;  %v4644_v2 = vor.u32 %v6213_v56, %v4641_v57  ;;  %v5289_v57 = vld [vmem:[#allocation8 + $0x768] sm:$0xf0] }
  0xa3   :  { %v4860_v9 = vor.u32 %v6267_v63, %v4857_v0  ;;  %v6243_v63 = vld [vmem:[#allocation8 + $0x334] sm:$0xf]  ;;  %v4761_v0 = vld [vmem:[#allocation8 + $0x348] sm:$0xf0] }
  0xa4   :  { %v4764_v12 = vor.u32 %v6243_v63, %v4761_v0  ;;  %v6459_v0 = vld [vmem:[#allocation8 + $0x9f4] sm:$0xf] }
  0xc0   :  { %v541_v6 = vpop.f32.mrf.mxu0  ;;  %v554_v8 = vpop.f32.mrf.mxu1 }
  0xc1   :  { %v542_v7 = vadd.f32 %v541_v6, %v196_v4  ;;  %v555_v11 = vadd.f32 %v554_v8, %v197_v5  ;;  %v5049_v4 = vld [vmem:[#allocation8 + $0x588] sm:$0xf0]  ;;  %v6159_v5 = vld [vmem:[#allocation8 + $0x94] sm:$0xf] }
  0xc2   :  { %v4425_v6 = vld [vmem:[#allocation8 + $0xa8] sm:$0xf0]  ;;  %v5052_v10 = vor.u32 %v6315_v1, %v5049_v4 }
  0xc3   :  { %v636_v14 = vmax.f32 %v542_v7, 0.0  ;;  %v637_v15 = vmax.f32 %v555_v11, 0.0  ;;  %v6207_v7 = vld [vmem:[#allocation8 + $0x214] sm:$0xf]  ;;  %v4617_v8 = vld [vmem:[#allocation8 + $0x228] sm:$0xf0]  ;;  %v4428_v11 = vor.u32 %v6159_v5, %v4425_v6 }
  0xc4   :  { %v6291_v5 = vld [vmem:[#allocation8 + $0x4b4] sm:$0xf]  ;;  %v4953_v6 = vld [vmem:[#allocation8 + $0x4c8] sm:$0xf0] }
  0xc5   :  { %v6881_v18 = vpack.c.bf16 %v636_v14, %v636_v14  ;;  %v6884_v23 = vpack.c.bf16 %v637_v15, %v637_v15  ;;  %v6309_v14 = vld [vmem:[#allocation8 + $0x544] sm:$0xf]  ;;  %v4620_v15 = vor.u32 %v6207_v7, %v4617_v8  ;;  %v203_v8 = vperm.slane %v6876_v3, 7 }
  0xc7   :  { %2978 = vmatmul.bf16.vlgmr.msra.gmra.mxu0 %v6881_v18  ;;  %2991 = vmatmul.bf16.vlgmr.msra.gmra.mxu1 %v6884_v23 }
  0xc8   :  { %v580_v28 = vpop.f32.mrf.mxu3  ;;  %3074 = vmatpush.bf16.msra.mxu0 %v4524_v17  ;;  %v543_v29 = vpop.f32.mrf.mxu0  ;;  %3087 = vmatpush.bf16.msra.mxu1 %v4716_v20  ;;  %v6153_v17 = vld [vmem:[#allocation8 + $0x64] sm:$0xf] }
  0xc9   :  { %v567_v26 = vpop.f32.mrf.mxu2  ;;  %v581_v34 = vadd.f32 %v580_v28, %v199_v19  ;;  %v556_v35 = vpop.f32.mrf.mxu1  ;;  %v4401_v19 = vld [vmem:[#allocation8 + $0x78] sm:$0xf0]  ;;  %v6201_v20 = vld [vmem:[#allocation8 + $0x1e4] sm:$0xf]  ;;  %v6303_v28 = vld [vmem:[#allocation8 + $0x514] sm:$0xf] }
  0xca   :  { %v568_v27 = vadd.f32 %v567_v26, %v198_v16  ;;  %v5025_v16 = vld [vmem:[#allocation8 + $0x558] sm:$0xf0]  ;;  %v4404_v25 = vor.u32 %v6153_v17, %v4401_v19  ;;  %v6255_v26 = vld [vmem:[#allocation8 + $0x394] sm:$0xf]  ;;  %v4596_v29 = vor.u32 %v6201_v20, %v4593_v21  ;;  %v4569_v35 = vld [vmem:[#allocation8 + $0x1c8] sm:$0xf0]  ;;  %v4956_v17 = vor.u32 %v6291_v5, %v4953_v6 }
  0xcb   :  { %v639_v48 = vmax.f32 %v581_v34, 0.0  ;;  %v5028_v24 = vor.u32 %v6309_v14, %v5025_v16  ;;  %v6195_v34 = vld [vmem:[#allocation8 + $0x1b4] sm:$0xf]  ;;  %v5265_v14 = vld [vmem:[#allocation8 + $0x738] sm:$0xf0] }
  0xcc   :  { %v638_v40 = vmax.f32 %v568_v27, 0.0  ;;  %3075 = vmatpush.bf16.msra.mxu0 %v4500_v30  ;;  %3088 = vmatpush.bf16.msra.mxu1 %v4692_v36  ;;  %v4809_v27 = vld [vmem:[#allocation8 + $0x3a8] sm:$0xf0]  ;;  %v201_v36 = vperm.slane %v6876_v3, 5  ;;  %v5457_v19 = vld [vmem:[#allocation8 + $0x8b8] sm:$0xf0] }
  0xcd   :  { %v6890_v51 = vpack.c.bf16 %v639_v48, %v639_v48  ;;  %v5001_v30 = vld [vmem:[#allocation8 + $0x528] sm:$0xf0]  ;;  %v4812_v37 = vor.u32 %v6255_v26, %v4809_v27  ;;  %v6237_v20 = vld [vmem:[#allocation8 + $0x304] sm:$0xf]  ;;  %v4737_v21 = vld [vmem:[#allocation8 + $0x318] sm:$0xf0] }
  0xce   :  { %v6888_v44 = vpack.c.bf16 %v638_v40, %v638_v40  ;;  %v5004_v38 = vor.u32 %v6303_v28, %v5001_v30  ;;  %v6249_v40 = vld [vmem:[#allocation8 + $0x364] sm:$0xf]  ;;  %v4929_v26 = vld [vmem:[#allocation8 + $0x498] sm:$0xf0]  ;;  %v6471_v27 = vld [vmem:[#allocation8 + $0xa54] sm:$0xf]  ;;  %v5268_v30 = vor.u32 %v6369_v13, %v5265_v14 }
  0xcf   :  { %3017 = vmatmul.bf16.vlgmr.msra.gmra.mxu3 %v6890_v51  ;;  %v4788_v56 = vor.u32 %v6249_v40, %v4785_v41  ;;  %v6411_v41 = vld [vmem:[#allocation8 + $0x874] sm:$0xf]  ;;  %v5817_v5 = vld [vmem:[#allocation8 + $0xb88] sm:$0xf0]  ;;  %v6453_v14 = vld [vmem:[#allocation8 + $0x9c4] sm:$0xf] }
  0xd0   :  { %3004 = vmatmul.bf16.vlgmr.msra.gmra.mxu2 %v6888_v44  ;;  %3113 = vmatpush.bf16.msra.mxu3 %v5100_v45  ;;  %v582_v60 = vpop.f32.mrf.mxu3  ;;  %v4977_v45 = vld [vmem:[#allocation8 + $0x4f8] sm:$0xf0]  ;;  %v6351_v6 = vld [vmem:[#allocation8 + $0x694] sm:$0xf] }
  0xd1   :  { %3100 = vmatpush.bf16.msra.mxu2 %v4908_v43  ;;  %v569_v58 = vpop.f32.mrf.mxu2  ;;  %3076 = vmatpush.bf16.msra.mxu0 %v4476_v46  ;;  %v4572_v43 = vor.u32 %v6195_v34, %v4569_v35  ;;  %v6141_v46 = vld [vmem:[#allocation8 + $0x4] sm:$0xf] }
  0xd2   :  { %3089 = vmatpush.bf16.msra.mxu1 %v4668_v52  ;;  %v6189_v52 = vld [vmem:[#allocation8 + $0x184] sm:$0xf]  ;;  %v6423_v58 = vld [vmem:[#allocation8 + $0x8d4] sm:$0xf] }
  0xd3   :  { %v4548_v4 = vor.u32 %v6189_v52, %v4545_v53  ;;  %v6513_v52 = vld [vmem:[#allocation8 + $0xba4] sm:$0xf] }
  0xd4   :  { %3114 = vmatpush.bf16.msra.mxu3 %v5076_v61  ;;  %v4980_v61 = vor.u32 %v6297_v42, %v4977_v45  ;;  %v5433_v42 = vld [vmem:[#allocation8 + $0x888] sm:$0xf0] }
  0xd5   :  { %3101 = vmatpush.bf16.msra.mxu2 %v4884_v59  ;;  %3077 = vmatpush.bf16.msra.mxu0 %v4452_v62  ;;  %v5481_v59 = vld [vmem:[#allocation8 + $0x8e8] sm:$0xf0]  ;;  %v4356_v62 = vor.u32 %v6141_v46, %v4353_v47  ;;  %v5436_v53 = vor.u32 %v6411_v41, %v5433_v42  ;;  %v6489_v41 = vld [vmem:[#allocation8 + $0xae4] sm:$0xf] }
  0xd6   :  { %3090 = vmatpush.bf16.msra.mxu1 %v4644_v2  ;;  %v202_v2 = vperm.slane %v6876_v3, 6 }
  0xd8   :  { %3115 = vmatpush.bf16.msra.mxu3 %v5052_v10 }
  0xd9   :  { %3102 = vmatpush.bf16.msra.mxu2 %v4860_v9  ;;  %3078 = vmatpush.bf16.msra.mxu0 %v4428_v11  ;;  %v5292_v9 = vor.u32 %v6375_v54, %v5289_v57  ;;  %v5484_v11 = vor.u32 %v6423_v58, %v5481_v59  ;;  %v5841_v54 = vld [vmem:[#allocation8 + $0xbb8] sm:$0xf0]  ;;  %v6405_v58 = vld [vmem:[#allocation8 + $0x844] sm:$0xf] }
  0xda   :  { %3091 = vmatpush.bf16.msra.mxu1 %v4620_v15  ;;  %v6417_v15 = vld [vmem:[#allocation8 + $0x8a4] sm:$0xf]  ;;  %v5409_v59 = vld [vmem:[#allocation8 + $0x858] sm:$0xf0] }
  0xdb   :  { %v5460_v35 = vor.u32 %v6417_v15, %v5457_v19  ;;  %v5601_v15 = vld [vmem:[#allocation8 + $0x9d8] sm:$0xf0]  ;;  %v6501_v19 = vld [vmem:[#allocation8 + $0xb44] sm:$0xf] }
  0xdc   :  { %3116 = vmatpush.bf16.msra.mxu3 %v5028_v24 }
  0xdd   :  { %3103 = vmatpush.bf16.msra.mxu2 %v4836_v22  ;;  %3079 = vmatpush.bf16.msra.mxu0 %v4404_v25  ;;  %v6285_v25 = vld [vmem:[#allocation8 + $0x484] sm:$0xf] }
  0xde   :  { %3092 = vmatpush.bf16.msra.mxu1 %v4596_v29  ;;  %v4932_v40 = vor.u32 %v6285_v25, %v4929_v26  ;;  %v5604_v25 = vor.u32 %v6453_v14, %v5601_v15  ;;  %v6477_v14 = vld [vmem:[#allocation8 + $0xa84] sm:$0xf]  ;;  %v5697_v15 = vld [vmem:[#allocation8 + $0xa98] sm:$0xf0] }
  0xe0   :  { %v593_v48 = vpop.f32.mrf.mxu0  ;;  %v606_v50 = vpop.f32.mrf.mxu1  ;;  %3117 = vmatpush.bf16.msra.mxu3 %v5004_v38  ;;  %v5241_v38 = vld [vmem:[#allocation8 + $0x708] sm:$0xf0] }
  0xe1   :  { %v594_v49 = vadd.f32 %v593_v48, %v200_v33  ;;  %v607_v55 = vadd.f32 %v606_v50, %v201_v36  ;;  %3104 = vmatpush.bf16.msra.mxu2 %v4812_v37  ;;  %3080 = vmatpush.bf16.msra.mxu0 %v4380_v39  ;;  %v5865_v33 = vld [vmem:[#allocation8 + $0xbe8] sm:$0xf0]  ;;  %v4740_v36 = vor.u32 %v6237_v20, %v4737_v21  ;;  %v6363_v37 = vld [vmem:[#allocation8 + $0x6f4] sm:$0xf]  ;;  %v5649_v50 = vld [vmem:[#allocation8 + $0xa38] sm:$0xf0] }
  0xe2   :  { %3093 = vmatpush.bf16.msra.mxu1 %v4572_v43  ;;  %v5676_v43 = vor.u32 %v6471_v27, %v5673_v31  ;;  %v5868_v46 = vor.u32 %v6519_v32, %v5865_v33  ;;  %v5244_v47 = vor.u32 %v6363_v37, %v5241_v38  ;;  %v5793_v20 = vld [vmem:[#allocation8 + $0xb58] sm:$0xf0]  ;;  %v6345_v21 = vld [vmem:[#allocation8 + $0x664] sm:$0xf]  ;;  %v6447_v27 = vld [vmem:[#allocation8 + $0x994] sm:$0xf] }
  0xe3   :  { %v640_v60 = vmax.f32 %v594_v49, 0.0  ;;  %v641_v1 = vmax.f32 %v607_v55, 0.0  ;;  %v6465_v49 = vld [vmem:[#allocation8 + $0xa24] sm:$0xf]  ;;  %v5796_v26 = vor.u32 %v6501_v19, %v5793_v20  ;;  %v6495_v31 = vld [vmem:[#allocation8 + $0xb14] sm:$0xf] }
  0xe4   :  { %3118 = vmatpush.bf16.msra.mxu3 %v4980_v61  ;;  %v6357_v55 = vld [vmem:[#allocation8 + $0x6c4] sm:$0xf]  ;;  %v5652_v61 = vor.u32 %v6465_v49, %v5649_v50  ;;  %v5769_v32 = vld [vmem:[#allocation8 + $0xb28] sm:$0xf0]  ;;  %v6339_v33 = vld [vmem:[#allocation8 + $0x634] sm:$0xf] }
  0xe5   :  { %v6897_v7 = vpack.c.bf16 %v640_v60, %v640_v60  ;;  %v6900_v10 = vpack.c.bf16 %v641_v1, %v641_v1  ;;  %3105 = vmatpush.bf16.msra.mxu2 %v4788_v56  ;;  %3081 = vmatpush.bf16.msra.mxu0 %v4356_v62  ;;  %v5217_v56 = vld [vmem:[#allocation8 + $0x6d8] sm:$0xf0]  ;;  %v5844_v62 = vor.u32 %v6513_v52, %v5841_v54  ;;  %v5625_v1 = vld [vmem:[#allocation8 + $0xa08] sm:$0xf0]  ;;  %v6381_v50 = vld [vmem:[#allocation8 + $0x784] sm:$0xf] }
  0xe6   :  { %3094 = vmatpush.bf16.msra.mxu1 %v4548_v4  ;;  %v5220_v63 = vor.u32 %v6357_v55, %v5217_v56  ;;  %v6507_v4 = vld [vmem:[#allocation8 + $0xb74] sm:$0xf]  ;;  %v5772_v38 = vor.u32 %v6495_v31, %v5769_v32  ;;  %v5121_v49 = vld [vmem:[#allocation8 + $0x618] sm:$0xf0]  ;;  %v6187_v55 = vld [vmem:[#allocation8 + $0x16c] sm:$0xf0] }
  0xe7   :  { %3030 = vmatmul.bf16.vlgmr.msrb.gmra.mxu0 %v6897_v7  ;;  %3043 = vmatmul.bf16.vlgmr.msrb.gmra.mxu1 %v6900_v10  ;;  %v5820_v13 = vor.u32 %v6507_v4, %v5817_v5  ;;  %v5313_v52 = vld [vmem:[#allocation8 + $0x798] sm:$0xf0]  ;;  %v4719_v56 = vld [vmem:[#allocation8 + $0x2d8] sm:$0xf]  ;;  %v4503_v4 = vld [vmem:[#allocation8 + $0x128] sm:$0xf] }
  0xe8   :  { %v619_v16 = vpop.f32.mrf.mxu2  ;;  %v632_v24 = vpop.f32.mrf.mxu3  ;;  %3119 = vmatpush.bf16.msra.mxu3 %v4956_v17  ;;  %v4887_v31 = vld [vmem:[#allocation8 + $0x428] sm:$0xf]  ;;  %v6277_v32 = vld [vmem:[#allocation8 + $0x43c] sm:$0xf0] }
  0xe9   :  { %v620_v22 = vadd.f32 %v619_v16, %v202_v2  ;;  %v595_v3 = vpop.f32.mrf.mxu0  ;;  %v633_v28 = vadd.f32 %v632_v24, %v203_v8  ;;  %3126 = vmatpush.bf16.msrb.mxu0 %v5292_v9  ;;  %v608_v29 = vpop.f32.mrf.mxu1  ;;  %3106 = vmatpush.bf16.msra.mxu2 %v4764_v12  ;;  %v5412_v2 = vor.u32 %v6405_v58, %v5409_v59  ;;  %v5193_v8 = vld [vmem:[#allocation8 + $0x6a8] sm:$0xf0]  ;;  %v6399_v9 = vld [vmem:[#allocation8 + $0x814] sm:$0xf]  ;;  %v6393_v24 = vld [vmem:[#allocation8 + $0x7e4] sm:$0xf] }
  0xea   :  { %3139 = vmatpush.bf16.msrb.mxu1 %v5484_v11  ;;  %v5385_v11 = vld [vmem:[#allocation8 + $0x828] sm:$0xf0]  ;;  %v5628_v12 = vor.u32 %v6459_v0, %v5625_v1  ;;  %v5196_v16 = vor.u32 %v6351_v6, %v5193_v8  ;;  %v5361_v3 = vld [vmem:[#allocation8 + $0x7f8] sm:$0xf0]  ;;  %v6435_v59 = vld [vmem:[#allocation8 + $0x934] sm:$0xf] }
  0xeb   :  { %v642_v34 = vmax.f32 %v620_v22, 0.0  ;;  %v643_v39 = vmax.f32 %v633_v28, 0.0  ;;  %v5388_v17 = vor.u32 %v6399_v9, %v5385_v11  ;;  %v5169_v22 = vld [vmem:[#allocation8 + $0x678] sm:$0xf0]  ;;  %v5577_v28 = vld [vmem:[#allocation8 + $0x9a8] sm:$0xf0] }
  0xec   :  { %3120 = vmatpush.bf16.msra.mxu3 %v4932_v40  ;;  %v5172_v29 = vor.u32 %v6345_v21, %v5169_v22  ;;  %v5580_v37 = vor.u32 %v6447_v27, %v5577_v28  ;;  %v5553_v40 = vld [vmem:[#allocation8 + $0x978] sm:$0xf0]  ;;  %v5721_v0 = vld [vmem:[#allocation8 + $0xac8] sm:$0xf0]  ;;  %v6181_v6 = vld [vmem:[#allocation8 + $0x13c] sm:$0xf0]  ;;  %v5700_v28 = vor.u32 %v6477_v14, %v5697_v15 }
  0xed   :  { %v6904_v48 = vpack.c.bf16 %v642_v34, %v642_v34  ;;  %v6906_v45 = vpack.c.bf16 %v643_v39, %v643_v39  ;;  %3127 = vmatpush.bf16.msrb.mxu0 %v5268_v30  ;;  %3107 = vmatpush.bf16.msra.mxu2 %v4740_v36  ;;  %v5364_v30 = vor.u32 %v6393_v24, %v5361_v3  ;;  %v5145_v34 = vld [vmem:[#allocation8 + $0x648] sm:$0xf0]  ;;  %v6441_v39 = vld [vmem:[#allocation8 + $0x964] sm:$0xf]  ;;  %v4695_v8 = vld [vmem:[#allocation8 + $0x2a8] sm:$0xf] }
  0xee   :  { %3140 = vmatpush.bf16.msrb.mxu1 %v5460_v35  ;;  %v6387_v35 = vld [vmem:[#allocation8 + $0x7b4] sm:$0xf]  ;;  %v5337_v36 = vld [vmem:[#allocation8 + $0x7c8] sm:$0xf0]  ;;  %v5148_v42 = vor.u32 %v6339_v33, %v5145_v34  ;;  %v5556_v54 = vor.u32 %v6441_v39, %v5553_v40  ;;  %v6229_v9 = vld [vmem:[#allocation8 + $0x2bc] sm:$0xf0]  ;;  %v4504_v19 = vor.u32 %v6181_v6, %v4503_v4 }
  0xef   :  { %3056 = vmatmul.bf16.vlgmr.msrb.gmra.mxu2 %v6904_v48  ;;  %3069 = vmatmul.bf16.vlgmr.msrb.gmra.mxu3 %v6906_v45  ;;  %v4696_v20 = vor.u32 %v6229_v9, %v4695_v8  ;;  %v5103_v21 = vld [vmem:[#allocation8 + $0x5d8] sm:$0xf]  ;;  %v6331_v22 = vld [vmem:[#allocation8 + $0x5ec] sm:$0xf0]  ;;  %v4647_v39 = vld [vmem:[#allocation8 + $0x248] sm:$0xf] }
  0xf0   :  { %v621_v57 = vpop.f32.mrf.mxu2  ;;  %v634_v60 = vpop.f32.mrf.mxu3  ;;  %3165 = vmatpush.bf16.msrb.mxu3 %v5868_v46  ;;  %v5745_v46 = vld [vmem:[#allocation8 + $0xaf8] sm:$0xf0]  ;;  %v4479_v24 = vld [vmem:[#allocation8 + $0xf8] sm:$0xf]  ;;  %v6223_v27 = vld [vmem:[#allocation8 + $0x28c] sm:$0xf0] }
  0xf1   :  { %3152 = vmatpush.bf16.msrb.mxu2 %v5676_v43  ;;  %3128 = vmatpush.bf16.msrb.mxu0 %v5244_v47  ;;  %v5340_v43 = vor.u32 %v6387_v35, %v5337_v36  ;;  %v6333_v47 = vld [vmem:[#allocation8 + $0x604] sm:$0xf]  ;;  %v6235_v57 = vld [vmem:[#allocation8 + $0x2ec] sm:$0xf0]  ;;  %v5748_v58 = vor.u32 %v6489_v41, %v5745_v46  ;;  %v5529_v60 = vld [vmem:[#allocation8 + $0x948] sm:$0xf0]  ;;  %v4888_v41 = vor.u32 %v6277_v32, %v4887_v31 }
  0xf2   :  { %3141 = vmatpush.bf16.msrb.mxu1 %v5436_v53  ;;  %v4527_v53 = vld [vmem:[#allocation8 + $0x158] sm:$0xf]  ;;  %v5532_v5 = vor.u32 %v6435_v59, %v5529_v60  ;;  %v5079_v35 = vld [vmem:[#allocation8 + $0x5a8] sm:$0xf]  ;;  %v6325_v36 = vld [vmem:[#allocation8 + $0x5bc] sm:$0xf0] }
  0xf3   :  { %v4528_v1 = vor.u32 %v6187_v55, %v4527_v53  ;;  %v6217_v40 = vld [vmem:[#allocation8 + $0x25c] sm:$0xf0]  ;;  %v6271_v46 = vld [vmem:[#allocation8 + $0x40c] sm:$0xf0]  ;;  %v4431_v53 = vld [vmem:[#allocation8 + $0x98] sm:$0xf] }
  0xf4   :  { %3166 = vmatpush.bf16.msrb.mxu3 %v5844_v62  ;;  %v5316_v62 = vor.u32 %v6381_v50, %v5313_v52  ;;  %v5055_v50 = vld [vmem:[#allocation8 + $0x578] sm:$0xf]  ;;  %v6319_v52 = vld [vmem:[#allocation8 + $0x58c] sm:$0xf0]  ;;  %v4839_v59 = vld [vmem:[#allocation8 + $0x3c8] sm:$0xf] }
  0xf5   :  { %3153 = vmatpush.bf16.msrb.mxu2 %v5652_v61  ;;  %3129 = vmatpush.bf16.msrb.mxu0 %v5220_v63  ;;  %v5124_v61 = vor.u32 %v6333_v47, %v5121_v49  ;;  %v6483_v63 = vld [vmem:[#allocation8 + $0xab4] sm:$0xf]  ;;  %v4648_v49 = vor.u32 %v6217_v40, %v4647_v39  ;;  %v4623_v55 = vld [vmem:[#allocation8 + $0x218] sm:$0xf]  ;;  %v6265_v60 = vld [vmem:[#allocation8 + $0x3dc] sm:$0xf0] }
  0xf6   :  { %3142 = vmatpush.bf16.msrb.mxu1 %v5412_v2  ;;  %v4720_v2 = vor.u32 %v6235_v57, %v4719_v56  ;;  %v5724_v11 = vor.u32 %v6483_v63, %v5721_v0  ;;  %v6211_v56 = vld [vmem:[#allocation8 + $0x22c] sm:$0xf0]  ;;  %v5031_v63 = vld [vmem:[#allocation8 + $0x548] sm:$0xf]  ;;  %v6313_v0 = vld [vmem:[#allocation8 + $0x55c] sm:$0xf0]  ;;  %v4840_v6 = vor.u32 %v6265_v60, %v4839_v59 }
  0xf7   :  { %3082 = vmatmul.bf16.vlgmr.msra.gmra.mxu0 %v6881_v18  ;;  %3095 = vmatmul.bf16.vlgmr.msra.gmra.mxu1 %v6884_v23  ;;  %v4599_v4 = vld [vmem:[#allocation8 + $0x1e8] sm:$0xf]  ;;  %v5032_v8 = vor.u32 %v6313_v0, %v5031_v63  ;;  %v4815_v9 = vld [vmem:[#allocation8 + $0x398] sm:$0xf]  ;;  %v6307_v15 = vld [vmem:[#allocation8 + $0x52c] sm:$0xf0] }
  0xf8   :  { %3167 = vmatpush.bf16.msrb.mxu3 %v5820_v13  ;;  %v5505_v13 = vld [vmem:[#allocation8 + $0x918] sm:$0xf0]  ;;  %v5007_v14 = vld [vmem:[#allocation8 + $0x518] sm:$0xf]  ;;  %v4551_v31 = vld [vmem:[#allocation8 + $0x188] sm:$0xf] }
  0xf9   :  { %3154 = vmatpush.bf16.msrb.mxu2 %v5628_v12  ;;  %3130 = vmatpush.bf16.msrb.mxu0 %v5196_v16  ;;  %v6429_v12 = vld [vmem:[#allocation8 + $0x904] sm:$0xf]  ;;  %v4911_v16 = vld [vmem:[#allocation8 + $0x458] sm:$0xf]  ;;  %v6193_v32 = vld [vmem:[#allocation8 + $0x19c] sm:$0xf0] }
  0xfa   :  { %3143 = vmatpush.bf16.msrb.mxu1 %v5388_v17  ;;  %v6283_v17 = vld [vmem:[#allocation8 + $0x46c] sm:$0xf0]  ;;  %v5508_v3 = vor.u32 %v6429_v12, %v5505_v13  ;;  %v4767_v39 = vld [vmem:[#allocation8 + $0x338] sm:$0xf]  ;;  %v4935_v59 = vld [vmem:[#allocation8 + $0x488] sm:$0xf] }
  0xfb   :  { %v6247_v40 = vld [vmem:[#allocation8 + $0x34c] sm:$0xf0]  ;;  %v6289_v60 = vld [vmem:[#allocation8 + $0x49c] sm:$0xf0] }
  0xfc   :  { %3168 = vmatpush.bf16.msrb.mxu3 %v5796_v26  ;;  %v4671_v26 = vld [vmem:[#allocation8 + $0x278] sm:$0xf] }
  0xfd   :  { %3155 = vmatpush.bf16.msrb.mxu2 %v5604_v25  ;;  %3131 = vmatpush.bf16.msrb.mxu0 %v5172_v29  ;;  %v6175_v25 = vld [vmem:[#allocation8 + $0x10c] sm:$0xf0]  ;;  %v4912_v29 = vor.u32 %v6283_v17, %v4911_v16  ;;  %v4672_v34 = vor.u32 %v6223_v27, %v4671_v26  ;;  %v4383_v16 = vld [vmem:[#allocation8 + $0x38] sm:$0xf] }
  0xfe   :  { %3144 = vmatpush.bf16.msrb.mxu1 %v5364_v30  ;;  %v5104_v30 = vor.u32 %v6331_v22, %v5103_v21  ;;  %v4480_v33 = vor.u32 %v6175_v25, %v4479_v24  ;;  %v6151_v17 = vld [vmem:[#allocation8 + $0x4c] sm:$0xf0]  ;;  %v5008_v22 = vor.u32 %v6307_v15, %v5007_v14  ;;  %v4791_v24 = vld [vmem:[#allocation8 + $0x368] sm:$0xf]  ;;  %v6469_v15 = vld [vmem:[#allocation8 + $0xa3c] sm:$0xf0] }
  0xff   :  { %3108 = vmatmul.bf16.vlgmr.msra.gmra.mxu2 %v6888_v44  ;;  %3121 = vmatmul.bf16.vlgmr.msra.gmra.mxu3 %v6890_v51  ;;  %v4983_v25 = vld [vmem:[#allocation8 + $0x4e8] sm:$0xf]  ;;  %v4384_v26 = vor.u32 %v6151_v17, %v4383_v16 }
 0x100   :  { %3169 = vmatpush.bf16.msrb.mxu3 %v5772_v38  ;;  %v6169_v38 = vld [vmem:[#allocation8 + $0xdc] sm:$0xf0]  ;;  %v5655_v14 = vld [vmem:[#allocation8 + $0xa28] sm:$0xf] }
 0x101   :  { %3156 = vmatpush.bf16.msrb.mxu2 %v5580_v37  ;;  %3132 = vmatpush.bf16.msrb.mxu0 %v5148_v42  ;;  %v4455_v37 = vld [vmem:[#allocation8 + $0xc8] sm:$0xf]  ;;  %v5080_v42 = vor.u32 %v6325_v36, %v5079_v35  ;;  %v6379_v35 = vld [vmem:[#allocation8 + $0x76c] sm:$0xf0]  ;;  %v5487_v36 = vld [vmem:[#allocation8 + $0x8d8] sm:$0xf] }
 0x102   :  { %3145 = vmatpush.bf16.msrb.mxu1 %v5340_v43  ;;  %v4863_v43 = vld [vmem:[#allocation8 + $0x3f8] sm:$0xf]  ;;  %v4456_v47 = vor.u32 %v6169_v38, %v4455_v37  ;;  %v6427_v37 = vld [vmem:[#allocation8 + $0x8ec] sm:$0xf0]  ;;  %v5847_v17 = vld [vmem:[#allocation8 + $0xba8] sm:$0xf] }
 0x103   :  { %v4864_v57 = vor.u32 %v6271_v46, %v4863_v43  ;;  %v4959_v43 = vld [vmem:[#allocation8 + $0x4b8] sm:$0xf]  ;;  %v6295_v46 = vld [vmem:[#allocation8 + $0x4cc] sm:$0xf0] }
 0x104   :  { %3170 = vmatpush.bf16.msrb.mxu3 %v5748_v58  ;;  %v5056_v58 = vor.u32 %v6319_v52, %v5055_v50  ;;  %v5271_v50 = vld [vmem:[#allocation8 + $0x728] sm:$0xf]  ;;  %v4768_v52 = vor.u32 %v6247_v40, %v4767_v39  ;;  %v6457_v40 = vld [vmem:[#allocation8 + $0x9dc] sm:$0xf0] }
 0x105   :  { %3157 = vmatpush.bf16.msrb.mxu2 %v5556_v54  ;;  %3133 = vmatpush.bf16.msrb.mxu0 %v5124_v61  ;;  %v6163_v54 = vld [vmem:[#allocation8 + $0xac] sm:$0xf0]  ;;  %v5607_v39 = vld [vmem:[#allocation8 + $0x9c8] sm:$0xf] }
 0x106   :  { %3146 = vmatpush.bf16.msrb.mxu1 %v5316_v62  ;;  %v4432_v61 = vor.u32 %v6163_v54, %v4431_v53  ;;  %v4624_v62 = vor.u32 %v6211_v56, %v4623_v55  ;;  %v6373_v53 = vld [vmem:[#allocation8 + $0x73c] sm:$0xf0]  ;;  %v5463_v54 = vld [vmem:[#allocation8 + $0x8a8] sm:$0xf]  ;;  %v4960_v56 = vor.u32 %v6295_v46, %v4959_v43 }
 0x107   :  { %v6421_v55 = vld [vmem:[#allocation8 + $0x8bc] sm:$0xf0]  ;;  %v5272_v63 = vor.u32 %v6373_v53, %v5271_v50  ;;  %v5608_v50 = vor.u32 %v6457_v40, %v5607_v39  ;;  %v5703_v39 = vld [vmem:[#allocation8 + $0xa88] sm:$0xf] }
 0x108   :  { %3171 = vmatpush.bf16.msrb.mxu3 %v5724_v11  ;;  %3134 = vmatmul.bf16.vlgmr.msrb.gmra.mxu0 %v6897_v7  ;;  %v6259_v11 = vld [vmem:[#allocation8 + $0x3ac] sm:$0xf0]  ;;  %v5464_v0 = vor.u32 %v6421_v55, %v5463_v54  ;;  %v6505_v43 = vld [vmem:[#allocation8 + $0xb5c] sm:$0xf0]  ;;  %v5583_v55 = vld [vmem:[#allocation8 + $0x998] sm:$0xf] }
 0x109   :  { %3178 = vmatpush.bf16.msra.mxu0 %v4528_v1  ;;  %3158 = vmatpush.bf16.msrb.mxu2 %v5532_v5  ;;  %v4407_v1 = vld [vmem:[#allocation8 + $0x68] sm:$0xf]  ;;  %v6205_v5 = vld [vmem:[#allocation8 + $0x1fc] sm:$0xf0]  ;;  %v4816_v21 = vor.u32 %v6259_v11, %v4815_v9  ;;  %v5439_v11 = vld [vmem:[#allocation8 + $0x878] sm:$0xf] }
 0x10a   :  { %3191 = vmatpush.bf16.msra.mxu1 %v4720_v2  ;;  %v6157_v2 = vld [vmem:[#allocation8 + $0x7c] sm:$0xf0]  ;;  %v4600_v13 = vor.u32 %v6205_v5, %v4599_v4  ;;  %v5247_v5 = vld [vmem:[#allocation8 + $0x6f8] sm:$0xf] }
 0x10b   :  { %3147 = vmatmul.bf16.vlgmr.msrb.gmra.mxu1 %v6900_v10  ;;  %v4408_v12 = vor.u32 %v6157_v2, %v4407_v1  ;;  %v5871_v1 = vld [vmem:[#allocation8 + $0xbd8] sm:$0xf]  ;;  %v6523_v2 = vld [vmem:[#allocation8 + $0xbec] sm:$0xf0]  ;;  %v6397_v53 = vld [vmem:[#allocation8 + $0x7fc] sm:$0xf0] }
 0x10c   :  { %3172 = vmatpush.bf16.msrb.mxu3 %v5700_v28  ;;  %v6301_v28 = vld [vmem:[#allocation8 + $0x4fc] sm:$0xf0] }
 0x10d   :  { %3179 = vmatpush.bf16.msra.mxu0 %v4504_v19  ;;  %3159 = vmatpush.bf16.msrb.mxu2 %v5508_v3  ;;  %v4575_v19 = vld [vmem:[#allocation8 + $0x1b8] sm:$0xf]  ;;  %v6253_v3 = vld [vmem:[#allocation8 + $0x37c] sm:$0xf0]  ;;  %v4984_v38 = vor.u32 %v6301_v28, %v4983_v25  ;;  %v6463_v28 = vld [vmem:[#allocation8 + $0xa0c] sm:$0xf0] }
 0x10e   :  { %3192 = vmatpush.bf16.msra.mxu1 %v4696_v20  ;;  %v6199_v20 = vld [vmem:[#allocation8 + $0x1cc] sm:$0xf0]  ;;  %v6409_v25 = vld [vmem:[#allocation8 + $0x85c] sm:$0xf0] }
 0x10f   :  { %3173 = vmatmul.bf16.vlgmr.msrb.gmra.mxu3 %v6906_v45  ;;  %v4576_v27 = vor.u32 %v6199_v20, %v4575_v19  ;;  %v6517_v19 = vld [vmem:[#allocation8 + $0xbbc] sm:$0xf0] }
 0x110   :  { %3217 = vmatpush.bf16.msra.mxu3 %v5104_v30  ;;  %3160 = vmatmul.bf16.vlgmr.msrb.gmra.mxu2 %v6904_v48  ;;  %v6145_v30 = vld [vmem:[#allocation8 + $0x1c] sm:$0xf0] }
 0x111   :  { %3204 = vmatpush.bf16.msra.mxu2 %v4912_v29  ;;  %3180 = vmatpush.bf16.msra.mxu0 %v4480_v33  ;;  %v4359_v29 = vld [vmem:[#allocation8 + $0x8] sm:$0xf]  ;;  %v5295_v33 = vld [vmem:[#allocation8 + $0x758] sm:$0xf]  ;;  %v6481_v40 = vld [vmem:[#allocation8 + $0xa9c] sm:$0xf0] }
 0x112   :  { %3193 = vmatpush.bf16.msra.mxu1 %v4672_v34  ;;  %v4792_v34 = vor.u32 %v6253_v3, %v4791_v24  ;;  %v5656_v24 = vor.u32 %v6469_v15, %v5655_v14  ;;  %v5415_v3 = vld [vmem:[#allocation8 + $0x848] sm:$0xf]  ;;  %v6385_v15 = vld [vmem:[#allocation8 + $0x79c] sm:$0xf0] }
 0x113   :  { %v5319_v14 = vld [vmem:[#allocation8 + $0x788] sm:$0xf] }
 0x114   :  { %3218 = vmatpush.bf16.msra.mxu3 %v5080_v42  ;;  %v4552_v42 = vor.u32 %v6193_v32, %v4551_v31  ;;  %v6511_v31 = vld [vmem:[#allocation8 + $0xb8c] sm:$0xf0]  ;;  %v5416_v32 = vor.u32 %v6409_v25, %v5415_v3 }
 0x115   :  { %3205 = vmatpush.bf16.msra.mxu2 %v4888_v41  ;;  %3181 = vmatpush.bf16.msra.mxu0 %v4456_v47  ;;  %v4360_v41 = vor.u32 %v6145_v30, %v4359_v29  ;;  %v5296_v47 = vor.u32 %v6379_v35, %v5295_v33  ;;  %v5823_v30 = vld [vmem:[#allocation8 + $0xb78] sm:$0xf]  ;;  %v6439_v3 = vld [vmem:[#allocation8 + $0x94c] sm:$0xf0] }
 0x116   :  { %3194 = vmatpush.bf16.msra.mxu1 %v4648_v49  ;;  %v5488_v49 = vor.u32 %v6427_v37, %v5487_v36  ;;  %v5199_v33 = vld [vmem:[#allocation8 + $0x698] sm:$0xf]  ;;  %v6403_v37 = vld [vmem:[#allocation8 + $0x82c] sm:$0xf0] }
 0x117   :  { %v5391_v36 = vld [vmem:[#allocation8 + $0x818] sm:$0xf] }
 0x118   :  { %3219 = vmatpush.bf16.msra.mxu3 %v5056_v58  ;;  %v6241_v58 = vld [vmem:[#allocation8 + $0x31c] sm:$0xf0]  ;;  %v5392_v46 = vor.u32 %v6403_v37, %v5391_v36  ;;  %v5511_v37 = vld [vmem:[#allocation8 + $0x908] sm:$0xf] }
 0x119   :  { %3206 = vmatpush.bf16.msra.mxu2 %v4864_v57  ;;  %3182 = vmatpush.bf16.msra.mxu0 %v4432_v61  ;;  %v4743_v57 = vld [vmem:[#allocation8 + $0x308] sm:$0xf]  ;;  %v5679_v61 = vld [vmem:[#allocation8 + $0xa58] sm:$0xf] }
 0x11a   :  { %3195 = vmatpush.bf16.msra.mxu1 %v4624_v62  ;;  %v6475_v62 = vld [vmem:[#allocation8 + $0xa6c] sm:$0xf0]  ;;  %v4744_v4 = vor.u32 %v6241_v58, %v4743_v57  ;;  %v5775_v58 = vld [vmem:[#allocation8 + $0xb18] sm:$0xf] }
 0x11b   :  { %v5680_v9 = vor.u32 %v6475_v62, %v5679_v61  ;;  %v5151_v61 = vld [vmem:[#allocation8 + $0x638] sm:$0xf]  ;;  %v6343_v62 = vld [vmem:[#allocation8 + $0x64c] sm:$0xf0] }
 0x11c   :  { %3220 = vmatpush.bf16.msra.mxu3 %v5032_v8  ;;  %v4936_v8 = vor.u32 %v6289_v60, %v4935_v59  ;;  %v6499_v59 = vld [vmem:[#allocation8 + $0xb2c] sm:$0xf0] }
 0x11d   :  { %3207 = vmatpush.bf16.msra.mxu2 %v4840_v6  ;;  %3183 = vmatpush.bf16.msra.mxu0 %v4408_v12  ;;  %v6367_v6 = vld [vmem:[#allocation8 + $0x70c] sm:$0xf0] }
 0x11e   :  { %3196 = vmatpush.bf16.msra.mxu1 %v4600_v13  ;;  %v6415_v12 = vld [vmem:[#allocation8 + $0x88c] sm:$0xf0]  ;;  %v5872_v13 = vor.u32 %v6523_v2, %v5871_v1  ;;  %v5248_v16 = vor.u32 %v6367_v6, %v5247_v5  ;;  %v5776_v2 = vor.u32 %v6499_v59, %v5775_v58  ;;  %v6445_v5 = vld [vmem:[#allocation8 + $0x97c] sm:$0xf0]  ;;  %v5152_v6 = vor.u32 %v6343_v62, %v5151_v61  ;;  %v4673_v58 = vld [vmem:[#allocation8 + $0x290] sm:$0xf0] }
 0x11f   :  { %v5440_v20 = vor.u32 %v6415_v12, %v5439_v11  ;;  %v6391_v1 = vld [vmem:[#allocation8 + $0x7cc] sm:$0xf0]  ;;  %v5127_v11 = vld [vmem:[#allocation8 + $0x608] sm:$0xf]  ;;  %v6274_v61 = vld [vmem:[#allocation8 + $0x42c] sm:$0xf] }
 0x120   :  { %3221 = vmatpush.bf16.msra.mxu3 %v5008_v22  ;;  %v6361_v22 = vld [vmem:[#allocation8 + $0x6dc] sm:$0xf0]  ;;  %v4889_v62 = vld [vmem:[#allocation8 + $0x440] sm:$0xf0] }
 0x121   :  { %3208 = vmatpush.bf16.msra.mxu2 %v4816_v21  ;;  %3184 = vmatpush.bf16.msra.mxu0 %v4384_v26  ;;  %v5223_v21 = vld [vmem:[#allocation8 + $0x6c8] sm:$0xf]  ;;  %v5848_v26 = vor.u32 %v6517_v19, %v5847_v17  ;;  %v6184_v17 = vld [vmem:[#allocation8 + $0x15c] sm:$0xf]  ;;  %v4529_v19 = vld [vmem:[#allocation8 + $0x170] sm:$0xf0] }
 0x122   :  { %3197 = vmatpush.bf16.msra.mxu1 %v4576_v27  ;;  %v5631_v27 = vld [vmem:[#allocation8 + $0x9f8] sm:$0xf]  ;;  %v5224_v29 = vor.u32 %v6361_v22, %v5223_v21  ;;  %v4721_v22 = vld [vmem:[#allocation8 + $0x2f0] sm:$0xf0] }
 0x123   :  { %v5632_v35 = vor.u32 %v6463_v28, %v5631_v27  ;;  %v6487_v27 = vld [vmem:[#allocation8 + $0xacc] sm:$0xf0]  ;;  %v5320_v28 = vor.u32 %v6385_v15, %v5319_v14  ;;  %v6268_v15 = vld [vmem:[#allocation8 + $0x3fc] sm:$0xf] }
 0x124   :  { %3222 = vmatpush.bf16.msra.mxu3 %v4984_v38  ;;  %v5824_v38 = vor.u32 %v6511_v31, %v5823_v30  ;;  %v6178_v30 = vld [vmem:[#allocation8 + $0x12c] sm:$0xf] }
 0x125   :  { %3209 = vmatpush.bf16.msra.mxu2 %v4792_v34  ;;  %3185 = vmatpush.bf16.msra.mxu0 %v4360_v41  ;;  %v6355_v34 = vld [vmem:[#allocation8 + $0x6ac] sm:$0xf0] }
 0x126   :  { %3198 = vmatpush.bf16.msra.mxu1 %v4552_v42  ;;  %v5200_v41 = vor.u32 %v6355_v34, %v5199_v33  ;;  %v5799_v42 = vld [vmem:[#allocation8 + $0xb48] sm:$0xf]  ;;  %v4505_v33 = vld [vmem:[#allocation8 + $0x140] sm:$0xf0]  ;;  %v6226_v34 = vld [vmem:[#allocation8 + $0x2ac] sm:$0xf] }
 0x127   :  { %v5800_v54 = vor.u32 %v6505_v43, %v5799_v42  ;;  %v4913_v42 = vld [vmem:[#allocation8 + $0x470] sm:$0xf0]  ;;  %v4508_v43 = vor.u32 %v6178_v30, %v4505_v33  ;;  %v4841_v30 = vld [vmem:[#allocation8 + $0x3e0] sm:$0xf0] }
 0x128   :  { %3223 = vmatpush.bf16.msra.mxu3 %v4960_v56  ;;  %3186 = vmatmul.bf16.vlgmr.msra.gmra.mxu0 %v6881_v18  ;;  %v6451_v56 = vld [vmem:[#allocation8 + $0x9ac] sm:$0xf0]  ;;  %v5033_v33 = vld [vmem:[#allocation8 + $0x560] sm:$0xf0] }
 0x129   :  { %3230 = vmatpush.bf16.msrb.mxu0 %v5296_v47  ;;  %3210 = vmatpush.bf16.msra.mxu2 %v4768_v52  ;;  %v5175_v47 = vld [vmem:[#allocation8 + $0x668] sm:$0xf] }
 0x12a   :  { %3243 = vmatpush.bf16.msrb.mxu1 %v5488_v49  ;;  %v6349_v49 = vld [vmem:[#allocation8 + $0x67c] sm:$0xf0]  ;;  %v5367_v52 = vld [vmem:[#allocation8 + $0x7e8] sm:$0xf] }
 0x12b   :  { %3199 = vmatmul.bf16.vlgmr.msra.gmra.mxu1 %v6884_v23  ;;  %v5176_v57 = vor.u32 %v6349_v49, %v5175_v47  ;;  %v5368_v60 = vor.u32 %v6397_v53, %v5367_v52  ;;  %v5105_v47 = vld [vmem:[#allocation8 + $0x5f0] sm:$0xf0]  ;;  %v6922_v49 = vld [vmem:[#allocation10] sm:$0x3f]  ;;  %v6172_v53 = vld [vmem:[#allocation8 + $0xfc] sm:$0xf] }
 0x12c   :  { %3224 = vmatpush.bf16.msra.mxu3 %v4936_v8  ;;  %v5751_v8 = vld [vmem:[#allocation8 + $0xae8] sm:$0xf] }
 0x12d   :  { %3231 = vmatpush.bf16.msrb.mxu0 %v5272_v63  ;;  %3211 = vmatpush.bf16.msra.mxu2 %v4744_v4  ;;  %v5584_v63 = vor.u32 %v6451_v56, %v5583_v55  ;;  %v5559_v4 = vld [vmem:[#allocation8 + $0x968] sm:$0xf]  ;;  %v5704_v55 = vor.u32 %v6481_v40, %v5703_v39  ;;  %v6202_v39 = vld [vmem:[#allocation8 + $0x1ec] sm:$0xf]  ;;  %v4601_v40 = vld [vmem:[#allocation8 + $0x200] sm:$0xf0] }
 0x12e   :  { %3244 = vmatpush.bf16.msrb.mxu1 %v5464_v0  ;;  %v5343_v0 = vld [vmem:[#allocation8 + $0x7b8] sm:$0xf] }
 0x12f   :  { %3225 = vmatmul.bf16.vlgmr.msra.gmra.mxu3 %v6890_v51  ;;  %v5344_v12 = vor.u32 %v6391_v1, %v5343_v0  ;;  %v6322_v0 = vld [vmem:[#allocation8 + $0x5ac] sm:$0xf]  ;;  %v5081_v1 = vld [vmem:[#allocation8 + $0x5c0] sm:$0xf0] }
 0x130   :  { %3269 = vmatpush.bf16.msrb.mxu3 %v5872_v13  ;;  %3212 = vmatmul.bf16.vlgmr.msra.gmra.mxu2 %v6888_v44  ;;  %v6337_v13 = vld [vmem:[#allocation8 + $0x61c] sm:$0xf0] }
 0x131   :  { %3256 = vmatpush.bf16.msrb.mxu2 %v5680_v9  ;;  %3232 = vmatpush.bf16.msrb.mxu0 %v5248_v16  ;;  %v6493_v9 = vld [vmem:[#allocation8 + $0xafc] sm:$0xf0]  ;;  %v5560_v16 = vor.u32 %v6445_v5, %v5559_v4  ;;  %v5128_v25 = vor.u32 %v6337_v13, %v5127_v11  ;;  %v6166_v4 = vld [vmem:[#allocation8 + $0xcc] sm:$0xf]  ;;  %v4457_v5 = vld [vmem:[#allocation8 + $0xe0] sm:$0xf0]  ;;  %v5084_v13 = vor.u32 %v6322_v0, %v5081_v1 }
 0x132   :  { %3245 = vmatpush.bf16.msrb.mxu1 %v5440_v20  ;;  %v6232_v20 = vld [vmem:[#allocation8 + $0x2dc] sm:$0xf]  ;;  %v5752_v21 = vor.u32 %v6493_v9, %v5751_v8  ;;  %v4892_v8 = vor.u32 %v6274_v61, %v4889_v62  ;;  %v6214_v9 = vld [vmem:[#allocation8 + $0x24c] sm:$0xf]  ;;  %v4649_v11 = vld [vmem:[#allocation8 + $0x260] sm:$0xf0] }
 0x133   :  { %v4724_v31 = vor.u32 %v6232_v20, %v4721_v22  ;;  %v5057_v20 = vld [vmem:[#allocation8 + $0x590] sm:$0xf0]  ;;  %v4652_v22 = vor.u32 %v6214_v9, %v4649_v11  ;;  %v6250_v61 = vld [vmem:[#allocation8 + $0x36c] sm:$0xf]  ;;  %v4793_v62 = vld [vmem:[#allocation8 + $0x380] sm:$0xf0] }
 0x134   :  { %3270 = vmatpush.bf16.msrb.mxu3 %v5848_v26  ;;  %v5727_v26 = vld [vmem:[#allocation8 + $0xab8] sm:$0xf]  ;;  %v6190_v9 = vld [vmem:[#allocation8 + $0x18c] sm:$0xf]  ;;  %v4553_v11 = vld [vmem:[#allocation8 + $0x1a0] sm:$0xf0] }
 0x135   :  { %3257 = vmatpush.bf16.msrb.mxu2 %v5656_v24  ;;  %3233 = vmatpush.bf16.msrb.mxu0 %v5224_v29  ;;  %v5535_v24 = vld [vmem:[#allocation8 + $0x938] sm:$0xf]  ;;  %v4532_v29 = vor.u32 %v6184_v17, %v4529_v19  ;;  %v5728_v36 = vor.u32 %v6487_v27, %v5727_v26  ;;  %v4460_v17 = vor.u32 %v6166_v4, %v4457_v5  ;;  %v6316_v19 = vld [vmem:[#allocation8 + $0x57c] sm:$0xf]  ;;  %v4625_v27 = vld [vmem:[#allocation8 + $0x230] sm:$0xf0] }
 0x136   :  { %3246 = vmatpush.bf16.msrb.mxu1 %v5416_v32  ;;  %v5536_v32 = vor.u32 %v6439_v3, %v5535_v24  ;;  %v6160_v24 = vld [vmem:[#allocation8 + $0x9c] sm:$0xf]  ;;  %v4433_v3 = vld [vmem:[#allocation8 + $0xb0] sm:$0xf0]  ;;  %v4985_v4 = vld [vmem:[#allocation8 + $0x500] sm:$0xf0] }
 0x137   :  { %v6208_v26 = vld [vmem:[#allocation8 + $0x21c] sm:$0xf]  ;;  %v6142_v5 = vld [vmem:[#allocation8 + $0xc] sm:$0xf] }
 0x138   :  { %3271 = vmatpush.bf16.msrb.mxu3 %v5824_v38  ;;  %v6433_v38 = vld [vmem:[#allocation8 + $0x91c] sm:$0xf0] }
 0x139   :  { %3258 = vmatpush.bf16.msrb.mxu2 %v5632_v35  ;;  %3234 = vmatpush.bf16.msrb.mxu0 %v5200_v41  ;;  %v4697_v35 = vld [vmem:[#allocation8 + $0x2c0] sm:$0xf0]  ;;  %v6280_v41 = vld [vmem:[#allocation8 + $0x45c] sm:$0xf]  ;;  %v5512_v52 = vor.u32 %v6433_v38, %v5511_v37 }
 0x13a   :  { %3247 = vmatpush.bf16.msrb.mxu1 %v5392_v46  ;;  %v6328_v46 = vld [vmem:[#allocation8 + $0x5dc] sm:$0xf]  ;;  %v4916_v56 = vor.u32 %v6280_v41, %v4913_v42 }
 0x13b   :  { %v5108_v59 = vor.u32 %v6328_v46, %v5105_v47  ;;  %v4817_v46 = vld [vmem:[#allocation8 + $0x3b0] sm:$0xf0] }
 0x13c   :  { %3272 = vmatpush.bf16.msrb.mxu3 %v5800_v54  ;;  %v4481_v54 = vld [vmem:[#allocation8 + $0x110] sm:$0xf0] }
 0x13d   :  { %3259 = vmatpush.bf16.msrb.mxu2 %v5608_v50  ;;  %3235 = vmatpush.bf16.msrb.mxu0 %v5176_v57  ;;  %v4700_v50 = vor.u32 %v6226_v34, %v4697_v35  ;;  %v6220_v57 = vld [vmem:[#allocation8 + $0x27c] sm:$0xf]  ;;  %v4628_v34 = vor.u32 %v6208_v26, %v4625_v27  ;;  %v6154_v35 = vld [vmem:[#allocation8 + $0x6c] sm:$0xf] }
 0x13e   :  { %3248 = vmatpush.bf16.msrb.mxu1 %v5368_v60  ;;  %v1038_v60 = vperm.slane %v6922_v49, 0  ;;  %v6370_v27 = vld [vmem:[#allocation8 + $0x72c] sm:$0xf] }
 0x140   :  { %3273 = vmatpush.bf16.msrb.mxu3 %v5776_v2  ;;  %v4676_v2 = vor.u32 %v6220_v57, %v4673_v58  ;;  %v6196_v57 = vld [vmem:[#allocation8 + $0x1bc] sm:$0xf]  ;;  %v4577_v58 = vld [vmem:[#allocation8 + $0x1d0] sm:$0xf0] }
 0x141   :  { %3260 = vmatpush.bf16.msrb.mxu2 %v5584_v63  ;;  %3236 = vmatpush.bf16.msrb.mxu0 %v5152_v6  ;;  %v4484_v63 = vor.u32 %v6172_v53, %v4481_v54  ;;  %v4604_v53 = vor.u32 %v6202_v39, %v4601_v40  ;;  %v6148_v54 = vld [vmem:[#allocation8 + $0x3c] sm:$0xf]  ;;  %v4937_v39 = vld [vmem:[#allocation8 + $0x4a0] sm:$0xf0] }
 0x142   :  { %3249 = vmatpush.bf16.msrb.mxu1 %v5344_v12  ;;  %v6472_v40 = vld [vmem:[#allocation8 + $0xa5c] sm:$0xf] }
 0x144   :  { %3274 = vmatpush.bf16.msrb.mxu3 %v5752_v21  ;;  %v2979_v6 = vpop.f32.mrf.mxu0  ;;  %v2992_v14 = vpop.f32.mrf.mxu1 }
 0x145   :  { %3261 = vmatpush.bf16.msrb.mxu2 %v5560_v16  ;;  %3237 = vmatpush.bf16.msrb.mxu0 %v5128_v25  ;;  %v2980_v12 = vadd.f32 %v2979_v6, %v1038_v60  ;;  %v4865_v16 = vld [vmem:[#allocation8 + $0x410] sm:$0xf0]  ;;  %v4580_v6 = vor.u32 %v6196_v57, %v4577_v58 }
 0x146   :  { %3250 = vmatpush.bf16.msrb.mxu1 %v5320_v28  ;;  %v4868_v25 = vor.u32 %v6268_v15, %v4865_v16  ;;  %v5060_v28 = vor.u32 %v6316_v19, %v5057_v20  ;;  %v5297_v15 = vld [vmem:[#allocation8 + $0x770] sm:$0xf0]  ;;  %v6424_v16 = vld [vmem:[#allocation8 + $0x8dc] sm:$0xf] }
 0x147   :  { %v2993_v21 = vadd.f32 %v2992_v14, %v2980_v12  ;;  %v6376_v14 = vld [vmem:[#allocation8 + $0x75c] sm:$0xf]  ;;  %v5489_v19 = vld [vmem:[#allocation8 + $0x8f0] sm:$0xf0] }
 0x148   :  { %3275 = vmatpush.bf16.msrb.mxu3 %v5728_v36  ;;  %3238 = vmatmul.bf16.vlgmr.msrb.gmra.mxu0 %v6897_v7  ;;  %v4409_v36 = vld [vmem:[#allocation8 + $0x80] sm:$0xf0]  ;;  %v6244_v20 = vld [vmem:[#allocation8 + $0x33c] sm:$0xf]  ;;  %v5300_v26 = vor.u32 %v6376_v14, %v5297_v15  ;;  %v5441_v57 = vld [vmem:[#allocation8 + $0x890] sm:$0xf0] }
 0x149   :  { %3282 = vmatpush.bf16.msra.mxu0 %v4532_v29  ;;  %3262 = vmatpush.bf16.msrb.mxu2 %v5536_v32  ;;  %v6262_v29 = vld [vmem:[#allocation8 + $0x3cc] sm:$0xf]  ;;  %v4412_v47 = vor.u32 %v6154_v35, %v4409_v36  ;;  %v4745_v36 = vld [vmem:[#allocation8 + $0x320] sm:$0xf0] }
 0x14a   :  { %3295 = vmatpush.bf16.msra.mxu1 %v4724_v31  ;;  %v4436_v31 = vor.u32 %v6160_v24, %v4433_v3  ;;  %v6310_v32 = vld [vmem:[#allocation8 + $0x54c] sm:$0xf]  ;;  %v4844_v38 = vor.u32 %v6262_v29, %v4841_v30  ;;  %v6292_v24 = vld [vmem:[#allocation8 + $0x4bc] sm:$0xf]  ;;  %v4961_v3 = vld [vmem:[#allocation8 + $0x4d0] sm:$0xf0] }
 0x14b   :  { %3251 = vmatmul.bf16.vlgmr.msrb.gmra.mxu1 %v6900_v10  ;;  %v5036_v41 = vor.u32 %v6310_v32, %v5033_v33  ;;  %v5273_v30 = vld [vmem:[#allocation8 + $0x740] sm:$0xf0]  ;;  %v6238_v35 = vld [vmem:[#allocation8 + $0x30c] sm:$0xf] }
 0x14c   :  { %3276 = vmatpush.bf16.msrb.mxu3 %v5704_v55  ;;  %v2981_v37 = vpop.f32.mrf.mxu0  ;;  %v2994_v42 = vpop.f32.mrf.mxu1  ;;  %v4385_v55 = vld [vmem:[#allocation8 + $0x50] sm:$0xf0]  ;;  %v5465_v32 = vld [vmem:[#allocation8 + $0x8c0] sm:$0xf0] }
 0x14d   :  { %3283 = vmatpush.bf16.msra.mxu0 %v4508_v43  ;;  %3263 = vmatpush.bf16.msrb.mxu2 %v5512_v52  ;;  %v6256_v43 = vld [vmem:[#allocation8 + $0x39c] sm:$0xf]  ;;  %v5009_v52 = vld [vmem:[#allocation8 + $0x530] sm:$0xf0]  ;;  %v4388_v1 = vor.u32 %v6148_v54, %v4385_v55  ;;  %v6286_v37 = vld [vmem:[#allocation8 + $0x48c] sm:$0xf]  ;;  %v5276_v42 = vor.u32 %v6370_v27, %v5273_v30 }
 0x14e   :  { %3296 = vmatpush.bf16.msra.mxu1 %v4700_v50  ;;  %v6304_v50 = vld [vmem:[#allocation8 + $0x51c] sm:$0xf]  ;;  %v4940_v54 = vor.u32 %v6286_v37, %v4937_v39  ;;  %v6502_v30 = vld [vmem:[#allocation8 + $0xb4c] sm:$0xf]  ;;  %v5369_v37 = vld [vmem:[#allocation8 + $0x800] sm:$0xf0] }
 0x14f   :  { %3277 = vmatmul.bf16.vlgmr.msrb.gmra.mxu3 %v6906_v45  ;;  %v5012_v60 = vor.u32 %v6304_v50, %v5009_v52  ;;  %v4748_v50 = vor.u32 %v6238_v35, %v4745_v36  ;;  %v6364_v52 = vld [vmem:[#allocation8 + $0x6fc] sm:$0xf]  ;;  %v6394_v36 = vld [vmem:[#allocation8 + $0x7ec] sm:$0xf] }
 0x150   :  { %3321 = vmatpush.bf16.msra.mxu3 %v5108_v59  ;;  %3264 = vmatmul.bf16.vlgmr.msrb.gmra.mxu2 %v6904_v48 }
 0x151   :  { %3308 = vmatpush.bf16.msra.mxu2 %v4916_v56  ;;  %3284 = vmatpush.bf16.msra.mxu0 %v4484_v63  ;;  %v4820_v56 = vor.u32 %v6256_v43, %v4817_v46  ;;  %v6520_v43 = vld [vmem:[#allocation8 + $0xbdc] sm:$0xf]  ;;  %v5873_v46 = vld [vmem:[#allocation8 + $0xbf0] sm:$0xf0] }
 0x152   :  { %3297 = vmatpush.bf16.msra.mxu1 %v4676_v2  ;;  %v3018_v0 = vpop.f32.mrf.mxu3  ;;  %v6298_v2 = vld [vmem:[#allocation8 + $0x4ec] sm:$0xf]  ;;  %v5876_v58 = vor.u32 %v6520_v43, %v5873_v46  ;;  %v6496_v46 = vld [vmem:[#allocation8 + $0xb1c] sm:$0xf] }
 0x153   :  { %v3005_v59 = vpop.f32.mrf.mxu2 }
 0x154   :  { %3322 = vmatpush.bf16.msra.mxu3 %v5084_v13  ;;  %v3006_v63 = vadd.f32 %v3005_v59, %v2993_v21  ;;  %v4796_v13 = vor.u32 %v6250_v61, %v4793_v62  ;;  %v4769_v21 = vld [vmem:[#allocation8 + $0x350] sm:$0xf0]  ;;  %v6466_v59 = vld [vmem:[#allocation8 + $0xa2c] sm:$0xf] }
 0x155   :  { %3309 = vmatpush.bf16.msra.mxu2 %v4892_v8  ;;  %3285 = vmatpush.bf16.msra.mxu0 %v4460_v17  ;;  %v4361_v8 = vld [vmem:[#allocation8 + $0x20] sm:$0xf0]  ;;  %v4988_v17 = vor.u32 %v6298_v2, %v4985_v4  ;;  %v4772_v29 = vor.u32 %v6244_v20, %v4769_v21  ;;  %v6514_v62 = vld [vmem:[#allocation8 + $0xbac] sm:$0xf]  ;;  %v6352_v21 = vld [vmem:[#allocation8 + $0x69c] sm:$0xf] }
 0x156   :  { %3298 = vmatpush.bf16.msra.mxu1 %v4652_v22  ;;  %v6929_v12 = vadd.f32 %v3018_v0, %v3006_v63  ;;  %v4364_v22 = vor.u32 %v6142_v5, %v4361_v8  ;;  %v5849_v63 = vld [vmem:[#allocation8 + $0xbc0] sm:$0xf0]  ;;  %v6406_v5 = vld [vmem:[#allocation8 + $0x84c] sm:$0xf] }
 0x157   :  { %v5225_v2 = vld [vmem:[#allocation8 + $0x6e0] sm:$0xf0] }
 0x158   :  { %3323 = vmatpush.bf16.msra.mxu3 %v5060_v28  ;;  %v5492_v28 = vor.u32 %v6424_v16, %v5489_v19  ;;  %v5825_v19 = vld [vmem:[#allocation8 + $0xb90] sm:$0xf0] }
 0x159   :  { %3310 = vmatpush.bf16.msra.mxu2 %v4868_v25  ;;  %3286 = vmatpush.bf16.msra.mxu0 %v4436_v31  ;;  %v4556_v25 = vor.u32 %v6190_v9, %v4553_v11  ;;  %v6418_v31 = vld [vmem:[#allocation8 + $0x8ac] sm:$0xf]  ;;  %v5852_v9 = vor.u32 %v6514_v62, %v5849_v63  ;;  %v6460_v11 = vld [vmem:[#allocation8 + $0x9fc] sm:$0xf]  ;;  %v1039_v63 = vperm.slane %v6922_v49, 1 }
 0x15a   :  { %3299 = vmatpush.bf16.msra.mxu1 %v4628_v34  ;;  %v4964_v34 = vor.u32 %v6292_v24, %v4961_v3 }
 0x15b   :  { %v3007_v33 = vpop.f32.mrf.mxu2 }
 0x15c   :  { %3324 = vmatpush.bf16.msra.mxu3 %v5036_v41  ;;  %v5681_v41 = vld [vmem:[#allocation8 + $0xa70] sm:$0xf0]  ;;  %v6346_v33 = vld [vmem:[#allocation8 + $0x66c] sm:$0xf] }
 0x15d   :  { %3311 = vmatpush.bf16.msra.mxu2 %v4844_v38  ;;  %3287 = vmatpush.bf16.msra.mxu0 %v4412_v47  ;;  %v3020_v38 = vpop.f32.mrf.mxu3  ;;  %v5468_v47 = vor.u32 %v6418_v31, %v5465_v32  ;;  %v5684_v55 = vor.u32 %v6472_v40, %v5681_v41  ;;  %v5801_v31 = vld [vmem:[#allocation8 + $0xb60] sm:$0xf0]  ;;  %v6448_v40 = vld [vmem:[#allocation8 + $0x99c] sm:$0xf]  ;;  %v5585_v41 = vld [vmem:[#allocation8 + $0x9b0] sm:$0xf0] }
 0x15e   :  { %3300 = vmatpush.bf16.msra.mxu1 %v4604_v53  ;;  %v5249_v53 = vld [vmem:[#allocation8 + $0x710] sm:$0xf0]  ;;  %v5804_v39 = vor.u32 %v6502_v30, %v5801_v31 }
 0x15f   :  { %v5252_v61 = vor.u32 %v6364_v52, %v5249_v53  ;;  %v6340_v52 = vld [vmem:[#allocation8 + $0x63c] sm:$0xf]  ;;  %v5153_v53 = vld [vmem:[#allocation8 + $0x650] sm:$0xf0] }
 0x160   :  { %3325 = vmatpush.bf16.msra.mxu3 %v5012_v60  ;;  %v5657_v60 = vld [vmem:[#allocation8 + $0xa40] sm:$0xf0]  ;;  %v5156_v62 = vor.u32 %v6340_v52, %v5153_v53  ;;  %v6332_v52 = vld [vmem:[#allocation8 + $0x5f4] sm:$0xf0] }
 0x161   :  { %3312 = vmatpush.bf16.msra.mxu2 %v4820_v56  ;;  %3288 = vmatpush.bf16.msra.mxu0 %v4388_v1  ;;  %v6412_v56 = vld [vmem:[#allocation8 + $0x87c] sm:$0xf]  ;;  %v6358_v1 = vld [vmem:[#allocation8 + $0x6cc] sm:$0xf]  ;;  %v5660_v4 = vor.u32 %v6466_v59, %v5657_v60  ;;  %v5561_v59 = vld [vmem:[#allocation8 + $0x980] sm:$0xf0] }
 0x162   :  { %3301 = vmatpush.bf16.msra.mxu1 %v4580_v6  ;;  %v5444_v0 = vor.u32 %v6412_v56, %v5441_v57  ;;  %v5417_v6 = vld [vmem:[#allocation8 + $0x860] sm:$0xf0]  ;;  %v5228_v16 = vor.u32 %v6358_v1, %v5225_v2  ;;  %v5345_v56 = vld [vmem:[#allocation8 + $0x7d0] sm:$0xf0]  ;;  %v6490_v60 = vld [vmem:[#allocation8 + $0xaec] sm:$0xf] }
 0x163   :  { %v5420_v20 = vor.u32 %v6406_v5, %v5417_v6  ;;  %v6334_v1 = vld [vmem:[#allocation8 + $0x60c] sm:$0xf]  ;;  %v5129_v6 = vld [vmem:[#allocation8 + $0x620] sm:$0xf0] }
 0x164   :  { %3326 = vmatpush.bf16.msra.mxu3 %v4988_v17  ;;  %v3031_v8 = vpop.f32.mrf.mxu0  ;;  %v3044_v15 = vpop.f32.mrf.mxu1  ;;  %v6508_v17 = vld [vmem:[#allocation8 + $0xb7c] sm:$0xf] }
 0x165   :  { %3313 = vmatpush.bf16.msra.mxu2 %v4796_v13  ;;  %3289 = vmatpush.bf16.msra.mxu0 %v4364_v22  ;;  %v5633_v13 = vld [vmem:[#allocation8 + $0xa10] sm:$0xf0]  ;;  %v3032_v14 = vadd.f32 %v3031_v8, %v6929_v12  ;;  %v5828_v27 = vor.u32 %v6508_v17, %v5825_v19  ;;  %v6382_v8 = vld [vmem:[#allocation8 + $0x78c] sm:$0xf] }
 0x166   :  { %3302 = vmatpush.bf16.msra.mxu1 %v4556_v25  ;;  %v5201_v22 = vld [vmem:[#allocation8 + $0x6b0] sm:$0xf0]  ;;  %v5636_v3 = vor.u32 %v6460_v11, %v5633_v13  ;;  %v6400_v25 = vld [vmem:[#allocation8 + $0x81c] sm:$0xf]  ;;  %v4535_v13 = vld [vmem:[#allocation8 + $0x160] sm:$0xf] }
 0x167   :  { %v3045_v24 = vadd.f32 %v3044_v15, %v3032_v14  ;;  %v5204_v12 = vor.u32 %v6352_v21, %v5201_v22  ;;  %v6188_v14 = vld [vmem:[#allocation8 + $0x174] sm:$0xf0]  ;;  %v4727_v15 = vld [vmem:[#allocation8 + $0x2e0] sm:$0xf]  ;;  %v6436_v21 = vld [vmem:[#allocation8 + $0x93c] sm:$0xf] }
 0x168   :  { %3327 = vmatpush.bf16.msra.mxu3 %v4964_v34  ;;  %3290 = vmatmul.bf16.vlgmr.msra.gmra.mxu0 %v6881_v18  ;;  %v5177_v34 = vld [vmem:[#allocation8 + $0x680] sm:$0xf0]  ;;  %v5537_v22 = vld [vmem:[#allocation8 + $0x950] sm:$0xf0] }
 0x169   :  { %3334 = vmatpush.bf16.msrb.mxu0 %v5300_v26  ;;  %3314 = vmatpush.bf16.msra.mxu2 %v4772_v29  ;;  %v5393_v26 = vld [vmem:[#allocation8 + $0x830] sm:$0xf0]  ;;  %v5609_v29 = vld [vmem:[#allocation8 + $0x9e0] sm:$0xf0]  ;;  %v5180_v43 = vor.u32 %v6346_v33, %v5177_v34  ;;  %v6182_v33 = vld [vmem:[#allocation8 + $0x144] sm:$0xf0] }
 0x16a   :  { %3347 = vmatpush.bf16.msrb.mxu1 %v5492_v28  ;;  %v6454_v28 = vld [vmem:[#allocation8 + $0x9cc] sm:$0xf]  ;;  %v5396_v32 = vor.u32 %v6400_v25, %v5393_v26  ;;  %v5132_v25 = vor.u32 %v6334_v1, %v5129_v6  ;;  %v6484_v26 = vld [vmem:[#allocation8 + $0xabc] sm:$0xf]  ;;  %v4703_v34 = vld [vmem:[#allocation8 + $0x2b0] sm:$0xf] }
 0x16b   :  { %3303 = vmatmul.bf16.vlgmr.msra.gmra.mxu1 %v6884_v23  ;;  %v5612_v35 = vor.u32 %v6454_v28, %v5609_v29  ;;  %v4536_v29 = vor.u32 %v6188_v14, %v4535_v13  ;;  %v6278_v1 = vld [vmem:[#allocation8 + $0x444] sm:$0xf0]  ;;  %v4655_v13 = vld [vmem:[#allocation8 + $0x250] sm:$0xf] }
 0x16c   :  { %3328 = vmatpush.bf16.msra.mxu3 %v4940_v54  ;;  %v3033_v38 = vpop.f32.mrf.mxu0  ;;  %v5588_v54 = vor.u32 %v6448_v40, %v5585_v41  ;;  %v5705_v41 = vld [vmem:[#allocation8 + $0xaa0] sm:$0xf0]  ;;  %v6218_v14 = vld [vmem:[#allocation8 + $0x264] sm:$0xf0] }
 0x16d   :  { %3335 = vmatpush.bf16.msrb.mxu0 %v5276_v42  ;;  %3315 = vmatpush.bf16.msra.mxu2 %v4748_v50  ;;  %v3046_v42 = vpop.f32.mrf.mxu1  ;;  %v5372_v50 = vor.u32 %v6394_v36, %v5369_v37  ;;  %v6430_v37 = vld [vmem:[#allocation8 + $0x90c] sm:$0xf]  ;;  %v5513_v38 = vld [vmem:[#allocation8 + $0x920] sm:$0xf0] }
 0x16e   :  { %3348 = vmatpush.bf16.msrb.mxu1 %v5468_v47  ;;  %v5777_v47 = vld [vmem:[#allocation8 + $0xb30] sm:$0xf0]  ;;  %v4919_v42 = vld [vmem:[#allocation8 + $0x460] sm:$0xf] }
 0x16f   :  { %3329 = vmatmul.bf16.vlgmr.msra.gmra.mxu3 %v6890_v51  ;;  %v5780_v57 = vor.u32 %v6496_v46, %v5777_v47 }
 0x170   :  { %3373 = vmatpush.bf16.msrb.mxu3 %v5876_v58  ;;  %3316 = vmatmul.bf16.vlgmr.msra.gmra.mxu2 %v6888_v44  ;;  %v6442_v58 = vld [vmem:[#allocation8 + $0x96c] sm:$0xf] }
 0x171   :  { %3360 = vmatpush.bf16.msrb.mxu2 %v5684_v55  ;;  %3336 = vmatpush.bf16.msrb.mxu0 %v5252_v61  ;;  %v6388_v55 = vld [vmem:[#allocation8 + $0x7bc] sm:$0xf]  ;;  %v5564_v11 = vor.u32 %v6442_v58, %v5561_v59 }
 0x172   :  { %3349 = vmatpush.bf16.msrb.mxu1 %v5444_v0  ;;  %v3057_v61 = vpop.f32.mrf.mxu2  ;;  %v5753_v0 = vld [vmem:[#allocation8 + $0xb00] sm:$0xf0]  ;;  %v5348_v5 = vor.u32 %v6388_v55, %v5345_v56  ;;  %v4487_v55 = vld [vmem:[#allocation8 + $0x100] sm:$0xf]  ;;  %v6176_v56 = vld [vmem:[#allocation8 + $0x114] sm:$0xf0] }
 0x173   :  { %v3058_v2 = vadd.f32 %v3057_v61, %v3045_v24  ;;  %v5756_v19 = vor.u32 %v6490_v60, %v5753_v0  ;;  %v4679_v60 = vld [vmem:[#allocation8 + $0x280] sm:$0xf]  ;;  %v6224_v61 = vld [vmem:[#allocation8 + $0x294] sm:$0xf0]  ;;  %v4895_v0 = vld [vmem:[#allocation8 + $0x430] sm:$0xf] }
 0x174   :  { %3374 = vmatpush.bf16.msrb.mxu3 %v5852_v9  ;;  %v5321_v9 = vld [vmem:[#allocation8 + $0x7a0] sm:$0xf0]  ;;  %v3083_v17 = vpop.f32.mrf.mxu0  ;;  %v4680_v6 = vor.u32 %v6224_v61, %v4679_v60  ;;  %v6308_v60 = vld [vmem:[#allocation8 + $0x534] sm:$0xf0] }
 0x175   :  { %3361 = vmatpush.bf16.msrb.mxu2 %v5660_v4  ;;  %3337 = vmatpush.bf16.msrb.mxu0 %v5228_v16  ;;  %v3070_v4 = vpop.f32.mrf.mxu3  ;;  %v3084_v24 = vadd.f32 %v3083_v17, %v1039_v63  ;;  %v5324_v28 = vor.u32 %v6382_v8, %v5321_v9  ;;  %v4463_v8 = vld [vmem:[#allocation8 + $0xd0] sm:$0xf]  ;;  %v6170_v9 = vld [vmem:[#allocation8 + $0xe4] sm:$0xf0] }
 0x176   :  { %3350 = vmatpush.bf16.msrb.mxu1 %v5420_v20  ;;  %v6937_v16 = vadd.f32 %v3070_v4, %v3058_v2  ;;  %v6236_v20 = vld [vmem:[#allocation8 + $0x2f4] sm:$0xf0]  ;;  %v4488_v2 = vor.u32 %v6176_v56, %v4487_v55  ;;  %v5087_v4 = vld [vmem:[#allocation8 + $0x5b0] sm:$0xf]  ;;  %v4823_v55 = vld [vmem:[#allocation8 + $0x3a0] sm:$0xf] }
 0x177   :  { %v4728_v31 = vor.u32 %v6236_v20, %v4727_v15  ;;  %v6272_v20 = vld [vmem:[#allocation8 + $0x414] sm:$0xf0] }
 0x178   :  { %3375 = vmatpush.bf16.msrb.mxu3 %v5828_v27  ;;  %v5729_v27 = vld [vmem:[#allocation8 + $0xad0] sm:$0xf0]  ;;  %v6260_v56 = vld [vmem:[#allocation8 + $0x3b4] sm:$0xf0] }
 0x179   :  { %3362 = vmatpush.bf16.msrb.mxu2 %v5636_v3  ;;  %3338 = vmatpush.bf16.msrb.mxu0 %v5204_v12  ;;  %v3096_v3 = vpop.f32.mrf.mxu1  ;;  %v4511_v12 = vld [vmem:[#allocation8 + $0x130] sm:$0xf]  ;;  %v5732_v36 = vor.u32 %v6484_v26, %v5729_v27  ;;  %v4656_v26 = vor.u32 %v6218_v14, %v4655_v13  ;;  %v4439_v27 = vld [vmem:[#allocation8 + $0xa0] sm:$0xf]  ;;  %v6302_v14 = vld [vmem:[#allocation8 + $0x504] sm:$0xf0] }
 0x17a   :  { %3351 = vmatpush.bf16.msrb.mxu1 %v5396_v32  ;;  %v3097_v30 = vadd.f32 %v3096_v3, %v3084_v24  ;;  %v5540_v32 = vor.u32 %v6436_v21, %v5537_v22  ;;  %v3059_v40 = vpop.f32.mrf.mxu2  ;;  %v4512_v47 = vor.u32 %v6182_v33, %v4511_v12  ;;  %v4464_v24 = vor.u32 %v6170_v9, %v4463_v8  ;;  %v5063_v3 = vld [vmem:[#allocation8 + $0x580] sm:$0xf]  ;;  %v6254_v8 = vld [vmem:[#allocation8 + $0x384] sm:$0xf0]  ;;  %v4991_v13 = vld [vmem:[#allocation8 + $0x4f0] sm:$0xf] }
 0x17b   :  { %v6314_v40 = vld [vmem:[#allocation8 + $0x564] sm:$0xf0] }
 0x17c   :  { %3376 = vmatpush.bf16.msrb.mxu3 %v5804_v39  ;;  %v6478_v39 = vld [vmem:[#allocation8 + $0xa8c] sm:$0xf] }
 0x17d   :  { %3363 = vmatpush.bf16.msrb.mxu2 %v5612_v35  ;;  %3339 = vmatpush.bf16.msrb.mxu0 %v5180_v43  ;;  %v6230_v35 = vld [vmem:[#allocation8 + $0x2c4] sm:$0xf0]  ;;  %v6284_v43 = vld [vmem:[#allocation8 + $0x474] sm:$0xf0]  ;;  %v3072_v46 = vpop.f32.mrf.mxu3  ;;  %v5708_v58 = vor.u32 %v6478_v39, %v5705_v41  ;;  %v5039_v39 = vld [vmem:[#allocation8 + $0x550] sm:$0xf] }
 0x17e   :  { %3352 = vmatpush.bf16.msrb.mxu1 %v5372_v50  ;;  %v5111_v50 = vld [vmem:[#allocation8 + $0x5e0] sm:$0xf]  ;;  %v4704_v53 = vor.u32 %v6230_v35, %v4703_v34  ;;  %v4920_v59 = vor.u32 %v6284_v43, %v4919_v42  ;;  %v4847_v34 = vld [vmem:[#allocation8 + $0x3d0] sm:$0xf]  ;;  %v6266_v35 = vld [vmem:[#allocation8 + $0x3e4] sm:$0xf0] }
 0x17f   :  { %v5112_v63 = vor.u32 %v6332_v52, %v5111_v50  ;;  %v4415_v42 = vld [vmem:[#allocation8 + $0x70] sm:$0xf]  ;;  %v6158_v43 = vld [vmem:[#allocation8 + $0x84] sm:$0xf0] }
 0x180   :  { %3377 = vmatpush.bf16.msrb.mxu3 %v5780_v57  ;;  %v3085_v57 = vpop.f32.mrf.mxu0  ;;  %v4607_v50 = vld [vmem:[#allocation8 + $0x1f0] sm:$0xf]  ;;  %v6206_v52 = vld [vmem:[#allocation8 + $0x204] sm:$0xf0] }
 0x181   :  { %3364 = vmatpush.bf16.msrb.mxu2 %v5588_v54  ;;  %3340 = vmatpush.bf16.msrb.mxu0 %v5156_v62  ;;  %v5516_v54 = vor.u32 %v6430_v37, %v5513_v38  ;;  %v3098_v62 = vpop.f32.mrf.mxu1  ;;  %v4608_v61 = vor.u32 %v6206_v52, %v4607_v50  ;;  %v4751_v50 = vld [vmem:[#allocation8 + $0x310] sm:$0xf]  ;;  %v6242_v52 = vld [vmem:[#allocation8 + $0x324] sm:$0xf0] }
 0x182   :  { %3353 = vmatpush.bf16.msrb.mxu1 %v5348_v5  ;;  %v6326_v5 = vld [vmem:[#allocation8 + $0x5c4] sm:$0xf0]  ;;  %v3109_v15 = vpop.f32.mrf.mxu2  ;;  %v4391_v62 = vld [vmem:[#allocation8 + $0x40] sm:$0xf] }
 0x183   :  { %v5088_v17 = vor.u32 %v6326_v5, %v5087_v4  ;;  %v3110_v21 = vadd.f32 %v3109_v15, %v3097_v30  ;;  %v4367_v15 = vld [vmem:[#allocation8 + $0x10] sm:$0xf] }
 0x184   :  { %3378 = vmatpush.bf16.msrb.mxu3 %v5756_v19  ;;  %v4871_v19 = vld [vmem:[#allocation8 + $0x400] sm:$0xf] }
 0x185   :  { %3365 = vmatpush.bf16.msrb.mxu2 %v5564_v11  ;;  %3341 = vmatpush.bf16.msrb.mxu0 %v5132_v25  ;;  %v4896_v11 = vor.u32 %v6278_v1, %v4895_v0  ;;  %v3122_v22 = vpop.f32.mrf.mxu3  ;;  %v6320_v25 = vld [vmem:[#allocation8 + $0x594] sm:$0xf0]  ;;  %v4872_v12 = vor.u32 %v6272_v20, %v4871_v19  ;;  %v4824_v0 = vor.u32 %v6260_v56, %v4823_v55  ;;  %v4583_v1 = vld [vmem:[#allocation8 + $0x1c0] sm:$0xf]  ;;  %v6146_v19 = vld [vmem:[#allocation8 + $0x24] sm:$0xf0] }
 0x186   :  { %3354 = vmatpush.bf16.msrb.mxu1 %v5324_v28  ;;  %v6164_v28 = vld [vmem:[#allocation8 + $0xb4] sm:$0xf0]  ;;  %v5064_v33 = vor.u32 %v6320_v25, %v5063_v3  ;;  %v4559_v20 = vld [vmem:[#allocation8 + $0x190] sm:$0xf]  ;;  %v5495_v25 = vld [vmem:[#allocation8 + $0x8e0] sm:$0xf] }
 0x187   :  { %v4440_v38 = vor.u32 %v6164_v28, %v4439_v27  ;;  %v6380_v3 = vld [vmem:[#allocation8 + $0x774] sm:$0xf0]  ;;  %v4775_v28 = vld [vmem:[#allocation8 + $0x340] sm:$0xf] }
 0x188   :  { %3379 = vmatpush.bf16.msrb.mxu3 %v5732_v36  ;;  %3342 = vmatmul.bf16.vlgmr.msrb.gmra.mxu0 %v6897_v7  ;;  %v3135_v30 = vpop.f32.mrf.mxu0  ;;  %v6428_v27 = vld [vmem:[#allocation8 + $0x8f4] sm:$0xf0] }
 0x189   :  { %3386 = vmatpush.bf16.msra.mxu0 %v4536_v29  ;;  %3366 = vmatpush.bf16.msrb.mxu2 %v5540_v32  ;;  %v3123_v29 = vadd.f32 %v3122_v22, %v3110_v21  ;;  %v6212_v32 = vld [vmem:[#allocation8 + $0x234] sm:$0xf0]  ;;  %v3148_v37 = vpop.f32.mrf.mxu1  ;;  %v6194_v21 = vld [vmem:[#allocation8 + $0x1a4] sm:$0xf0] }
 0x18a   :  { %3399 = vmatpush.bf16.msra.mxu1 %v4728_v31  ;;  %v4631_v31 = vld [vmem:[#allocation8 + $0x220] sm:$0xf]  ;;  %v6476_v55 = vld [vmem:[#allocation8 + $0xa74] sm:$0xf0] }
 0x18b   :  { %3355 = vmatmul.bf16.vlgmr.msrb.gmra.mxu1 %v6900_v10  ;;  %v3136_v36 = vadd.f32 %v3135_v30, %v3123_v29  ;;  %v4632_v41 = vor.u32 %v6212_v32, %v4631_v31  ;;  %v6248_v29 = vld [vmem:[#allocation8 + $0x354] sm:$0xf0]  ;;  %v4368_v32 = vor.u32 %v6146_v19, %v4367_v15  ;;  %v4967_v30 = vld [vmem:[#allocation8 + $0x4c0] sm:$0xf]  ;;  %v6362_v19 = vld [vmem:[#allocation8 + $0x6e4] sm:$0xf0] }
 0x18c   :  { %3380 = vmatpush.bf16.msrb.mxu3 %v5708_v58  ;;  %v4416_v58 = vor.u32 %v6158_v43, %v4415_v42  ;;  %v6422_v42 = vld [vmem:[#allocation8 + $0x8c4] sm:$0xf0] }
 0x18d   :  { %3387 = vmatpush.bf16.msra.mxu0 %v4512_v47  ;;  %3367 = vmatpush.bf16.msrb.mxu2 %v5516_v54  ;;  %v3149_v46 = vadd.f32 %v3148_v37, %v3136_v36  ;;  %v4848_v47 = vor.u32 %v6266_v35, %v4847_v34  ;;  %v5040_v54 = vor.u32 %v6314_v40, %v5039_v39  ;;  %v3124_v57 = vpop.f32.mrf.mxu3  ;;  %v5279_v37 = vld [vmem:[#allocation8 + $0x730] sm:$0xf]  ;;  %v6374_v40 = vld [vmem:[#allocation8 + $0x744] sm:$0xf0] }
 0x18e   :  { %3400 = vmatpush.bf16.msra.mxu1 %v4704_v53  ;;  %v3111_v53 = vpop.f32.mrf.mxu2  ;;  %v4560_v35 = vor.u32 %v6194_v21, %v4559_v20  ;;  %v4776_v39 = vor.u32 %v6248_v29, %v4775_v28  ;;  %v5280_v56 = vor.u32 %v6374_v40, %v5279_v37  ;;  %v5879_v57 = vld [vmem:[#allocation8 + $0xbe0] sm:$0xf]  ;;  %v5423_v21 = vld [vmem:[#allocation8 + $0x850] sm:$0xf]  ;;  %v6512_v29 = vld [vmem:[#allocation8 + $0xb94] sm:$0xf0] }
 0x18f   :  { %3381 = vmatmul.bf16.vlgmr.msrb.gmra.mxu3 %v6906_v45  ;;  %v4943_v53 = vld [vmem:[#allocation8 + $0x490] sm:$0xf]  ;;  %v5831_v28 = vld [vmem:[#allocation8 + $0xb80] sm:$0xf] }
 0x190   :  { %3425 = vmatpush.bf16.msra.mxu3 %v5112_v63  ;;  %3368 = vmatmul.bf16.vlgmr.msrb.gmra.mxu2 %v6904_v48  ;;  %v6152_v63 = vld [vmem:[#allocation8 + $0x54] sm:$0xf0]  ;;  %v3137_v4 = vpop.f32.mrf.mxu0  ;;  %v5615_v37 = vld [vmem:[#allocation8 + $0x9d0] sm:$0xf] }
 0x191   :  { %3412 = vmatpush.bf16.msra.mxu2 %v4920_v59  ;;  %3388 = vmatpush.bf16.msra.mxu0 %v4488_v2  ;;  %v5015_v59 = vld [vmem:[#allocation8 + $0x520] sm:$0xf]  ;;  %v6200_v2 = vld [vmem:[#allocation8 + $0x1d4] sm:$0xf0]  ;;  %v3150_v9 = vpop.f32.mrf.mxu1 }
 0x192   :  { %3401 = vmatpush.bf16.msra.mxu1 %v4680_v6  ;;  %v5016_v5 = vor.u32 %v6308_v60, %v5015_v59  ;;  %v4799_v6 = vld [vmem:[#allocation8 + $0x370] sm:$0xf]  ;;  %v4752_v60 = vor.u32 %v6242_v52, %v4751_v50  ;;  %v6470_v9 = vld [vmem:[#allocation8 + $0xa44] sm:$0xf0] }
 0x193   :  { %v4800_v22 = vor.u32 %v6254_v8, %v4799_v6  ;;  %v5663_v8 = vld [vmem:[#allocation8 + $0xa30] sm:$0xf]  ;;  %v6350_v52 = vld [vmem:[#allocation8 + $0x684] sm:$0xf0] }
 0x194   :  { %3426 = vmatpush.bf16.msra.mxu3 %v5088_v17  ;;  %v4584_v17 = vor.u32 %v6200_v2, %v4583_v1  ;;  %v5447_v1 = vld [vmem:[#allocation8 + $0x880] sm:$0xf]  ;;  %v6416_v2 = vld [vmem:[#allocation8 + $0x894] sm:$0xf0]  ;;  %v5664_v20 = vor.u32 %v6470_v9, %v5663_v8  ;;  %v5183_v50 = vld [vmem:[#allocation8 + $0x670] sm:$0xf] }
 0x195   :  { %3413 = vmatpush.bf16.msra.mxu2 %v4896_v11  ;;  %3389 = vmatpush.bf16.msra.mxu0 %v4464_v24  ;;  %v4392_v11 = vor.u32 %v6152_v63, %v4391_v62  ;;  %v5303_v24 = vld [vmem:[#allocation8 + $0x760] sm:$0xf]  ;;  %v3174_v31 = vpop.f32.mrf.mxu3  ;;  %v6368_v62 = vld [vmem:[#allocation8 + $0x714] sm:$0xf0]  ;;  %v5448_v15 = vor.u32 %v6416_v2, %v5447_v1  ;;  %v5567_v8 = vld [vmem:[#allocation8 + $0x970] sm:$0xf] }
 0x196   :  { %3402 = vmatpush.bf16.msra.mxu1 %v4656_v26  ;;  %v4992_v26 = vor.u32 %v6302_v14, %v4991_v13  ;;  %v5304_v36 = vor.u32 %v6380_v3, %v5303_v24  ;;  %v5855_v13 = vld [vmem:[#allocation8 + $0xbb0] sm:$0xf]  ;;  %v6518_v14 = vld [vmem:[#allocation8 + $0xbc4] sm:$0xf0]  ;;  %v5639_v3 = vld [vmem:[#allocation8 + $0xa00] sm:$0xf] }
 0x197   :  { %v5856_v24 = vor.u32 %v6518_v14, %v5855_v13  ;;  %v5351_v2 = vld [vmem:[#allocation8 + $0x7c0] sm:$0xf]  ;;  %v6446_v9 = vld [vmem:[#allocation8 + $0x984] sm:$0xf0]  ;;  %v5759_v14 = vld [vmem:[#allocation8 + $0xaf0] sm:$0xf] }
 0x198   :  { %3427 = vmatpush.bf16.msra.mxu3 %v5064_v33  ;;  %v6296_v33 = vld [vmem:[#allocation8 + $0x4d4] sm:$0xf0] }
 0x199   :  { %3414 = vmatpush.bf16.msra.mxu2 %v4872_v12  ;;  %3390 = vmatpush.bf16.msra.mxu0 %v4440_v38  ;;  %v3161_v12 = vpop.f32.mrf.mxu2  ;;  %v5496_v38 = vor.u32 %v6428_v27, %v5495_v25  ;;  %v6464_v25 = vld [vmem:[#allocation8 + $0xa14] sm:$0xf0] }
 0x19a   :  { %3403 = vmatpush.bf16.msra.mxu1 %v4632_v41  ;;  %v3162_v34 = vadd.f32 %v3161_v12, %v3149_v46  ;;  %v5471_v41 = vld [vmem:[#allocation8 + $0x8b0] sm:$0xf]  ;;  %v5687_v46 = vld [vmem:[#allocation8 + $0xa60] sm:$0xf] }
 0x19b   :  { %v5472_v59 = vor.u32 %v6422_v42, %v5471_v41  ;;  %v5807_v41 = vld [vmem:[#allocation8 + $0xb50] sm:$0xf]  ;;  %v6506_v42 = vld [vmem:[#allocation8 + $0xb64] sm:$0xf0] }
 0x19c   :  { %3428 = vmatpush.bf16.msra.mxu3 %v5040_v54  ;;  %v6943_v43 = vadd.f32 %v3174_v31, %v3162_v34  ;;  %v6290_v54 = vld [vmem:[#allocation8 + $0x4a4] sm:$0xf0]  ;;  %v5207_v31 = vld [vmem:[#allocation8 + $0x6a0] sm:$0xf]  ;;  %v6404_v34 = vld [vmem:[#allocation8 + $0x834] sm:$0xf0] }
 0x19d   :  { %3415 = vmatpush.bf16.msra.mxu2 %v4848_v47  ;;  %3391 = vmatpush.bf16.msra.mxu0 %v4416_v58  ;;  %v4968_v47 = vor.u32 %v6296_v33, %v4967_v30  ;;  %v6524_v58 = vld [vmem:[#allocation8 + $0xbf4] sm:$0xf0]  ;;  %v4944_v63 = vor.u32 %v6290_v54, %v4943_v53  ;;  %v5640_v30 = vor.u32 %v6464_v25, %v5639_v3  ;;  %v5399_v33 = vld [vmem:[#allocation8 + $0x820] sm:$0xf]  ;;  %v6185_v3 = vld [vmem:[#allocation8 + $0x164] sm:$0xf] }
 0x19e   :  { %3404 = vmatpush.bf16.msra.mxu1 %v4608_v61  ;;  %v5255_v61 = vld [vmem:[#allocation8 + $0x700] sm:$0xf]  ;;  %v5880_v6 = vor.u32 %v6524_v58, %v5879_v57  ;;  %v6452_v58 = vld [vmem:[#allocation8 + $0x9b4] sm:$0xf0]  ;;  %v4537_v25 = vld [vmem:[#allocation8 + $0x178] sm:$0xf0] }
 0x19f   :  { %v5591_v57 = vld [vmem:[#allocation8 + $0x9a0] sm:$0xf] }
 0x1a0   :  { %3429 = vmatpush.bf16.msra.mxu3 %v5016_v5  ;;  %v3176_v5 = vpop.f32.mrf.mxu3  ;;  %v5592_v1 = vor.u32 %v6452_v58, %v5591_v57  ;;  %v6329_v58 = vld [vmem:[#allocation8 + $0x5e4] sm:$0xf] }
 0x1a1   :  { %3416 = vmatpush.bf16.msra.mxu2 %v4824_v0  ;;  %3392 = vmatpush.bf16.msra.mxu0 %v4392_v11  ;;  %v5688_v0 = vor.u32 %v6476_v55, %v5687_v46  ;;  %v3163_v4 = vpop.f32.mrf.mxu2  ;;  %v5256_v11 = vor.u32 %v6368_v62, %v5255_v61  ;;  %v5375_v46 = vld [vmem:[#allocation8 + $0x7f0] sm:$0xf]  ;;  %v6398_v55 = vld [vmem:[#allocation8 + $0x804] sm:$0xf0]  ;;  %v6500_v61 = vld [vmem:[#allocation8 + $0xb34] sm:$0xf0] }
 0x1a2   :  { %3405 = vmatpush.bf16.msra.mxu1 %v4584_v17  ;;  %v5231_v17 = vld [vmem:[#allocation8 + $0x6d0] sm:$0xf]  ;;  %v5376_v62 = vor.u32 %v6398_v55, %v5375_v46  ;;  %v6392_v4 = vld [vmem:[#allocation8 + $0x7d4] sm:$0xf0]  ;;  %v6482_v46 = vld [vmem:[#allocation8 + $0xaa4] sm:$0xf0] }
 0x1a3   :  { %v5232_v27 = vor.u32 %v6362_v19, %v5231_v17  ;;  %v5135_v17 = vld [vmem:[#allocation8 + $0x610] sm:$0xf]  ;;  %v5352_v19 = vor.u32 %v6392_v4, %v5351_v2  ;;  %v6281_v55 = vld [vmem:[#allocation8 + $0x464] sm:$0xf] }
 0x1a4   :  { %3430 = vmatpush.bf16.msra.mxu3 %v4992_v26  ;;  %v1040_v26 = vperm.slane %v6922_v49, 2  ;;  %v6221_v4 = vld [vmem:[#allocation8 + $0x284] sm:$0xf] }
 0x1a5   :  { %3417 = vmatpush.bf16.msra.mxu2 %v4800_v22  ;;  %3393 = vmatpush.bf16.msra.mxu0 %v4368_v32  ;;  %v6410_v22 = vld [vmem:[#allocation8 + $0x864] sm:$0xf0]  ;;  %v6356_v32 = vld [vmem:[#allocation8 + $0x6b4] sm:$0xf0] }
 0x1a6   :  { %3406 = vmatpush.bf16.msra.mxu1 %v4560_v35  ;;  %v5424_v12 = vor.u32 %v6410_v22, %v5423_v21  ;;  %v3187_v35 = vpop.f32.mrf.mxu0  ;;  %v5208_v40 = vor.u32 %v6356_v32, %v5207_v31  ;;  %v5327_v21 = vld [vmem:[#allocation8 + $0x790] sm:$0xf]  ;;  %v6386_v22 = vld [vmem:[#allocation8 + $0x7a4] sm:$0xf0]  ;;  %v6440_v31 = vld [vmem:[#allocation8 + $0x954] sm:$0xf0] }
 0x1a8   :  { %3431 = vmatpush.bf16.msra.mxu3 %v4968_v47  ;;  %3394 = vmatmul.bf16.vlgmr.msra.gmra.mxu0 %v6881_v18  ;;  %v3200_v49 = vpop.f32.mrf.mxu1  ;;  %v5400_v47 = vor.u32 %v6404_v34, %v5399_v33  ;;  %v5735_v34 = vld [vmem:[#allocation8 + $0xac0] sm:$0xf] }
 0x1a9   :  { %3438 = vmatpush.bf16.msrb.mxu0 %v5304_v36  ;;  %3418 = vmatpush.bf16.msra.mxu2 %v4776_v39  ;;  %v5832_v36 = vor.u32 %v6512_v29, %v5831_v28  ;;  %v3188_v39 = vadd.f32 %v3187_v35, %v1040_v26  ;;  %v6233_v26 = vld [vmem:[#allocation8 + $0x2e4] sm:$0xf]  ;;  %v4729_v29 = vld [vmem:[#allocation8 + $0x2f8] sm:$0xf0]  ;;  %v6488_v35 = vld [vmem:[#allocation8 + $0xad4] sm:$0xf0] }
 0x1aa   :  { %3451 = vmatpush.bf16.msrb.mxu1 %v5496_v38  ;;  %v6458_v38 = vld [vmem:[#allocation8 + $0x9e4] sm:$0xf0] }
 0x1ab   :  { %3407 = vmatmul.bf16.vlgmr.msra.gmra.mxu1 %v6884_v23  ;;  %v3201_v53 = vadd.f32 %v3200_v49, %v3188_v39  ;;  %v5616_v54 = vor.u32 %v6458_v38, %v5615_v37  ;;  %v4540_v37 = vor.u32 %v6185_v3, %v4537_v25  ;;  %v6179_v38 = vld [vmem:[#allocation8 + $0x134] sm:$0xf]  ;;  %v4732_v49 = vor.u32 %v6233_v26, %v4729_v29  ;;  %v6269_v25 = vld [vmem:[#allocation8 + $0x404] sm:$0xf]  ;;  %v4873_v26 = vld [vmem:[#allocation8 + $0x418] sm:$0xf0] }
 0x1ac   :  { %3432 = vmatpush.bf16.msra.mxu3 %v4944_v63  ;;  %v5159_v63 = vld [vmem:[#allocation8 + $0x640] sm:$0xf]  ;;  %v5065_v29 = vld [vmem:[#allocation8 + $0x598] sm:$0xf0] }
 0x1ad   :  { %3439 = vmatpush.bf16.msrb.mxu0 %v5280_v56  ;;  %3419 = vmatpush.bf16.msra.mxu2 %v4752_v60  ;;  %v5808_v56 = vor.u32 %v6506_v42, %v5807_v41  ;;  %v5783_v60 = vld [vmem:[#allocation8 + $0xb20] sm:$0xf]  ;;  %v4513_v41 = vld [vmem:[#allocation8 + $0x148] sm:$0xf0]  ;;  %v6227_v42 = vld [vmem:[#allocation8 + $0x2b4] sm:$0xf] }
 0x1ae   :  { %3452 = vmatpush.bf16.msrb.mxu1 %v5472_v59  ;;  %v5184_v59 = vor.u32 %v6350_v52, %v5183_v50  ;;  %v3189_v5 = vpop.f32.mrf.mxu0  ;;  %v5736_v50 = vor.u32 %v6488_v35, %v5735_v34  ;;  %v5519_v52 = vld [vmem:[#allocation8 + $0x910] sm:$0xf]  ;;  %v4516_v57 = vor.u32 %v6179_v38, %v4513_v41  ;;  %v4633_v34 = vld [vmem:[#allocation8 + $0x238] sm:$0xf0]  ;;  %v4849_v38 = vld [vmem:[#allocation8 + $0x3e8] sm:$0xf0] }
 0x1af   :  { %3433 = vmatmul.bf16.vlgmr.msra.gmra.mxu3 %v6890_v51  ;;  %v4681_v5 = vld [vmem:[#allocation8 + $0x298] sm:$0xf0] }
 0x1b0   :  { %3477 = vmatpush.bf16.msrb.mxu3 %v5880_v6  ;;  %3420 = vmatmul.bf16.vlgmr.msra.gmra.mxu2 %v6888_v44  ;;  %v5784_v6 = vor.u32 %v6500_v61, %v5783_v60 }
 0x1b1   :  { %3464 = vmatpush.bf16.msrb.mxu2 %v5688_v0  ;;  %3440 = vmatpush.bf16.msrb.mxu0 %v5256_v11  ;;  %v6344_v0 = vld [vmem:[#allocation8 + $0x654] sm:$0xf0]  ;;  %v3202_v11 = vpop.f32.mrf.mxu1 }
 0x1b2   :  { %3453 = vmatpush.bf16.msrb.mxu1 %v5448_v15  ;;  %v5160_v13 = vor.u32 %v6344_v0, %v5159_v63  ;;  %v6494_v15 = vld [vmem:[#allocation8 + $0xb04] sm:$0xf0]  ;;  %v4489_v63 = vld [vmem:[#allocation8 + $0x118] sm:$0xf0]  ;;  %v4897_v11 = vld [vmem:[#allocation8 + $0x448] sm:$0xf0] }
 0x1b3   :  { %v5760_v28 = vor.u32 %v6494_v15, %v5759_v14  ;;  %v6323_v14 = vld [vmem:[#allocation8 + $0x5b4] sm:$0xf]  ;;  %v5089_v15 = vld [vmem:[#allocation8 + $0x5c8] sm:$0xf0] }
 0x1b4   :  { %3478 = vmatpush.bf16.msrb.mxu3 %v5856_v24  ;;  %v5568_v24 = vor.u32 %v6446_v9, %v5567_v8  ;;  %v6275_v9 = vld [vmem:[#allocation8 + $0x434] sm:$0xf]  ;;  %v5092_v3 = vor.u32 %v6323_v14, %v5089_v15  ;;  %v4993_v15 = vld [vmem:[#allocation8 + $0x508] sm:$0xf0] }
 0x1b5   :  { %3465 = vmatpush.bf16.msrb.mxu2 %v5664_v20  ;;  %3441 = vmatpush.bf16.msrb.mxu0 %v5232_v27  ;;  %v6338_v20 = vld [vmem:[#allocation8 + $0x624] sm:$0xf0]  ;;  %v3213_v27 = vpop.f32.mrf.mxu2  ;;  %v6299_v14 = vld [vmem:[#allocation8 + $0x4f4] sm:$0xf] }
 0x1b6   :  { %3454 = vmatpush.bf16.msrb.mxu1 %v5424_v12  ;;  %v5543_v12 = vld [vmem:[#allocation8 + $0x940] sm:$0xf]  ;;  %v3214_v32 = vadd.f32 %v3213_v27, %v3201_v53  ;;  %v5136_v33 = vor.u32 %v6338_v20, %v5135_v17  ;;  %v6434_v53 = vld [vmem:[#allocation8 + $0x924] sm:$0xf0]  ;;  %v4684_v17 = vor.u32 %v6221_v4, %v4681_v5  ;;  %v4465_v20 = vld [vmem:[#allocation8 + $0xe8] sm:$0xf0] }
 0x1b7   :  { %v5520_v61 = vor.u32 %v6434_v53, %v5519_v52  ;;  %v6155_v52 = vld [vmem:[#allocation8 + $0x74] sm:$0xf]  ;;  %v4417_v53 = vld [vmem:[#allocation8 + $0x88] sm:$0xf0]  ;;  %v4585_v4 = vld [vmem:[#allocation8 + $0x1d8] sm:$0xf0] }
 0x1b8   :  { %3479 = vmatpush.bf16.msrb.mxu3 %v5832_v36  ;;  %v5328_v36 = vor.u32 %v6386_v22, %v5327_v21  ;;  %v4900_v21 = vor.u32 %v6275_v9, %v4897_v11  ;;  %v6215_v22 = vld [vmem:[#allocation8 + $0x254] sm:$0xf]  ;;  %v4801_v9 = vld [vmem:[#allocation8 + $0x388] sm:$0xf0] }
 0x1b9   :  { %3466 = vmatpush.bf16.msrb.mxu2 %v5640_v30  ;;  %3442 = vmatpush.bf16.msrb.mxu0 %v5208_v40  ;;  %v3226_v30 = vpop.f32.mrf.mxu3  ;;  %v5544_v40 = vor.u32 %v6440_v31, %v5543_v12  ;;  %v6161_v31 = vld [vmem:[#allocation8 + $0xa4] sm:$0xf] }
 0x1ba   :  { %3455 = vmatpush.bf16.msrb.mxu1 %v5400_v47  ;;  %v6950_v39 = vadd.f32 %v3226_v30, %v3214_v32  ;;  %v4705_v47 = vld [vmem:[#allocation8 + $0x2c8] sm:$0xf0]  ;;  %v4441_v32 = vld [vmem:[#allocation8 + $0xb8] sm:$0xf0]  ;;  %v4876_v30 = vor.u32 %v6269_v25, %v4873_v26  ;;  %v6425_v26 = vld [vmem:[#allocation8 + $0x8e4] sm:$0xf] }
 0x1bb   :  { %v4708_v60 = vor.u32 %v6227_v42, %v4705_v47  ;;  %v4444_v41 = vor.u32 %v6161_v31, %v4441_v32  ;;  %v6311_v42 = vld [vmem:[#allocation8 + $0x554] sm:$0xf]  ;;  %v5041_v47 = vld [vmem:[#allocation8 + $0x568] sm:$0xf0]  ;;  %v5305_v25 = vld [vmem:[#allocation8 + $0x778] sm:$0xf0] }
 0x1bc   :  { %3480 = vmatpush.bf16.msrb.mxu3 %v5808_v56  ;;  %v4921_v56 = vld [vmem:[#allocation8 + $0x478] sm:$0xf0] }
 0x1bd   :  { %3467 = vmatpush.bf16.msrb.mxu2 %v5616_v54  ;;  %3443 = vmatpush.bf16.msrb.mxu0 %v5184_v59  ;;  %v5711_v54 = vld [vmem:[#allocation8 + $0xa90] sm:$0xf]  ;;  %v5113_v59 = vld [vmem:[#allocation8 + $0x5f8] sm:$0xf0]  ;;  %v3215_v0 = vpop.f32.mrf.mxu2  ;;  %v4924_v2 = vor.u32 %v6281_v55, %v4921_v56  ;;  %v6203_v55 = vld [vmem:[#allocation8 + $0x1f4] sm:$0xf] }
 0x1be   :  { %3456 = vmatpush.bf16.msrb.mxu1 %v5376_v62  ;;  %v6173_v62 = vld [vmem:[#allocation8 + $0x104] sm:$0xf]  ;;  %v5116_v8 = vor.u32 %v6329_v58, %v5113_v59  ;;  %v4609_v56 = vld [vmem:[#allocation8 + $0x208] sm:$0xf0]  ;;  %v4825_v59 = vld [vmem:[#allocation8 + $0x3b8] sm:$0xf0] }
 0x1bf   :  { %v6257_v58 = vld [vmem:[#allocation8 + $0x3a4] sm:$0xf]  ;;  %v4393_v0 = vld [vmem:[#allocation8 + $0x58] sm:$0xf0] }
 0x1c0   :  { %3481 = vmatpush.bf16.msrb.mxu3 %v5784_v6  ;;  %v4777_v31 = vld [vmem:[#allocation8 + $0x358] sm:$0xf0] }
 0x1c1   :  { %3468 = vmatpush.bf16.msrb.mxu2 %v5592_v1  ;;  %3444 = vmatpush.bf16.msrb.mxu0 %v5160_v13  ;;  %v5712_v1 = vor.u32 %v6482_v46, %v5711_v54  ;;  %v3228_v6 = vpop.f32.mrf.mxu3  ;;  %v4492_v13 = vor.u32 %v6173_v62, %v4489_v63  ;;  %v4612_v62 = vor.u32 %v6203_v55, %v4609_v56  ;;  %v6149_v63 = vld [vmem:[#allocation8 + $0x44] sm:$0xf]  ;;  %v4945_v55 = vld [vmem:[#allocation8 + $0x4a8] sm:$0xf0] }
 0x1c2   :  { %3457 = vmatpush.bf16.msrb.mxu1 %v5352_v19  ;;  %v6167_v19 = vld [vmem:[#allocation8 + $0xd4] sm:$0xf]  ;;  %v6473_v56 = vld [vmem:[#allocation8 + $0xa64] sm:$0xf] }
 0x1c3   :  { %v4468_v27 = vor.u32 %v6167_v19, %v4465_v20  ;;  %v4369_v20 = vld [vmem:[#allocation8 + $0x28] sm:$0xf0] }
 0x1c4   :  { %3482 = vmatpush.bf16.msrb.mxu3 %v5760_v28  ;;  %v6317_v28 = vld [vmem:[#allocation8 + $0x584] sm:$0xf] }
 0x1c5   :  { %3469 = vmatpush.bf16.msrb.mxu2 %v5568_v24  ;;  %3445 = vmatpush.bf16.msrb.mxu0 %v5136_v33  ;;  %v4657_v24 = vld [vmem:[#allocation8 + $0x268] sm:$0xf0]  ;;  %v6209_v33 = vld [vmem:[#allocation8 + $0x224] sm:$0xf]  ;;  %v3239_v35 = vpop.f32.mrf.mxu0 }
 0x1c6   :  { %3458 = vmatpush.bf16.msrb.mxu1 %v5328_v36  ;;  %v4660_v12 = vor.u32 %v6215_v22, %v4657_v24  ;;  %v5068_v36 = vor.u32 %v6317_v28, %v5065_v29  ;;  %v4561_v22 = vld [vmem:[#allocation8 + $0x1a8] sm:$0xf0]  ;;  %v4996_v28 = vor.u32 %v6299_v14, %v4993_v15  ;;  %v5497_v29 = vld [vmem:[#allocation8 + $0x8f8] sm:$0xf0]  ;;  %v6515_v14 = vld [vmem:[#allocation8 + $0xbb4] sm:$0xf] }
 0x1c7   :  { %v5857_v15 = vld [vmem:[#allocation8 + $0xbc8] sm:$0xf0] }
 0x1c8   :  { %3483 = vmatpush.bf16.msrb.mxu3 %v5736_v50  ;;  %3446 = vmatmul.bf16.vlgmr.msrb.gmra.mxu0 %v6897_v7  ;;  %v4636_v50 = vor.u32 %v6209_v33, %v4633_v34  ;;  %v6293_v34 = vld [vmem:[#allocation8 + $0x4c4] sm:$0xf] }
 0x1c9   :  { %3490 = vmatpush.bf16.msra.mxu0 %v4540_v37  ;;  %3470 = vmatpush.bf16.msrb.mxu2 %v5544_v40  ;;  %v6263_v37 = vld [vmem:[#allocation8 + $0x3d4] sm:$0xf]  ;;  %v3252_v40 = vpop.f32.mrf.mxu1 }
 0x1ca   :  { %3503 = vmatpush.bf16.msra.mxu1 %v4732_v49  ;;  %v3240_v49 = vadd.f32 %v3239_v35, %v6950_v39  ;;  %v4852_v46 = vor.u32 %v6263_v37, %v4849_v38  ;;  %v4420_v39 = vor.u32 %v6155_v52, %v4417_v53  ;;  %v4969_v35 = vld [vmem:[#allocation8 + $0x4d8] sm:$0xf0]  ;;  %v6371_v38 = vld [vmem:[#allocation8 + $0x734] sm:$0xf] }
 0x1cb   :  { %3459 = vmatmul.bf16.vlgmr.msrb.gmra.mxu1 %v6900_v10  ;;  %v4972_v52 = vor.u32 %v6293_v34, %v4969_v35  ;;  %v6239_v53 = vld [vmem:[#allocation8 + $0x314] sm:$0xf] }
 0x1cc   :  { %3484 = vmatpush.bf16.msrb.mxu3 %v5712_v1  ;;  %v3253_v54 = vadd.f32 %v3252_v40, %v3240_v49  ;;  %v4828_v1 = vor.u32 %v6257_v58, %v4825_v59  ;;  %v5500_v40 = vor.u32 %v6425_v26, %v5497_v29  ;;  %v6521_v59 = vld [vmem:[#allocation8 + $0xbe4] sm:$0xf]  ;;  %v6455_v35 = vld [vmem:[#allocation8 + $0x9d4] sm:$0xf] }
 0x1cd   :  { %3491 = vmatpush.bf16.msra.mxu0 %v4516_v57  ;;  %3471 = vmatpush.bf16.msrb.mxu2 %v5520_v61  ;;  %v5044_v57 = vor.u32 %v6311_v42, %v5041_v47  ;;  %v5017_v61 = vld [vmem:[#allocation8 + $0x538] sm:$0xf0]  ;;  %v3241_v5 = vpop.f32.mrf.mxu0  ;;  %v5281_v42 = vld [vmem:[#allocation8 + $0x748] sm:$0xf0]  ;;  %v6419_v47 = vld [vmem:[#allocation8 + $0x8b4] sm:$0xf] }
 0x1ce   :  { %3504 = vmatpush.bf16.msra.mxu1 %v4708_v60  ;;  %v6305_v60 = vld [vmem:[#allocation8 + $0x524] sm:$0xf]  ;;  %v5284_v58 = vor.u32 %v6371_v38, %v5281_v42  ;;  %v5449_v5 = vld [vmem:[#allocation8 + $0x898] sm:$0xf0]  ;;  %v6503_v38 = vld [vmem:[#allocation8 + $0xb54] sm:$0xf] }
 0x1cf   :  { %3485 = vmatmul.bf16.vlgmr.msrb.gmra.mxu3 %v6906_v45  ;;  %v5020_v6 = vor.u32 %v6305_v60, %v5017_v61  ;;  %v6509_v26 = vld [vmem:[#allocation8 + $0xb84] sm:$0xf]  ;;  %v5185_v42 = vld [vmem:[#allocation8 + $0x688] sm:$0xf0] }
 0x1d0   :  { %3529 = vmatpush.bf16.msra.mxu3 %v5116_v8  ;;  %3472 = vmatmul.bf16.vlgmr.msrb.gmra.mxu2 %v6904_v48  ;;  %v6251_v8 = vld [vmem:[#allocation8 + $0x374] sm:$0xf]  ;;  %v6353_v29 = vld [vmem:[#allocation8 + $0x6a4] sm:$0xf] }
 0x1d1   :  { %3516 = vmatpush.bf16.msra.mxu2 %v4924_v2  ;;  %3492 = vmatpush.bf16.msra.mxu0 %v4492_v13  ;;  %v6197_v2 = vld [vmem:[#allocation8 + $0x1c4] sm:$0xf]  ;;  %v3254_v11 = vpop.f32.mrf.mxu1  ;;  %v4396_v13 = vor.u32 %v6149_v63, %v4393_v0  ;;  %v4804_v24 = vor.u32 %v6251_v8, %v4801_v9  ;;  %v5257_v63 = vld [vmem:[#allocation8 + $0x718] sm:$0xf0]  ;;  %v6467_v9 = vld [vmem:[#allocation8 + $0xa34] sm:$0xf] }
 0x1d2   :  { %3505 = vmatpush.bf16.msra.mxu1 %v4684_v17  ;;  %v6143_v17 = vld [vmem:[#allocation8 + $0x14] sm:$0xf]  ;;  %v4588_v19 = vor.u32 %v6197_v2, %v4585_v4  ;;  %v6413_v4 = vld [vmem:[#allocation8 + $0x884] sm:$0xf]  ;;  %v5665_v11 = vld [vmem:[#allocation8 + $0xa48] sm:$0xf0] }
 0x1d3   :  { %v4372_v33 = vor.u32 %v6143_v17, %v4369_v20  ;;  %v5452_v17 = vor.u32 %v6413_v4, %v5449_v5  ;;  %v5233_v20 = vld [vmem:[#allocation8 + $0x6e8] sm:$0xf0] }
 0x1d4   :  { %3530 = vmatpush.bf16.msra.mxu3 %v5092_v3  ;;  %v6377_v3 = vld [vmem:[#allocation8 + $0x764] sm:$0xf] }
 0x1d5   :  { %3517 = vmatpush.bf16.msra.mxu2 %v4900_v21  ;;  %3493 = vmatpush.bf16.msra.mxu0 %v4468_v27  ;;  %v6191_v21 = vld [vmem:[#allocation8 + $0x194] sm:$0xf]  ;;  %v3265_v27 = vpop.f32.mrf.mxu2  ;;  %v5308_v37 = vor.u32 %v6377_v3, %v5305_v25  ;;  %v5641_v3 = vld [vmem:[#allocation8 + $0xa18] sm:$0xf0] }
 0x1d6   :  { %3506 = vmatpush.bf16.msra.mxu1 %v4660_v12  ;;  %v6245_v12 = vld [vmem:[#allocation8 + $0x344] sm:$0xf]  ;;  %v3266_v32 = vadd.f32 %v3265_v27, %v3253_v54  ;;  %v4753_v54 = vld [vmem:[#allocation8 + $0x328] sm:$0xf0]  ;;  %v5833_v27 = vld [vmem:[#allocation8 + $0xb98] sm:$0xf0] }
 0x1d7   :  { %v4756_v61 = vor.u32 %v6239_v53, %v4753_v54  ;;  %v5836_v34 = vor.u32 %v6509_v26, %v5833_v27  ;;  %v6449_v54 = vld [vmem:[#allocation8 + $0x9a4] sm:$0xf] }
 0x1d8   :  { %3531 = vmatpush.bf16.msra.mxu3 %v5068_v36  ;;  %v4564_v36 = vor.u32 %v6191_v21, %v4561_v22  ;;  %v6407_v21 = vld [vmem:[#allocation8 + $0x854] sm:$0xf]  ;;  %v5425_v22 = vld [vmem:[#allocation8 + $0x868] sm:$0xf0]  ;;  %v6532_v26 = vld [vmem:[#allocation11 + $0x38] sm:$0xff] }
 0x1d9   :  { %3518 = vmatpush.bf16.msra.mxu2 %v4876_v30  ;;  %3494 = vmatpush.bf16.msra.mxu0 %v4444_v41  ;;  %v3278_v30 = vpop.f32.mrf.mxu3  ;;  %v4780_v41 = vor.u32 %v6245_v12, %v4777_v31  ;;  %v5209_v12 = vld [vmem:[#allocation8 + $0x6b8] sm:$0xf0] }
 0x1da   :  { %3507 = vmatpush.bf16.msra.mxu1 %v4636_v50  ;;  %v6957_v49 = vadd.f32 %v3278_v30, %v3266_v32  ;;  %v5473_v50 = vld [vmem:[#allocation8 + $0x8c8] sm:$0xf0]  ;;  %v6401_v32 = vld [vmem:[#allocation8 + $0x824] sm:$0xf]  ;;  %v5401_v30 = vld [vmem:[#allocation8 + $0x838] sm:$0xf0] }
 0x1db   :  { %v5476_v60 = vor.u32 %v6419_v47, %v5473_v50  ;;  %v6395_v50 = vld [vmem:[#allocation8 + $0x7f4] sm:$0xf]  ;;  %v6540_v27 = vld [vmem:[#allocation11 + $0x78] sm:$0xff] }
 0x1dc   :  { %3532 = vmatpush.bf16.msra.mxu3 %v5044_v57  ;;  %v5689_v57 = vld [vmem:[#allocation8 + $0xa78] sm:$0xf0] }
 0x1dd   :  { %3519 = vmatpush.bf16.msra.mxu2 %v4852_v46  ;;  %3495 = vmatpush.bf16.msra.mxu0 %v4420_v39  ;;  %v6287_v46 = vld [vmem:[#allocation8 + $0x494] sm:$0xf]  ;;  %v5881_v39 = vld [vmem:[#allocation8 + $0xbf8] sm:$0xf0]  ;;  %v3267_v0 = vpop.f32.mrf.mxu2  ;;  %v5692_v2 = vor.u32 %v6473_v56, %v5689_v57  ;;  %v6497_v56 = vld [vmem:[#allocation8 + $0xb24] sm:$0xf] }
 0x1de   :  { %3508 = vmatpush.bf16.msra.mxu1 %v4612_v62  ;;  %v6365_v62 = vld [vmem:[#allocation8 + $0x704] sm:$0xf]  ;;  %v5884_v8 = vor.u32 %v6521_v59, %v5881_v39  ;;  %v5785_v57 = vld [vmem:[#allocation8 + $0xb38] sm:$0xf0] }
 0x1df   :  { %v6341_v59 = vld [vmem:[#allocation8 + $0x644] sm:$0xf]  ;;  %v5161_v39 = vld [vmem:[#allocation8 + $0x658] sm:$0xf0]  ;;  %v5788_v0 = vor.u32 %v6497_v56, %v5785_v57  ;;  %v6546_v56 = vld [vmem:[#allocation11 + $0xa8] sm:$0xff] }
 0x1e0   :  { %3533 = vmatpush.bf16.msra.mxu3 %v5020_v6  ;;  %v5164_v5 = vor.u32 %v6341_v59, %v5161_v39  ;;  %v6528_v39 = vld [vmem:[#allocation11 + $0x18] sm:$0xff] }
 0x1e1   :  { %3520 = vmatpush.bf16.msra.mxu2 %v4828_v1  ;;  %3496 = vmatpush.bf16.msra.mxu0 %v4396_v13  ;;  %v4948_v1 = vor.u32 %v6287_v46, %v4945_v55  ;;  %v3280_v6 = vpop.f32.mrf.mxu3  ;;  %v5260_v13 = vor.u32 %v6365_v62, %v5257_v63  ;;  %v5593_v46 = vld [vmem:[#allocation8 + $0x9b8] sm:$0xf0] }
 0x1e2   :  { %3509 = vmatpush.bf16.msra.mxu1 %v4588_v19  ;;  %v6359_v19 = vld [vmem:[#allocation8 + $0x6d4] sm:$0xf]  ;;  %v5353_v62 = vld [vmem:[#allocation8 + $0x7d8] sm:$0xf0] }
 0x1e3   :  { %v5236_v25 = vor.u32 %v6359_v19, %v5233_v20  ;;  %v6491_v6 = vld [vmem:[#allocation8 + $0xaf4] sm:$0xf] }
 0x1e4   :  { %3534 = vmatpush.bf16.msra.mxu3 %v4996_v28  ;;  %v5428_v28 = vor.u32 %v6407_v21, %v5425_v22  ;;  %v5545_v21 = vld [vmem:[#allocation8 + $0x958] sm:$0xf0] }
 0x1e5   :  { %3521 = vmatpush.bf16.msra.mxu2 %v4804_v24  ;;  %3497 = vmatpush.bf16.msra.mxu0 %v4372_v33  ;;  %v5860_v24 = vor.u32 %v6515_v14, %v5857_v15  ;;  %v6963_v33 = vpop.f32.mrf.mxu0  ;;  %v6383_v15 = vld [vmem:[#allocation8 + $0x794] sm:$0xf] }
 0x1e6   :  { %3510 = vmatpush.bf16.msra.mxu1 %v4564_v36 }
 0x1e8   :  { %3535 = vmatpush.bf16.msra.mxu3 %v4972_v52  ;;  %3498 = vmatmul.bf16.vlgmr.msra.gmra.mxu0 %v6881_v18  ;;  %v5668_v18 = vor.u32 %v6467_v9, %v5665_v11  ;;  %v6965_v36 = vpop.f32.mrf.mxu1  ;;  %v5377_v52 = vld [vmem:[#allocation8 + $0x808] sm:$0xf0]  ;;  %v6335_v11 = vld [vmem:[#allocation8 + $0x614] sm:$0xf] }
 0x1e9   :  { %3542 = vmatpush.bf16.msrb.mxu0 %v5308_v37  ;;  %3522 = vmatpush.bf16.msra.mxu2 %v4780_v41  ;;  %v5212_v37 = vor.u32 %v6353_v29, %v5209_v12  ;;  %v6347_v41 = vld [vmem:[#allocation8 + $0x674] sm:$0xf] }
 0x1ea   :  { %3555 = vmatpush.bf16.msrb.mxu1 %v5500_v40  ;;  %v5404_v40 = vor.u32 %v6401_v32, %v5401_v30  ;;  %v5188_v55 = vor.u32 %v6347_v41, %v5185_v42  ;;  %v6431_v12 = vld [vmem:[#allocation8 + $0x914] sm:$0xf]  ;;  %v5713_v30 = vld [vmem:[#allocation8 + $0xaa8] sm:$0xf0]  ;;  %v6548_v41 = vld [vmem:[#allocation11 + $0xb8] sm:$0xff] }
 0x1eb   :  { %3511 = vmatmul.bf16.vlgmr.msra.gmra.mxu1 %v6884_v23  ;;  %v6461_v23 = vld [vmem:[#allocation8 + $0xa04] sm:$0xf]  ;;  %v6479_v32 = vld [vmem:[#allocation8 + $0xa94] sm:$0xf] }
 0x1ec   :  { %3536 = vmatpush.bf16.msra.mxu3 %v4948_v1  ;;  %v5644_v31 = vor.u32 %v6461_v23, %v5641_v3  ;;  %v6443_v1 = vld [vmem:[#allocation8 + $0x974] sm:$0xf]  ;;  %v6485_v23 = vld [vmem:[#allocation8 + $0xac4] sm:$0xf]  ;;  %v5737_v3 = vld [vmem:[#allocation8 + $0xad8] sm:$0xf0] }
 0x1ed   :  { %3543 = vmatpush.bf16.msrb.mxu0 %v5284_v58  ;;  %3523 = vmatpush.bf16.msra.mxu2 %v4756_v61  ;;  %v5380_v58 = vor.u32 %v6395_v50, %v5377_v52  ;;  %v6389_v61 = vld [vmem:[#allocation8 + $0x7c4] sm:$0xf]  ;;  %v3293_v63 = vpop.f32.mrf.mxu0  ;;  %v5740_v29 = vor.u32 %v6485_v23, %v5737_v3  ;;  %v6530_v50 = vld [vmem:[#allocation11 + $0x28] sm:$0xff] }
 0x1ee   :  { %3556 = vmatpush.bf16.msrb.mxu1 %v5476_v60  ;;  %v5596_v60 = vor.u32 %v6449_v54, %v5593_v46  ;;  %v5356_v9 = vor.u32 %v6389_v61, %v5353_v62  ;;  %v6538_v52 = vld [vmem:[#allocation11 + $0x68] sm:$0xff]  ;;  %v6547_v54 = vld [vmem:[#allocation11 + $0xb0] sm:$0xff]  ;;  %v6553_v61 = vld [vmem:[#allocation11 + $0xe0] sm:$0xff] }
 0x1ef   :  { %3537 = vmatmul.bf16.vlgmr.msra.gmra.mxu3 %v6890_v51  ;;  %v5809_v51 = vld [vmem:[#allocation8 + $0xb68] sm:$0xf0]  ;;  %v6555_v46 = vld [vmem:[#allocation11 + $0xf0] sm:$0xff] }
 0x1f0   :  { %3581 = vmatpush.bf16.msrb.mxu3 %v5884_v8  ;;  %3524 = vmatmul.bf16.vlgmr.msra.gmra.mxu2 %v6888_v44  ;;  %v5617_v44 = vld [vmem:[#allocation8 + $0x9e8] sm:$0xf0]  ;;  %v5812_v53 = vor.u32 %v6503_v38, %v5809_v51  ;;  %v3306_v4 = vpop.f32.mrf.mxu1  ;;  %v6527_v62 = vld [vmem:[#allocation11 + $0x10] sm:$0xff] }
 0x1f1   :  { %3568 = vmatpush.bf16.msrb.mxu2 %v5692_v2  ;;  %3544 = vmatpush.bf16.msrb.mxu0 %v5260_v13  ;;  %v5620_v47 = vor.u32 %v6455_v35, %v5617_v44  ;;  %v5569_v2 = vld [vmem:[#allocation8 + $0x988] sm:$0xf0]  ;;  %v6539_v35 = vld [vmem:[#allocation11 + $0x70] sm:$0xff] }
 0x1f2   :  { %3557 = vmatpush.bf16.msrb.mxu1 %v5452_v17  ;;  %v5761_v8 = vld [vmem:[#allocation8 + $0xb08] sm:$0xf0]  ;;  %v5572_v14 = vor.u32 %v6443_v1, %v5569_v2  ;;  %v6967_v22 = vpop.f32.mrf.mxu3  ;;  %v6552_v2 = vld [vmem:[#allocation11 + $0xd8] sm:$0xff] }
 0x1f3   :  { %v5137_v13 = vld [vmem:[#allocation8 + $0x628] sm:$0xf0]  ;;  %v3317_v19 = vpop.f32.mrf.mxu2  ;;  %v5764_v20 = vor.u32 %v6491_v6, %v5761_v8 }
 0x1f4   :  { %3582 = vmatpush.bf16.msrb.mxu3 %v5860_v24  ;;  %v5329_v17 = vld [vmem:[#allocation8 + $0x7a8] sm:$0xf0]  ;;  %v5140_v24 = vor.u32 %v6335_v11, %v5137_v13  ;;  %v6551_v13 = vld [vmem:[#allocation11 + $0xd0] sm:$0xff] }
 0x1f5   :  { %3569 = vmatpush.bf16.msrb.mxu2 %v5668_v18  ;;  %3545 = vmatpush.bf16.msrb.mxu0 %v5236_v25  ;;  %v6437_v18 = vld [vmem:[#allocation8 + $0x944] sm:$0xf]  ;;  %v5332_v25 = vor.u32 %v6383_v15, %v5329_v17  ;;  %v6534_v6 = vld [vmem:[#allocation11 + $0x48] sm:$0xff] }
 0x1f6   :  { %3558 = vmatpush.bf16.msrb.mxu1 %v5428_v28  ;;  %v5548_v28 = vor.u32 %v6437_v18, %v5545_v21  ;;  %v6525_v17 = vld [vmem:[#allocation11] sm:$0xff]  ;;  %v6564_v18 = vld [vmem:[#allocation11 + $0x138] sm:$0xff]  ;;  %v3595_v21 = vmax.f32 %v6943_v43, 0.0 }
 0x1f8   :  { %3583 = vmatpush.bf16.msrb.mxu3 %v5836_v34  ;;  %v6531_v34 = vld [vmem:[#allocation11 + $0x30] sm:$0xff] }
 0x1f9   :  { %3570 = vmatpush.bf16.msrb.mxu2 %v5644_v31  ;;  %3546 = vmatpush.bf16.msrb.mxu0 %v5212_v37  ;;  %v5521_v31 = vld [vmem:[#allocation8 + $0x928] sm:$0xf0]  ;;  %v6969_v37 = vld [vmem:[#allocation10] sm:$0x3f] }
 0x1fa   :  { %3559 = vmatpush.bf16.msrb.mxu1 %v5404_v40  ;;  %v5524_v44 = vor.u32 %v6431_v12, %v5521_v31  ;;  %v1041_v38 = vperm.slane %v6969_v37, 3  ;;  %v5716_v40 = vor.u32 %v6479_v32, %v5713_v30  ;;  %v3332_v42 = vpop.f32.mrf.mxu3  ;;  %v6562_v31 = vld [vmem:[#allocation11 + $0x128] sm:$0xff] }
 0x1fb   :  { %v3319_v51 = vpop.f32.mrf.mxu2 }
 0x1fc   :  { %3584 = vmatpush.bf16.msrb.mxu3 %v5812_v53  ;;  %v3292_v53 = vadd.f32 %v6963_v33, %v1041_v38  ;;  %v6554_v33 = vld [vmem:[#allocation11 + $0xe8] sm:$0xff]  ;;  %v6559_v38 = vld [vmem:[#allocation11 + $0x110] sm:$0xff] }
 0x1fd   :  { %3571 = vmatpush.bf16.msrb.mxu2 %v5620_v47  ;;  %3547 = vmatpush.bf16.msrb.mxu0 %v5188_v55  ;;  %v6556_v47 = vld [vmem:[#allocation11 + $0xf8] sm:$0xff] }
 0x1fe   :  { %3560 = vmatpush.bf16.msrb.mxu1 %v5380_v58  ;;  %v3305_v55 = vadd.f32 %v6965_v36, %v3292_v53  ;;  %v6535_v36 = vld [vmem:[#allocation11 + $0x50] sm:$0xff] }
 0x200   :  { %3585 = vmatpush.bf16.msrb.mxu3 %v5788_v0  ;;  %v3318_v58 = vadd.f32 %v3317_v19, %v3305_v55  ;;  %v6544_v0 = vld [vmem:[#allocation11 + $0x98] sm:$0xff]  ;;  %v3594_v19 = vmax.f32 %v6937_v16, 0.0  ;;  %v3596_v16 = vmax.f32 %v6957_v49, 0.0 }
 0x201   :  { %3572 = vmatpush.bf16.msrb.mxu2 %v5596_v60  ;;  %3548 = vmatpush.bf16.msrb.mxu0 %v5164_v5  ;;  %v6536_v60 = vld [vmem:[#allocation11 + $0x58] sm:$0xff]  ;;  %v6526_v5 = vld [vmem:[#allocation11 + $0x8] sm:$0xff] }
 0x202   :  { %3561 = vmatpush.bf16.msrb.mxu1 %v5356_v9  ;;  %v6543_v9 = vld [vmem:[#allocation11 + $0x90] sm:$0xff]  ;;  %v3600_v3 = vpack.c.bf16 %v3594_v19, %v3594_v19  ;;  %v3602_v32 = vpack.c.bf16 %v3596_v16, %v3596_v16  ;;  %v6560_v49 = vld [vmem:[#allocation11 + $0x118] sm:$0xff] }
 0x204   :  { %3586 = vmatpush.bf16.msrb.mxu3 %v5764_v20  ;;  %v6533_v20 = vld [vmem:[#allocation11 + $0x40] sm:$0xff] }
 0x205   :  { %3573 = vmatpush.bf16.msrb.mxu2 %v5572_v14  ;;  %3549 = vmatpush.bf16.msrb.mxu0 %v5140_v24  ;;  %v3343_v57 = vpop.f32.mrf.mxu0  ;;  %v6550_v24 = vld [vmem:[#allocation11 + $0xc8] sm:$0xff] }
 0x206   :  { %3562 = vmatpush.bf16.msrb.mxu1 %v5332_v25  ;;  %v6563_v25 = vld [vmem:[#allocation11 + $0x130] sm:$0xff] }
 0x208   :  { %3587 = vmatpush.bf16.msrb.mxu3 %v5740_v29  ;;  %3550 = vmatmul.bf16.vlgmr.msrb.gmra.mxu0 %v6897_v7  ;;  %v6529_v7 = vld [vmem:[#allocation11 + $0x20] sm:$0xff]  ;;  %v3356_v59 = vpop.f32.mrf.mxu1 }
 0x209   :  { %3994 = vmatpush.bf16.msra.mxu0 %v6532_v26  ;;  %3574 = vmatpush.bf16.msrb.mxu2 %v5548_v28  ;;  %v3601_v26 = vpack.c.bf16 %v3595_v21, %v3595_v21  ;;  %v6549_v29 = vld [vmem:[#allocation11 + $0xc0] sm:$0xff] }
 0x20a   :  { %4007 = vmatpush.bf16.msra.mxu1 %v6540_v27  ;;  %v6541_v27 = vld [vmem:[#allocation11 + $0x80] sm:$0xff] }
 0x20b   :  { %3563 = vmatmul.bf16.vlgmr.msrb.gmra.mxu1 %v6900_v10  ;;  %v6537_v10 = vld [vmem:[#allocation11 + $0x60] sm:$0xff] }
 0x20c   :  { %3588 = vmatpush.bf16.msrb.mxu3 %v5716_v40 }
 0x20d   :  { %3995 = vmatpush.bf16.msra.mxu0 %v6531_v34  ;;  %3575 = vmatpush.bf16.msrb.mxu2 %v5524_v44  ;;  %v3345_v1 = vpop.f32.mrf.mxu0  ;;  %v6561_v34 = vld [vmem:[#allocation11 + $0x120] sm:$0xff] }
 0x20e   :  { %4008 = vmatpush.bf16.msra.mxu1 %v6539_v35 }
 0x20f   :  { %3589 = vmatmul.bf16.vlgmr.msrb.gmra.mxu3 %v6906_v45  ;;  %v3331_v45 = vadd.f32 %v6967_v22, %v3318_v58  ;;  %v6542_v22 = vld [vmem:[#allocation11 + $0x88] sm:$0xff] }
 0x210   :  { %4033 = vmatpush.bf16.msra.mxu3 %v6556_v47  ;;  %3576 = vmatmul.bf16.vlgmr.msrb.gmra.mxu2 %v6904_v48  ;;  %v6545_v48 = vld [vmem:[#allocation11 + $0xa0] sm:$0xff]  ;;  %v3358_v4 = vpop.f32.mrf.mxu1 }
 0x211   :  { %4020 = vmatpush.bf16.msra.mxu2 %v6548_v41  ;;  %3996 = vmatpush.bf16.msra.mxu0 %v6530_v50  ;;  %v3344_v63 = vadd.f32 %v3343_v57, %v3331_v45  ;;  %v6558_v41 = vld [vmem:[#allocation11 + $0x108] sm:$0xff]  ;;  %v6557_v50 = vld [vmem:[#allocation11 + $0x100] sm:$0xff] }
 0x212   :  { %4009 = vmatpush.bf16.msra.mxu1 %v6538_v52  ;;  %v3382_v15 = vpop.f32.mrf.mxu3  ;;  %v1042_v52 = vperm.slane %v6969_v37, 4 }
 0x213   :  { %v3357_v8 = vadd.f32 %v3356_v59, %v3344_v63  ;;  %v3369_v11 = vpop.f32.mrf.mxu2  ;;  %v6571_v63 = vld [vmem:[#allocation11 + $0x170] sm:$0xff] }
 0x214   :  { %4034 = vmatpush.bf16.msra.mxu3 %v6555_v46 }
 0x215   :  { %4021 = vmatpush.bf16.msra.mxu2 %v6547_v54  ;;  %3997 = vmatpush.bf16.msra.mxu0 %v6529_v7  ;;  %v3370_v14 = vadd.f32 %v3369_v11, %v3357_v8  ;;  %v6568_v8 = vld [vmem:[#allocation11 + $0x158] sm:$0xff]  ;;  %v6567_v11 = vld [vmem:[#allocation11 + $0x150] sm:$0xff] }
 0x216   :  { %4010 = vmatpush.bf16.msra.mxu1 %v6537_v10 }
 0x217   :  { %v3383_v23 = vadd.f32 %v3382_v15, %v3370_v14  ;;  %v6566_v15 = vld [vmem:[#allocation11 + $0x148] sm:$0xff] }
 0x218   :  { %4035 = vmatpush.bf16.msra.mxu3 %v6554_v33 }
 0x219   :  { %4022 = vmatpush.bf16.msra.mxu2 %v6546_v56  ;;  %3998 = vmatpush.bf16.msra.mxu0 %v6528_v39  ;;  %v3597_v43 = vmax.f32 %v3383_v23, 0.0 }
 0x21a   :  { %4011 = vmatpush.bf16.msra.mxu1 %v6536_v60  ;;  %v3384_v12 = vpop.f32.mrf.mxu3 }
 0x21b   :  { %v3371_v28 = vpop.f32.mrf.mxu2  ;;  %v3603_v30 = vpack.c.bf16 %v3597_v43, %v3597_v43 }
 0x21c   :  { %4036 = vmatpush.bf16.msra.mxu3 %v6553_v61 }
 0x21d   :  { %4023 = vmatpush.bf16.msra.mxu2 %v6545_v48  ;;  %3999 = vmatpush.bf16.msra.mxu0 %v6527_v62  ;;  %v6572_v48 = vld [vmem:[#allocation11 + $0x178] sm:$0xff] }
 0x21e   :  { %4012 = vmatpush.bf16.msra.mxu1 %v6535_v36 }
 0x220   :  { %4037 = vmatpush.bf16.msra.mxu3 %v6552_v2  ;;  %v6570_v2 = vld [vmem:[#allocation11 + $0x168] sm:$0xff] }
 0x221   :  { %4024 = vmatpush.bf16.msra.mxu2 %v6544_v0  ;;  %4000 = vmatpush.bf16.msra.mxu0 %v6526_v5  ;;  %v6569_v5 = vld [vmem:[#allocation11 + $0x160] sm:$0xff] }
 0x222   :  { %4013 = vmatpush.bf16.msra.mxu1 %v6534_v6 }
 0x224   :  { %4038 = vmatpush.bf16.msra.mxu3 %v6551_v13 }
 0x225   :  { %4025 = vmatpush.bf16.msra.mxu2 %v6543_v9  ;;  %4001 = vmatpush.bf16.msra.mxu0 %v6525_v17  ;;  %v3395_v35 = vpop.f32.mrf.mxu0 }
 0x226   :  { %4014 = vmatpush.bf16.msra.mxu1 %v6533_v20  ;;  %v3396_v46 = vadd.f32 %v3395_v35, %v1042_v52  ;;  %v6565_v20 = vld [vmem:[#allocation11 + $0x140] sm:$0xff] }
 0x228   :  { %4039 = vmatpush.bf16.msra.mxu3 %v6550_v24  ;;  %4002 = vmatmul.bf16.vlgmr.msra.gmra.mxu0 %v3600_v3  ;;  %v3408_v44 = vpop.f32.mrf.mxu1 }
 0x229   :  { %4046 = vmatpush.bf16.msrb.mxu0 %v6564_v18  ;;  %4026 = vmatpush.bf16.msra.mxu2 %v6542_v22  ;;  %v3409_v7 = vadd.f32 %v3408_v44, %v3396_v46  ;;  %v1043_v18 = vperm.slane %v6969_v37, 5 }
 0x22a   :  { %4015 = vmatmul.bf16.vlgmr.msra.gmra.mxu1 %v3601_v26 }
 0x22b   :  { %4059 = vmatpush.bf16.msrb.mxu1 %v6572_v48 }
 0x22c   :  { %4040 = vmatpush.bf16.msra.mxu3 %v6549_v29 }
 0x22d   :  { %4047 = vmatpush.bf16.msrb.mxu0 %v6563_v25  ;;  %4027 = vmatpush.bf16.msra.mxu2 %v6541_v27  ;;  %v3397_v51 = vpop.f32.mrf.mxu0 }
 0x22f   :  { %4041 = vmatmul.bf16.vlgmr.msra.gmra.mxu3 %v3603_v30  ;;  %4060 = vmatpush.bf16.msrb.mxu1 %v6571_v63 }
 0x230   :  { %4028 = vmatmul.bf16.vlgmr.msra.gmra.mxu2 %v3602_v32  ;;  %v3410_v40 = vpop.f32.mrf.mxu1 }
 0x231   :  { %4048 = vmatpush.bf16.msrb.mxu0 %v6562_v31 }
 0x232   :  { %v3434_v47 = vpop.f32.mrf.mxu3 }
 0x233   :  { %v3421_v42 = vpop.f32.mrf.mxu2  ;;  %4061 = vmatpush.bf16.msrb.mxu1 %v6570_v2 }
 0x234   :  { %v3422_v55 = vadd.f32 %v3421_v42, %v3409_v7 }
 0x235   :  { %4049 = vmatpush.bf16.msrb.mxu0 %v6561_v34 }
 0x236   :  { %v3435_v57 = vadd.f32 %v3434_v47, %v3422_v55 }
 0x237   :  { %4062 = vmatpush.bf16.msrb.mxu1 %v6569_v5 }
 0x239   :  { %4050 = vmatpush.bf16.msrb.mxu0 %v6560_v49  ;;  %v6587_v49 = vld [vmem:[#allocation13] ss:$0 sm:$0xff] }
 0x23a   :  { %v3436_v54 = vpop.f32.mrf.mxu3 }
 0x23b   :  { %v3423_v53 = vpop.f32.mrf.mxu2  ;;  %4063 = vmatpush.bf16.msrb.mxu1 %v6568_v8 }
 0x23d   :  { %4051 = vmatpush.bf16.msrb.mxu0 %v6559_v38 }
 0x23f   :  { %4064 = vmatpush.bf16.msrb.mxu1 %v6567_v11 }
 0x241   :  { %4052 = vmatpush.bf16.msrb.mxu0 %v6558_v41 }
 0x243   :  { %4065 = vmatpush.bf16.msrb.mxu1 %v6566_v15 }
 0x245   :  { %4053 = vmatpush.bf16.msrb.mxu0 %v6557_v50  ;;  %v3447_v10 = vpop.f32.mrf.mxu0 }
 0x246   :  { %v3448_v33 = vadd.f32 %v3447_v10, %v3435_v57 }
 0x247   :  { %4066 = vmatpush.bf16.msrb.mxu1 %v6565_v20 }
 0x248   :  { %v3460_v56 = vpop.f32.mrf.mxu1 }
 0x249   :  { %v3461_v39 = vadd.f32 %v3460_v56, %v3448_v33 }
 0x24d   :  { %v3449_v58 = vpop.f32.mrf.mxu0 }
 0x250   :  { %v3462_v59 = vpop.f32.mrf.mxu1 }
 0x252   :  { %v3486_v45 = vpop.f32.mrf.mxu3 }
 0x253   :  { %v3473_v60 = vpop.f32.mrf.mxu2 }
 0x254   :  { %v3474_v61 = vadd.f32 %v3473_v60, %v3461_v39 }
 0x256   :  { %v3487_v62 = vadd.f32 %v3486_v45, %v3474_v61 }
 0x258   :  { %v3598_v36 = vmax.f32 %v3487_v62, 0.0 }
 0x25a   :  { %v3604_v0 = vpack.c.bf16 %v3598_v36, %v3598_v36  ;;  %v3488_v4 = vpop.f32.mrf.mxu3 }
 0x25b   :  { %v3475_v1 = vpop.f32.mrf.mxu2 }
 0x25c   :  { %4054 = vmatmul.bf16.vlgmr.msrb.gmra.mxu0 %v3604_v0 }
 0x265   :  { %v3499_v6 = vpop.f32.mrf.mxu0 }
 0x266   :  { %v3500_v24 = vadd.f32 %v3499_v6, %v1043_v18 }
 0x268   :  { %v3512_v9 = vpop.f32.mrf.mxu1 }
 0x269   :  { %v3513_v23 = vadd.f32 %v3512_v9, %v3500_v24 }
 0x26d   :  { %v3501_v13 = vpop.f32.mrf.mxu0 }
 0x270   :  { %v3514_v14 = vpop.f32.mrf.mxu1 }
 0x272   :  { %v3538_v19 = vpop.f32.mrf.mxu3 }
 0x273   :  { %v3525_v17 = vpop.f32.mrf.mxu2 }
 0x274   :  { %v3526_v25 = vadd.f32 %v3525_v17, %v3513_v23 }
 0x276   :  { %v3539_v27 = vadd.f32 %v3538_v19, %v3526_v25 }
 0x27a   :  { %v3540_v22 = vpop.f32.mrf.mxu3 }
 0x27b   :  { %v3527_v21 = vpop.f32.mrf.mxu2 }
 0x285   :  { %v3551_v3 = vpop.f32.mrf.mxu0 }
 0x286   :  { %v3552_v16 = vadd.f32 %v3551_v3, %v3539_v27 }
 0x288   :  { %v3564_v26 = vpop.f32.mrf.mxu1 }
 0x289   :  { %v3565_v43 = vadd.f32 %v3564_v26, %v3552_v16 }
 0x28d   :  { %v3553_v28 = vpop.f32.mrf.mxu0 }
 0x290   :  { %v3566_v29 = vpop.f32.mrf.mxu1 }
 0x292   :  { %v3590_v32 = vpop.f32.mrf.mxu3 }
 0x293   :  { %v3577_v12 = vpop.f32.mrf.mxu2 }
 0x294   :  { %v3578_v31 = vadd.f32 %v3577_v12, %v3565_v43 }
 0x296   :  { %v3591_v30 = vadd.f32 %v3590_v32, %v3578_v31 }
 0x298   :  { %v3599_v34 = vmax.f32 %v3591_v30, 0.0 }
 0x29a   :  { %v3605_v35 = vpack.c.bf16 %v3599_v34, %v3599_v34  ;;  %v3592_v37 = vpop.f32.mrf.mxu3 }
 0x29b   :  { %v3579_v44 = vpop.f32.mrf.mxu2 }
 0x29c   :  { %4067 = vmatmul.bf16.vlgmr.msrb.gmra.mxu1 %v3605_v35 }
 0x2a5   :  { %v4003_v38 = vpop.f32.mrf.mxu0 }
 0x2a6   :  { %v4004_v51 = vadd.f32 %v6587_v49, %v4003_v38 }
 0x2a7   :  { %v4016_v40 = vpop.f32.mrf.mxu1 }
 0x2a8   :  { %v4017_v41 = vadd.f32 %v4016_v40, %v4004_v51 }
 0x2ad   :  { %v4005_v42 = vpop.f32.mrf.mxu0 }
 0x2af   :  { %v4018_v47 = vpop.f32.mrf.mxu1 }
 0x2b2   :  { %v4042_v53 = vpop.f32.mrf.mxu3 }
 0x2b3   :  { %v4029_v50 = vpop.f32.mrf.mxu2 }
 0x2b4   :  { %v4030_v52 = vadd.f32 %v4029_v50, %v4017_v41 }
 0x2b6   :  { %v4043_v54 = vadd.f32 %v4042_v53, %v4030_v52 }
 0x2ba   :  { %v4044_v7 = vpop.f32.mrf.mxu3 }
 0x2bb   :  { %v4031_v46 = vpop.f32.mrf.mxu2 }
 0x2d9   :  { %v4055_v10 = vpop.f32.mrf.mxu0 }
 0x2da   :  { %v4056_v56 = vadd.f32 %v4055_v10, %v4043_v54 }
 0x2e1   :  { %v4057_v55 = vpop.f32.mrf.mxu0 }
 0x319   :  { %v4068_v57 = vpop.f32.mrf.mxu1 }
 0x31a   :  { %v4069_v33 = vadd.f32 %v4068_v57, %v4056_v56 }
 0x31c   :  { %4072 = vst [vmem:[#allocation14] sm:$0xff] %v4069_v33 }
 0x31d   :  { %4083 = dma.vmem_to_hbm [thread:$0]  %s4079_s6, 128, %s4081_s15, [#allocation4]  }
 0x321   :  { %v4070_v58 = vpop.f32.mrf.mxu1 }
 0x322   :  { %6789 = dma.done.wait [#allocation4], 128  }
 0x323   :  { %6790 = vsyncadd [#allocation4], 4294967168 }
 0x324   :  { %4088 = vsyncpa [#allocation3], 1 }
 0x325   :  { %4089 = vsyncpa [#allocation6], 1 }
 0x326   :  { %4090 = vsyncpa [#allocation9], 1 }
 0x327   :  { %4091 = vsyncpa [#allocation12], 1 }
 0x328   :  { %4092 = vsyncpa [#allocation4], 1 }

</bundles_post_ra>
